<compile_context>
chip_gen: v7x
topology: tpu7x:2x2x1
jax: 0.10.0
libtpu: 0.0.40
codegen_flags: <defaults>
</compile_context>

<pallas_src>
import functools

import jax
import jax.numpy as jnp
import numpy as np
from jax.experimental import pallas as pl
from jax.experimental.pallas import tpu as pltpu

LANE = 128  # time axis padded to a multiple of the lane width


def _round_up(x, m):
    return (x + m - 1) // m * m


def _choose_batch_tile(B, max_bt=8):
    """Largest divisor of B (<= max_bt), preferring an even number of grid steps."""
    cands = [bt for bt in range(1, min(B, max_bt) + 1) if B % bt == 0]
    even = [bt for bt in cands if (B // bt) % 2 == 0]
    pool = even if even else cands
    return max(pool)


# ---------------------------------------------------------------------------
# Fused kernel: all TemporalBlocks + Linear head, Bt batch elements per step
# ---------------------------------------------------------------------------
def _tcn_fused_kernel(x_ref, *refs, block_cfg, bt):
    """refs = (per-block: w1,b1,w2,b2[,wd,bd]) ... , wf, bf, o_ref (last).

    x_ref: (bt, c_in0, L_pad);  o_ref: (bt, 1, L_pad).
    block_cfg: tuple of (dilation, has_downsample) — static.
    """
    o_ref = refs[-1]
    prefs = refs[:-1]

    # Load every weight exactly once; reused across all bt batch elements.
    vals = [r[...] for r in prefs]

    # Causal-shift wrap masks, computed once per (shift, shape) and reused.
    masks = {}

    def causal_shift(x, s):
        """x[:, t] -> x[:, t - s] with zero fill for t < s (2D, lane axis last)."""
        if s == 0:
            return x
        key = (s, x.shape)
        if key not in masks:
            t = jax.lax.broadcasted_iota(jnp.int32, x.shape, 1)
            masks[key] = t >= s
        rolled = pltpu.roll(x, shift=s, axis=1)          # XLU lane rotate
        return jnp.where(masks[key], rolled, jnp.zeros_like(rolled))

    def tree_sum(terms):
        """Pairwise reduction — log-depth add chain instead of a serial one."""
        while len(terms) > 1:
            nxt = [a + b for a, b in zip(terms[::2], terms[1::2])]
            if len(terms) % 2:
                nxt.append(terms[-1])
            terms = nxt
        return terms[0]

    def contract_terms(w, x):
        """(C_out, C_in) x (C_in, L): list of per-channel partial products."""
        return [w[:, c:c + 1] * x[c:c + 1, :] for c in range(x.shape[0])]

    def causal_conv(w, b, x, d):
        """Causal dilated conv1d with the chomp fused in.

        w: (k, C_out, C_in); b: (C_out, 1); x: (C_in, L) -> (C_out, L).
        Tap j looks back by (k-1-j)*d  ==  chomp(conv1d(x, pad=(k-1)*d, dil=d)).
        """
        k = w.shape[0]
        terms = []
        for j in range(k):
            terms += contract_terms(w[j], causal_shift(x, (k - 1 - j) * d))
        return tree_sum(terms) + b

    # Static unroll over the batch tile: independent chains give the VLIW
    # scheduler work to interleave; weights/masks are shared across them.
    for bi in range(bt):
        h = x_ref[bi]                                    # (c_in, L_pad)
        idx = 0
        for d, has_down in block_cfg:
            w1, b1, w2, b2 = vals[idx], vals[idx + 1], vals[idx + 2], vals[idx + 3]
            idx += 4
            if has_down:
                wd, bd = vals[idx], vals[idx + 1]
                idx += 2
            h1 = causal_conv(w1, b1, h, d)               # conv1 + chomp
            h2 = causal_conv(w2, b2, h1, d)              # conv2 + chomp
            if has_down:
                res = tree_sum(contract_terms(wd, h)) + bd
            else:
                res = h
            h = jnp.maximum(h2 + res, 0.0)               # relu(conv path + residual)
        wf, bf = vals[idx], vals[idx + 1]                # fused Linear(C -> 1) head
        y = tree_sum(contract_terms(wf, h)) + bf         # (1, L_pad)
        o_ref[bi] = y.astype(o_ref.dtype)


# ---------------------------------------------------------------------------
# Host-side: one-time weight packing + jitted forward
# ---------------------------------------------------------------------------
def pack_tcn_params(params):
    """One-time packing of PyTorch-layout params into kernel layout (call once)."""
    f32 = jnp.float32
    packed = {"blocks": []}
    for blk in params["blocks"]:
        pb = {
            # (C_out, C_in, k) -> (k, C_out, C_in)
            "w1": jnp.transpose(blk["W1"].astype(f32), (2, 0, 1)),
            "b1": blk["b1"].astype(f32).reshape(-1, 1),
            "w2": jnp.transpose(blk["W2"].astype(f32), (2, 0, 1)),
            "b2": blk["b2"].astype(f32).reshape(-1, 1),
            "wd": None if blk["Wd"] is None else blk["Wd"].astype(f32),
            "bd": None if blk["bd"] is None else blk["bd"].astype(f32).reshape(-1, 1),
        }
        packed["blocks"].append(pb)
    packed["wf"] = params["W_fc"].astype(f32)            # (1, C_last)
    packed["bf"] = params["b_fc"].astype(f32).reshape(1, 1)
    return packed


@jax.jit
def tcn_forward(x, packed):
    """Pallas TCN forward.  x: (B, L) (args.m == 1)  ->  (B, L, 1)."""
    B, L = x.shape
    f32 = jnp.float32
    L_pad = _round_up(L, LANE)

    # unsqueeze(dim=1) + lane pad only (no channel padding).  The pad is zero
    # and causally inert; it is sliced off once at the very end.
    x3 = jnp.pad(x.astype(f32)[:, None, :], ((0, 0), (0, 0), (0, L_pad - L)))

    bt = _choose_batch_tile(B)

    operands = [x3]
    in_specs = [pl.BlockSpec((bt, 1, L_pad), lambda i: (i, 0, 0))]
    block_cfg = []
    for i, blk in enumerate(packed["blocks"]):
        has_down = blk["wd"] is not None
        block_cfg.append((2 ** i, has_down))
        ws = [blk["w1"], blk["b1"], blk["w2"], blk["b2"]]
        if has_down:
            ws += [blk["wd"], blk["bd"]]
        for w in ws:
            operands.append(w)
            in_specs.append(pl.BlockSpec(w.shape, lambda i, _n=w.ndim: (0,) * _n))
    for w in (packed["wf"], packed["bf"]):
        operands.append(w)
        in_specs.append(pl.BlockSpec(w.shape, lambda i, _n=w.ndim: (0,) * _n))

    kernel = functools.partial(_tcn_fused_kernel, block_cfg=tuple(block_cfg), bt=bt)
    out = pl.pallas_call(
        kernel,
        out_shape=jax.ShapeDtypeStruct((B, 1, L_pad), f32),
        grid=(B // bt,),
        in_specs=in_specs,
        out_specs=pl.BlockSpec((bt, 1, L_pad), lambda i: (i, 0, 0)),
        compiler_params=pltpu.CompilerParams(dimension_semantics=("parallel",)),
    )(*operands)

    # (B, 1, L_pad) -> (B, L, 1): drop lane pad, fold unit channel (free reshape).
    return out[:, 0, :L].reshape(B, L, 1)


def init_tcn_params(key, num_inputs=1, num_channels=(16, 16, 16), kernel_size=2,
                    w_scale=0.3, b_scale=0.1):
    """Random parameters with the same shapes/roles as the PyTorch TCN.

    weight_norm only reparameterizes the conv weight; plain weight tensors
    reproduce the forward math exactly.
    """
    params = {"blocks": []}
    c_in = num_inputs
    for c_out in num_channels:
        key, k1, k2, k3, k4, k5, k6 = jax.random.split(key, 7)
        blk = {
            "W1": w_scale * jax.random.normal(k1, (c_out, c_in, kernel_size), jnp.float32),
            "b1": b_scale * jax.random.normal(k2, (c_out,), jnp.float32),
            "W2": w_scale * jax.random.normal(k3, (c_out, c_out, kernel_size), jnp.float32),
            "b2": b_scale * jax.random.normal(k4, (c_out,), jnp.float32),
            "Wd": (w_scale * jax.random.normal(k5, (c_out, c_in), jnp.float32)
                   if c_in != c_out else None),
            "bd": (b_scale * jax.random.normal(k6, (c_out,), jnp.float32)
                   if c_in != c_out else None),
        }
        params["blocks"].append(blk)
        c_in = c_out
    key, k7, k8 = jax.random.split(key, 3)
    params["W_fc"] = w_scale * jax.random.normal(k7, (1, c_in), jnp.float32)
    params["b_fc"] = b_scale * jax.random.normal(k8, (1,), jnp.float32)
    return params


# ---------------------------------------------------------------------------
# NumPy float64 reference (literal PyTorch semantics: conv1d(pad) + chomp, ...)
# ---------------------------------------------------------------------------
def _ref_causal_conv_np(x, W, b, d):
    Bn, _, L = x.shape
    C_out, _, k = W.shape
    y = np.zeros((Bn, C_out, L), np.float64)
    for j in range(k):
        s = (k - 1 - j) * d
        if s == 0:
            xs = x
        else:
            xs = np.zeros_like(x)
            xs[:, :, s:] = x[:, :, :L - s]
        y += np.einsum("oc,bcl->bol", W[:, :, j], xs)
    return y + b[None, :, None]


def ref_tcn_np(x, params):
    x = np.asarray(x, np.float64)
    h = x[:, None, :]                                   # unsqueeze(dim=1)
    for i, blk in enumerate(params["blocks"]):
        d = 2 ** i
        W1 = np.asarray(blk["W1"], np.float64); b1 = np.asarray(blk["b1"], np.float64)
        W2 = np.asarray(blk["W2"], np.float64); b2 = np.asarray(blk["b2"], np.float64)
        h1 = _ref_causal_conv_np(h, W1, b1, d)          # conv1 + chomp
        h2 = _ref_causal_conv_np(h1, W2, b2, d)         # conv2 + chomp
        if blk["Wd"] is not None:
            Wd = np.asarray(blk["Wd"], np.float64); bd = np.asarray(blk["bd"], np.float64)
            res = np.einsum("oc,bcl->bol", Wd, h) + bd[None, :, None]
        else:
            res = h
        h = np.maximum(h2 + res, 0.0)                   # relu(x + res)
    Wf = np.asarray(params["W_fc"], np.float64); bf = np.asarray(params["b_fc"], np.float64)
    return np.einsum("bcl,oc->blo", h, Wf) + bf[None, None, :]


if __name__ == "__main__":
    B, L = 2, 20                   # x: (B, L); TCN.forward unsqueezes to (B, 1, L)
    num_channels = (16, 16, 16)    # TCN defaults
    kernel_size = 2

    key = jax.random.PRNGKey(0)
    key, kx = jax.random.split(key)
    x = jax.random.normal(kx, (B, L), jnp.float32)
    params = init_tcn_params(key, num_inputs=1, num_channels=num_channels,
                             kernel_size=kernel_size)

    packed = pack_tcn_params(params)   # one-time packing, outside the jitted forward
    out = tcn_forward(x, packed)
    out = jax.block_until_ready(out)
    assert out.shape == (B, L, 1), out.shape

    ref = ref_tcn_np(np.asarray(x), params)
    err = float(np.max(np.abs(np.asarray(out, np.float64) - ref)))
    assert np.allclose(np.asarray(out, np.float64), ref, rtol=1e-3, atol=1e-3), err

    print("KERNEL_OK")
</pallas_src>

<mosaic_0001>
module attributes {stable_mosaic.version = 11 : i64} {
  func.func @_tcn_fused_kernel(%arg0: i32, %arg1: memref<1x1x128xf32, #tpu.memory_space<vmem>>, %arg2: memref<2x16x1xf32, #tpu.memory_space<vmem>>, %arg3: memref<16x1xf32, #tpu.memory_space<vmem>>, %arg4: memref<2x16x16xf32, #tpu.memory_space<vmem>>, %arg5: memref<16x1xf32, #tpu.memory_space<vmem>>, %arg6: memref<16x1xf32, #tpu.memory_space<vmem>>, %arg7: memref<16x1xf32, #tpu.memory_space<vmem>>, %arg8: memref<2x16x16xf32, #tpu.memory_space<vmem>>, %arg9: memref<16x1xf32, #tpu.memory_space<vmem>>, %arg10: memref<2x16x16xf32, #tpu.memory_space<vmem>>, %arg11: memref<16x1xf32, #tpu.memory_space<vmem>>, %arg12: memref<2x16x16xf32, #tpu.memory_space<vmem>>, %arg13: memref<16x1xf32, #tpu.memory_space<vmem>>, %arg14: memref<2x16x16xf32, #tpu.memory_space<vmem>>, %arg15: memref<16x1xf32, #tpu.memory_space<vmem>>, %arg16: memref<1x16xf32, #tpu.memory_space<vmem>>, %arg17: memref<1x1xf32, #tpu.memory_space<vmem>>, %arg18: memref<1x1x128xf32, #tpu.memory_space<vmem>>) attributes {dimension_semantics = [#tpu.dimension_semantics<parallel>], iteration_bounds = array<i64: 2>, scalar_prefetch = 0 : i64, scratch_operands = 0 : i64, tpu.core_type = #tpu.core_type<tc>, window_params = [{transform_indices = @transform_0, window_bounds = array<i64: 1, 1, 128>}, {pipeline_mode = #tpu.pipeline_mode<synchronous>, transform_indices = @transform_1, window_bounds = array<i64: 2, 16, 1>}, {pipeline_mode = #tpu.pipeline_mode<synchronous>, transform_indices = @transform_2, window_bounds = array<i64: 16, 1>}, {pipeline_mode = #tpu.pipeline_mode<synchronous>, transform_indices = @transform_3, window_bounds = array<i64: 2, 16, 16>}, {pipeline_mode = #tpu.pipeline_mode<synchronous>, transform_indices = @transform_4, window_bounds = array<i64: 16, 1>}, {pipeline_mode = #tpu.pipeline_mode<synchronous>, transform_indices = @transform_5, window_bounds = array<i64: 16, 1>}, {pipeline_mode = #tpu.pipeline_mode<synchronous>, transform_indices = @transform_6, window_bounds = array<i64: 16, 1>}, {pipeline_mode = #tpu.pipeline_mode<synchronous>, transform_indices = @transform_7, window_bounds = array<i64: 2, 16, 16>}, {pipeline_mode = #tpu.pipeline_mode<synchronous>, transform_indices = @transform_8, window_bounds = array<i64: 16, 1>}, {pipeline_mode = #tpu.pipeline_mode<synchronous>, transform_indices = @transform_9, window_bounds = array<i64: 2, 16, 16>}, {pipeline_mode = #tpu.pipeline_mode<synchronous>, transform_indices = @transform_10, window_bounds = array<i64: 16, 1>}, {pipeline_mode = #tpu.pipeline_mode<synchronous>, transform_indices = @transform_11, window_bounds = array<i64: 2, 16, 16>}, {pipeline_mode = #tpu.pipeline_mode<synchronous>, transform_indices = @transform_12, window_bounds = array<i64: 16, 1>}, {pipeline_mode = #tpu.pipeline_mode<synchronous>, transform_indices = @transform_13, window_bounds = array<i64: 2, 16, 16>}, {pipeline_mode = #tpu.pipeline_mode<synchronous>, transform_indices = @transform_14, window_bounds = array<i64: 16, 1>}, {pipeline_mode = #tpu.pipeline_mode<synchronous>, transform_indices = @transform_15, window_bounds = array<i64: 1, 16>}, {pipeline_mode = #tpu.pipeline_mode<synchronous>, transform_indices = @transform_16, window_bounds = array<i64: 1, 1>}, {transform_indices = @transform_17, window_bounds = array<i64: 1, 1, 128>}]} {
    %c0 = arith.constant 0 : index
    %c0_0 = arith.constant 0 : index
    %c0_1 = arith.constant 0 : index
    %0 = vector.load %arg2[%c0, %c0_0, %c0_1] : memref<2x16x1xf32, #tpu.memory_space<vmem>>, vector<2x16x1xf32>
    %c0_2 = arith.constant 0 : index
    %c0_3 = arith.constant 0 : index
    %1 = vector.load %arg3[%c0_2, %c0_3] : memref<16x1xf32, #tpu.memory_space<vmem>>, vector<16x1xf32>
    %c0_4 = arith.constant 0 : index
    %c0_5 = arith.constant 0 : index
    %c0_6 = arith.constant 0 : index
    %2 = vector.load %arg4[%c0_4, %c0_5, %c0_6] : memref<2x16x16xf32, #tpu.memory_space<vmem>>, vector<2x16x16xf32>
    %c0_7 = arith.constant 0 : index
    %c0_8 = arith.constant 0 : index
    %3 = vector.load %arg5[%c0_7, %c0_8] : memref<16x1xf32, #tpu.memory_space<vmem>>, vector<16x1xf32>
    %c0_9 = arith.constant 0 : index
    %c0_10 = arith.constant 0 : index
    %4 = vector.load %arg6[%c0_9, %c0_10] : memref<16x1xf32, #tpu.memory_space<vmem>>, vector<16x1xf32>
    %c0_11 = arith.constant 0 : index
    %c0_12 = arith.constant 0 : index
    %5 = vector.load %arg7[%c0_11, %c0_12] : memref<16x1xf32, #tpu.memory_space<vmem>>, vector<16x1xf32>
    %c0_13 = arith.constant 0 : index
    %c0_14 = arith.constant 0 : index
    %c0_15 = arith.constant 0 : index
    %6 = vector.load %arg8[%c0_13, %c0_14, %c0_15] : memref<2x16x16xf32, #tpu.memory_space<vmem>>, vector<2x16x16xf32>
    %c0_16 = arith.constant 0 : index
    %c0_17 = arith.constant 0 : index
    %7 = vector.load %arg9[%c0_16, %c0_17] : memref<16x1xf32, #tpu.memory_space<vmem>>, vector<16x1xf32>
    %c0_18 = arith.constant 0 : index
    %c0_19 = arith.constant 0 : index
    %c0_20 = arith.constant 0 : index
    %8 = vector.load %arg10[%c0_18, %c0_19, %c0_20] : memref<2x16x16xf32, #tpu.memory_space<vmem>>, vector<2x16x16xf32>
    %c0_21 = arith.constant 0 : index
    %c0_22 = arith.constant 0 : index
    %9 = vector.load %arg11[%c0_21, %c0_22] : memref<16x1xf32, #tpu.memory_space<vmem>>, vector<16x1xf32>
    %c0_23 = arith.constant 0 : index
    %c0_24 = arith.constant 0 : index
    %c0_25 = arith.constant 0 : index
    %10 = vector.load %arg12[%c0_23, %c0_24, %c0_25] : memref<2x16x16xf32, #tpu.memory_space<vmem>>, vector<2x16x16xf32>
    %c0_26 = arith.constant 0 : index
    %c0_27 = arith.constant 0 : index
    %11 = vector.load %arg13[%c0_26, %c0_27] : memref<16x1xf32, #tpu.memory_space<vmem>>, vector<16x1xf32>
    %c0_28 = arith.constant 0 : index
    %c0_29 = arith.constant 0 : index
    %c0_30 = arith.constant 0 : index
    %12 = vector.load %arg14[%c0_28, %c0_29, %c0_30] : memref<2x16x16xf32, #tpu.memory_space<vmem>>, vector<2x16x16xf32>
    %c0_31 = arith.constant 0 : index
    %c0_32 = arith.constant 0 : index
    %13 = vector.load %arg15[%c0_31, %c0_32] : memref<16x1xf32, #tpu.memory_space<vmem>>, vector<16x1xf32>
    %c0_33 = arith.constant 0 : index
    %c0_34 = arith.constant 0 : index
    %14 = vector.load %arg16[%c0_33, %c0_34] : memref<1x16xf32, #tpu.memory_space<vmem>>, vector<1x16xf32>
    %c0_35 = arith.constant 0 : index
    %c0_36 = arith.constant 0 : index
    %15 = vector.load %arg17[%c0_35, %c0_36] : memref<1x1xf32, #tpu.memory_space<vmem>>, vector<1x1xf32>
    %c0_37 = arith.constant 0 : index
    %c0_38 = arith.constant 0 : index
    %c0_39 = arith.constant 0 : index
    %16 = vector.load %arg1[%c0_37, %c0_38, %c0_39] : memref<1x1x128xf32, #tpu.memory_space<vmem>>, vector<1x1x128xf32>
    %17 = vector.shape_cast %16 : vector<1x1x128xf32> to vector<1x128xf32>
    %18 = vector.extract_strided_slice %0 {offsets = [0, 0, 0], sizes = [1, 16, 1], strides = [1, 1, 1]} : vector<2x16x1xf32> to vector<1x16x1xf32>
    %19 = vector.shape_cast %18 : vector<1x16x1xf32> to vector<16x1xf32>
    %20 = tpu.iota {dimensions = array<i32: 1>} : vector<1x128xi32>
    %c1_i32 = arith.constant 1 : i32
    %21 = vector.broadcast %c1_i32 : i32 to vector<1x128xi32>
    %22 = arith.cmpi sge, %20, %21 : vector<1x128xi32>
    %c1_i32_40 = arith.constant 1 : i32
    %23 = tpu.dynamic_rotate %17 by %c1_i32_40 dim 1 : vector<1x128xf32>, i32 -> vector<1x128xf32>
    %cst = arith.constant 0.000000e+00 : f32
    %24 = vector.broadcast %cst : f32 to vector<1x128xf32>
    %25 = arith.select %22, %23, %24 : vector<1x128xi1>, vector<1x128xf32>
    %26 = vector.broadcast %19 : vector<16x1xf32> to vector<16x128xf32>
    %27 = vector.broadcast %25 : vector<1x128xf32> to vector<16x128xf32>
    %28 = arith.mulf %26, %27 : vector<16x128xf32>
    %29 = vector.extract_strided_slice %0 {offsets = [1, 0, 0], sizes = [1, 16, 1], strides = [1, 1, 1]} : vector<2x16x1xf32> to vector<1x16x1xf32>
    %30 = vector.shape_cast %29 : vector<1x16x1xf32> to vector<16x1xf32>
    %31 = vector.broadcast %30 : vector<16x1xf32> to vector<16x128xf32>
    %32 = vector.broadcast %17 : vector<1x128xf32> to vector<16x128xf32>
    %33 = arith.mulf %31, %32 : vector<16x128xf32>
    %34 = arith.addf %28, %33 : vector<16x128xf32>
    %35 = vector.broadcast %1 : vector<16x1xf32> to vector<16x128xf32>
    %36 = arith.addf %34, %35 : vector<16x128xf32>
    %37 = vector.extract_strided_slice %2 {offsets = [0, 0, 0], sizes = [1, 16, 16], strides = [1, 1, 1]} : vector<2x16x16xf32> to vector<1x16x16xf32>
    %38 = vector.shape_cast %37 : vector<1x16x16xf32> to vector<16x16xf32>
    %39 = tpu.iota {dimensions = array<i32: 1>} : vector<16x128xi32>
    %c1_i32_41 = arith.constant 1 : i32
    %40 = vector.broadcast %c1_i32_41 : i32 to vector<16x128xi32>
    %41 = arith.cmpi sge, %39, %40 : vector<16x128xi32>
    %c1_i32_42 = arith.constant 1 : i32
    %42 = tpu.dynamic_rotate %36 by %c1_i32_42 dim 1 : vector<16x128xf32>, i32 -> vector<16x128xf32>
    %cst_43 = arith.constant 0.000000e+00 : f32
    %43 = vector.broadcast %cst_43 : f32 to vector<16x128xf32>
    %44 = arith.select %41, %42, %43 : vector<16x128xi1>, vector<16x128xf32>
    %45 = vector.extract_strided_slice %38 {offsets = [0, 0], sizes = [16, 1], strides = [1, 1]} : vector<16x16xf32> to vector<16x1xf32>
    %46 = vector.extract_strided_slice %44 {offsets = [0, 0], sizes = [1, 128], strides = [1, 1]} : vector<16x128xf32> to vector<1x128xf32>
    %47 = vector.broadcast %45 : vector<16x1xf32> to vector<16x128xf32>
    %48 = vector.broadcast %46 : vector<1x128xf32> to vector<16x128xf32>
    %49 = arith.mulf %47, %48 : vector<16x128xf32>
    %50 = vector.extract_strided_slice %38 {offsets = [0, 1], sizes = [16, 1], strides = [1, 1]} : vector<16x16xf32> to vector<16x1xf32>
    %51 = vector.extract_strided_slice %44 {offsets = [1, 0], sizes = [1, 128], strides = [1, 1]} : vector<16x128xf32> to vector<1x128xf32>
    %52 = vector.broadcast %50 : vector<16x1xf32> to vector<16x128xf32>
    %53 = vector.broadcast %51 : vector<1x128xf32> to vector<16x128xf32>
    %54 = arith.mulf %52, %53 : vector<16x128xf32>
    %55 = vector.extract_strided_slice %38 {offsets = [0, 2], sizes = [16, 1], strides = [1, 1]} : vector<16x16xf32> to vector<16x1xf32>
    %56 = vector.extract_strided_slice %44 {offsets = [2, 0], sizes = [1, 128], strides = [1, 1]} : vector<16x128xf32> to vector<1x128xf32>
    %57 = vector.broadcast %55 : vector<16x1xf32> to vector<16x128xf32>
    %58 = vector.broadcast %56 : vector<1x128xf32> to vector<16x128xf32>
    %59 = arith.mulf %57, %58 : vector<16x128xf32>
    %60 = vector.extract_strided_slice %38 {offsets = [0, 3], sizes = [16, 1], strides = [1, 1]} : vector<16x16xf32> to vector<16x1xf32>
    %61 = vector.extract_strided_slice %44 {offsets = [3, 0], sizes = [1, 128], strides = [1, 1]} : vector<16x128xf32> to vector<1x128xf32>
    %62 = vector.broadcast %60 : vector<16x1xf32> to vector<16x128xf32>
    %63 = vector.broadcast %61 : vector<1x128xf32> to vector<16x128xf32>
    %64 = arith.mulf %62, %63 : vector<16x128xf32>
    %65 = vector.extract_strided_slice %38 {offsets = [0, 4], sizes = [16, 1], strides = [1, 1]} : vector<16x16xf32> to vector<16x1xf32>
    %66 = vector.extract_strided_slice %44 {offsets = [4, 0], sizes = [1, 128], strides = [1, 1]} : vector<16x128xf32> to vector<1x128xf32>
    %67 = vector.broadcast %65 : vector<16x1xf32> to vector<16x128xf32>
    %68 = vector.broadcast %66 : vector<1x128xf32> to vector<16x128xf32>
    %69 = arith.mulf %67, %68 : vector<16x128xf32>
    %70 = vector.extract_strided_slice %38 {offsets = [0, 5], sizes = [16, 1], strides = [1, 1]} : vector<16x16xf32> to vector<16x1xf32>
    %71 = vector.extract_strided_slice %44 {offsets = [5, 0], sizes = [1, 128], strides = [1, 1]} : vector<16x128xf32> to vector<1x128xf32>
    %72 = vector.broadcast %70 : vector<16x1xf32> to vector<16x128xf32>
    %73 = vector.broadcast %71 : vector<1x128xf32> to vector<16x128xf32>
    %74 = arith.mulf %72, %73 : vector<16x128xf32>
    %75 = vector.extract_strided_slice %38 {offsets = [0, 6], sizes = [16, 1], strides = [1, 1]} : vector<16x16xf32> to vector<16x1xf32>
    %76 = vector.extract_strided_slice %44 {offsets = [6, 0], sizes = [1, 128], strides = [1, 1]} : vector<16x128xf32> to vector<1x128xf32>
    %77 = vector.broadcast %75 : vector<16x1xf32> to vector<16x128xf32>
    %78 = vector.broadcast %76 : vector<1x128xf32> to vector<16x128xf32>
    %79 = arith.mulf %77, %78 : vector<16x128xf32>
    %80 = vector.extract_strided_slice %38 {offsets = [0, 7], sizes = [16, 1], strides = [1, 1]} : vector<16x16xf32> to vector<16x1xf32>
    %81 = vector.extract_strided_slice %44 {offsets = [7, 0], sizes = [1, 128], strides = [1, 1]} : vector<16x128xf32> to vector<1x128xf32>
    %82 = vector.broadcast %80 : vector<16x1xf32> to vector<16x128xf32>
    %83 = vector.broadcast %81 : vector<1x128xf32> to vector<16x128xf32>
    %84 = arith.mulf %82, %83 : vector<16x128xf32>
    %85 = vector.extract_strided_slice %38 {offsets = [0, 8], sizes = [16, 1], strides = [1, 1]} : vector<16x16xf32> to vector<16x1xf32>
    %86 = vector.extract_strided_slice %44 {offsets = [8, 0], sizes = [1, 128], strides = [1, 1]} : vector<16x128xf32> to vector<1x128xf32>
    %87 = vector.broadcast %85 : vector<16x1xf32> to vector<16x128xf32>
    %88 = vector.broadcast %86 : vector<1x128xf32> to vector<16x128xf32>
    %89 = arith.mulf %87, %88 : vector<16x128xf32>
    %90 = vector.extract_strided_slice %38 {offsets = [0, 9], sizes = [16, 1], strides = [1, 1]} : vector<16x16xf32> to vector<16x1xf32>
    %91 = vector.extract_strided_slice %44 {offsets = [9, 0], sizes = [1, 128], strides = [1, 1]} : vector<16x128xf32> to vector<1x128xf32>
    %92 = vector.broadcast %90 : vector<16x1xf32> to vector<16x128xf32>
    %93 = vector.broadcast %91 : vector<1x128xf32> to vector<16x128xf32>
    %94 = arith.mulf %92, %93 : vector<16x128xf32>
    %95 = vector.extract_strided_slice %38 {offsets = [0, 10], sizes = [16, 1], strides = [1, 1]} : vector<16x16xf32> to vector<16x1xf32>
    %96 = vector.extract_strided_slice %44 {offsets = [10, 0], sizes = [1, 128], strides = [1, 1]} : vector<16x128xf32> to vector<1x128xf32>
    %97 = vector.broadcast %95 : vector<16x1xf32> to vector<16x128xf32>
    %98 = vector.broadcast %96 : vector<1x128xf32> to vector<16x128xf32>
    %99 = arith.mulf %97, %98 : vector<16x128xf32>
    %100 = vector.extract_strided_slice %38 {offsets = [0, 11], sizes = [16, 1], strides = [1, 1]} : vector<16x16xf32> to vector<16x1xf32>
    %101 = vector.extract_strided_slice %44 {offsets = [11, 0], sizes = [1, 128], strides = [1, 1]} : vector<16x128xf32> to vector<1x128xf32>
    %102 = vector.broadcast %100 : vector<16x1xf32> to vector<16x128xf32>
    %103 = vector.broadcast %101 : vector<1x128xf32> to vector<16x128xf32>
    %104 = arith.mulf %102, %103 : vector<16x128xf32>
    %105 = vector.extract_strided_slice %38 {offsets = [0, 12], sizes = [16, 1], strides = [1, 1]} : vector<16x16xf32> to vector<16x1xf32>
    %106 = vector.extract_strided_slice %44 {offsets = [12, 0], sizes = [1, 128], strides = [1, 1]} : vector<16x128xf32> to vector<1x128xf32>
    %107 = vector.broadcast %105 : vector<16x1xf32> to vector<16x128xf32>
    %108 = vector.broadcast %106 : vector<1x128xf32> to vector<16x128xf32>
    %109 = arith.mulf %107, %108 : vector<16x128xf32>
    %110 = vector.extract_strided_slice %38 {offsets = [0, 13], sizes = [16, 1], strides = [1, 1]} : vector<16x16xf32> to vector<16x1xf32>
    %111 = vector.extract_strided_slice %44 {offsets = [13, 0], sizes = [1, 128], strides = [1, 1]} : vector<16x128xf32> to vector<1x128xf32>
    %112 = vector.broadcast %110 : vector<16x1xf32> to vector<16x128xf32>
    %113 = vector.broadcast %111 : vector<1x128xf32> to vector<16x128xf32>
    %114 = arith.mulf %112, %113 : vector<16x128xf32>
    %115 = vector.extract_strided_slice %38 {offsets = [0, 14], sizes = [16, 1], strides = [1, 1]} : vector<16x16xf32> to vector<16x1xf32>
    %116 = vector.extract_strided_slice %44 {offsets = [14, 0], sizes = [1, 128], strides = [1, 1]} : vector<16x128xf32> to vector<1x128xf32>
    %117 = vector.broadcast %115 : vector<16x1xf32> to vector<16x128xf32>
    %118 = vector.broadcast %116 : vector<1x128xf32> to vector<16x128xf32>
    %119 = arith.mulf %117, %118 : vector<16x128xf32>
    %120 = vector.extract_strided_slice %38 {offsets = [0, 15], sizes = [16, 1], strides = [1, 1]} : vector<16x16xf32> to vector<16x1xf32>
    %121 = vector.extract_strided_slice %44 {offsets = [15, 0], sizes = [1, 128], strides = [1, 1]} : vector<16x128xf32> to vector<1x128xf32>
    %122 = vector.broadcast %120 : vector<16x1xf32> to vector<16x128xf32>
    %123 = vector.broadcast %121 : vector<1x128xf32> to vector<16x128xf32>
    %124 = arith.mulf %122, %123 : vector<16x128xf32>
    %125 = vector.extract_strided_slice %2 {offsets = [1, 0, 0], sizes = [1, 16, 16], strides = [1, 1, 1]} : vector<2x16x16xf32> to vector<1x16x16xf32>
    %126 = vector.shape_cast %125 : vector<1x16x16xf32> to vector<16x16xf32>
    %127 = vector.extract_strided_slice %126 {offsets = [0, 0], sizes = [16, 1], strides = [1, 1]} : vector<16x16xf32> to vector<16x1xf32>
    %128 = vector.extract_strided_slice %36 {offsets = [0, 0], sizes = [1, 128], strides = [1, 1]} : vector<16x128xf32> to vector<1x128xf32>
    %129 = vector.broadcast %127 : vector<16x1xf32> to vector<16x128xf32>
    %130 = vector.broadcast %128 : vector<1x128xf32> to vector<16x128xf32>
    %131 = arith.mulf %129, %130 : vector<16x128xf32>
    %132 = vector.extract_strided_slice %126 {offsets = [0, 1], sizes = [16, 1], strides = [1, 1]} : vector<16x16xf32> to vector<16x1xf32>
    %133 = vector.extract_strided_slice %36 {offsets = [1, 0], sizes = [1, 128], strides = [1, 1]} : vector<16x128xf32> to vector<1x128xf32>
    %134 = vector.broadcast %132 : vector<16x1xf32> to vector<16x128xf32>
    %135 = vector.broadcast %133 : vector<1x128xf32> to vector<16x128xf32>
    %136 = arith.mulf %134, %135 : vector<16x128xf32>
    %137 = vector.extract_strided_slice %126 {offsets = [0, 2], sizes = [16, 1], strides = [1, 1]} : vector<16x16xf32> to vector<16x1xf32>
    %138 = vector.extract_strided_slice %36 {offsets = [2, 0], sizes = [1, 128], strides = [1, 1]} : vector<16x128xf32> to vector<1x128xf32>
    %139 = vector.broadcast %137 : vector<16x1xf32> to vector<16x128xf32>
    %140 = vector.broadcast %138 : vector<1x128xf32> to vector<16x128xf32>
    %141 = arith.mulf %139, %140 : vector<16x128xf32>
    %142 = vector.extract_strided_slice %126 {offsets = [0, 3], sizes = [16, 1], strides = [1, 1]} : vector<16x16xf32> to vector<16x1xf32>
    %143 = vector.extract_strided_slice %36 {offsets = [3, 0], sizes = [1, 128], strides = [1, 1]} : vector<16x128xf32> to vector<1x128xf32>
    %144 = vector.broadcast %142 : vector<16x1xf32> to vector<16x128xf32>
    %145 = vector.broadcast %143 : vector<1x128xf32> to vector<16x128xf32>
    %146 = arith.mulf %144, %145 : vector<16x128xf32>
    %147 = vector.extract_strided_slice %126 {offsets = [0, 4], sizes = [16, 1], strides = [1, 1]} : vector<16x16xf32> to vector<16x1xf32>
    %148 = vector.extract_strided_slice %36 {offsets = [4, 0], sizes = [1, 128], strides = [1, 1]} : vector<16x128xf32> to vector<1x128xf32>
    %149 = vector.broadcast %147 : vector<16x1xf32> to vector<16x128xf32>
    %150 = vector.broadcast %148 : vector<1x128xf32> to vector<16x128xf32>
    %151 = arith.mulf %149, %150 : vector<16x128xf32>
    %152 = vector.extract_strided_slice %126 {offsets = [0, 5], sizes = [16, 1], strides = [1, 1]} : vector<16x16xf32> to vector<16x1xf32>
    %153 = vector.extract_strided_slice %36 {offsets = [5, 0], sizes = [1, 128], strides = [1, 1]} : vector<16x128xf32> to vector<1x128xf32>
    %154 = vector.broadcast %152 : vector<16x1xf32> to vector<16x128xf32>
    %155 = vector.broadcast %153 : vector<1x128xf32> to vector<16x128xf32>
    %156 = arith.mulf %154, %155 : vector<16x128xf32>
    %157 = vector.extract_strided_slice %126 {offsets = [0, 6], sizes = [16, 1], strides = [1, 1]} : vector<16x16xf32> to vector<16x1xf32>
    %158 = vector.extract_strided_slice %36 {offsets = [6, 0], sizes = [1, 128], strides = [1, 1]} : vector<16x128xf32> to vector<1x128xf32>
    %159 = vector.broadcast %157 : vector<16x1xf32> to vector<16x128xf32>
    %160 = vector.broadcast %158 : vector<1x128xf32> to vector<16x128xf32>
    %161 = arith.mulf %159, %160 : vector<16x128xf32>
    %162 = vector.extract_strided_slice %126 {offsets = [0, 7], sizes = [16, 1], strides = [1, 1]} : vector<16x16xf32> to vector<16x1xf32>
    %163 = vector.extract_strided_slice %36 {offsets = [7, 0], sizes = [1, 128], strides = [1, 1]} : vector<16x128xf32> to vector<1x128xf32>
    %164 = vector.broadcast %162 : vector<16x1xf32> to vector<16x128xf32>
    %165 = vector.broadcast %163 : vector<1x128xf32> to vector<16x128xf32>
    %166 = arith.mulf %164, %165 : vector<16x128xf32>
    %167 = vector.extract_strided_slice %126 {offsets = [0, 8], sizes = [16, 1], strides = [1, 1]} : vector<16x16xf32> to vector<16x1xf32>
    %168 = vector.extract_strided_slice %36 {offsets = [8, 0], sizes = [1, 128], strides = [1, 1]} : vector<16x128xf32> to vector<1x128xf32>
    %169 = vector.broadcast %167 : vector<16x1xf32> to vector<16x128xf32>
    %170 = vector.broadcast %168 : vector<1x128xf32> to vector<16x128xf32>
    %171 = arith.mulf %169, %170 : vector<16x128xf32>
    %172 = vector.extract_strided_slice %126 {offsets = [0, 9], sizes = [16, 1], strides = [1, 1]} : vector<16x16xf32> to vector<16x1xf32>
    %173 = vector.extract_strided_slice %36 {offsets = [9, 0], sizes = [1, 128], strides = [1, 1]} : vector<16x128xf32> to vector<1x128xf32>
    %174 = vector.broadcast %172 : vector<16x1xf32> to vector<16x128xf32>
    %175 = vector.broadcast %173 : vector<1x128xf32> to vector<16x128xf32>
    %176 = arith.mulf %174, %175 : vector<16x128xf32>
    %177 = vector.extract_strided_slice %126 {offsets = [0, 10], sizes = [16, 1], strides = [1, 1]} : vector<16x16xf32> to vector<16x1xf32>
    %178 = vector.extract_strided_slice %36 {offsets = [10, 0], sizes = [1, 128], strides = [1, 1]} : vector<16x128xf32> to vector<1x128xf32>
    %179 = vector.broadcast %177 : vector<16x1xf32> to vector<16x128xf32>
    %180 = vector.broadcast %178 : vector<1x128xf32> to vector<16x128xf32>
    %181 = arith.mulf %179, %180 : vector<16x128xf32>
    %182 = vector.extract_strided_slice %126 {offsets = [0, 11], sizes = [16, 1], strides = [1, 1]} : vector<16x16xf32> to vector<16x1xf32>
    %183 = vector.extract_strided_slice %36 {offsets = [11, 0], sizes = [1, 128], strides = [1, 1]} : vector<16x128xf32> to vector<1x128xf32>
    %184 = vector.broadcast %182 : vector<16x1xf32> to vector<16x128xf32>
    %185 = vector.broadcast %183 : vector<1x128xf32> to vector<16x128xf32>
    %186 = arith.mulf %184, %185 : vector<16x128xf32>
    %187 = vector.extract_strided_slice %126 {offsets = [0, 12], sizes = [16, 1], strides = [1, 1]} : vector<16x16xf32> to vector<16x1xf32>
    %188 = vector.extract_strided_slice %36 {offsets = [12, 0], sizes = [1, 128], strides = [1, 1]} : vector<16x128xf32> to vector<1x128xf32>
    %189 = vector.broadcast %187 : vector<16x1xf32> to vector<16x128xf32>
    %190 = vector.broadcast %188 : vector<1x128xf32> to vector<16x128xf32>
    %191 = arith.mulf %189, %190 : vector<16x128xf32>
    %192 = vector.extract_strided_slice %126 {offsets = [0, 13], sizes = [16, 1], strides = [1, 1]} : vector<16x16xf32> to vector<16x1xf32>
    %193 = vector.extract_strided_slice %36 {offsets = [13, 0], sizes = [1, 128], strides = [1, 1]} : vector<16x128xf32> to vector<1x128xf32>
    %194 = vector.broadcast %192 : vector<16x1xf32> to vector<16x128xf32>
    %195 = vector.broadcast %193 : vector<1x128xf32> to vector<16x128xf32>
    %196 = arith.mulf %194, %195 : vector<16x128xf32>
    %197 = vector.extract_strided_slice %126 {offsets = [0, 14], sizes = [16, 1], strides = [1, 1]} : vector<16x16xf32> to vector<16x1xf32>
    %198 = vector.extract_strided_slice %36 {offsets = [14, 0], sizes = [1, 128], strides = [1, 1]} : vector<16x128xf32> to vector<1x128xf32>
    %199 = vector.broadcast %197 : vector<16x1xf32> to vector<16x128xf32>
    %200 = vector.broadcast %198 : vector<1x128xf32> to vector<16x128xf32>
    %201 = arith.mulf %199, %200 : vector<16x128xf32>
    %202 = vector.extract_strided_slice %126 {offsets = [0, 15], sizes = [16, 1], strides = [1, 1]} : vector<16x16xf32> to vector<16x1xf32>
    %203 = vector.extract_strided_slice %36 {offsets = [15, 0], sizes = [1, 128], strides = [1, 1]} : vector<16x128xf32> to vector<1x128xf32>
    %204 = vector.broadcast %202 : vector<16x1xf32> to vector<16x128xf32>
    %205 = vector.broadcast %203 : vector<1x128xf32> to vector<16x128xf32>
    %206 = arith.mulf %204, %205 : vector<16x128xf32>
    %207 = arith.addf %49, %54 : vector<16x128xf32>
    %208 = arith.addf %59, %64 : vector<16x128xf32>
    %209 = arith.addf %69, %74 : vector<16x128xf32>
    %210 = arith.addf %79, %84 : vector<16x128xf32>
    %211 = arith.addf %89, %94 : vector<16x128xf32>
    %212 = arith.addf %99, %104 : vector<16x128xf32>
    %213 = arith.addf %109, %114 : vector<16x128xf32>
    %214 = arith.addf %119, %124 : vector<16x128xf32>
    %215 = arith.addf %131, %136 : vector<16x128xf32>
    %216 = arith.addf %141, %146 : vector<16x128xf32>
    %217 = arith.addf %151, %156 : vector<16x128xf32>
    %218 = arith.addf %161, %166 : vector<16x128xf32>
    %219 = arith.addf %171, %176 : vector<16x128xf32>
    %220 = arith.addf %181, %186 : vector<16x128xf32>
    %221 = arith.addf %191, %196 : vector<16x128xf32>
    %222 = arith.addf %201, %206 : vector<16x128xf32>
    %223 = arith.addf %207, %208 : vector<16x128xf32>
    %224 = arith.addf %209, %210 : vector<16x128xf32>
    %225 = arith.addf %211, %212 : vector<16x128xf32>
    %226 = arith.addf %213, %214 : vector<16x128xf32>
    %227 = arith.addf %215, %216 : vector<16x128xf32>
    %228 = arith.addf %217, %218 : vector<16x128xf32>
    %229 = arith.addf %219, %220 : vector<16x128xf32>
    %230 = arith.addf %221, %222 : vector<16x128xf32>
    %231 = arith.addf %223, %224 : vector<16x128xf32>
    %232 = arith.addf %225, %226 : vector<16x128xf32>
    %233 = arith.addf %227, %228 : vector<16x128xf32>
    %234 = arith.addf %229, %230 : vector<16x128xf32>
    %235 = arith.addf %231, %232 : vector<16x128xf32>
    %236 = arith.addf %233, %234 : vector<16x128xf32>
    %237 = arith.addf %235, %236 : vector<16x128xf32>
    %238 = vector.broadcast %3 : vector<16x1xf32> to vector<16x128xf32>
    %239 = arith.addf %237, %238 : vector<16x128xf32>
    %240 = vector.broadcast %4 : vector<16x1xf32> to vector<16x128xf32>
    %241 = vector.broadcast %17 : vector<1x128xf32> to vector<16x128xf32>
    %242 = arith.mulf %240, %241 : vector<16x128xf32>
    %243 = vector.broadcast %5 : vector<16x1xf32> to vector<16x128xf32>
    %244 = arith.addf %242, %243 : vector<16x128xf32>
    %245 = arith.addf %239, %244 : vector<16x128xf32>
    %cst_44 = arith.constant 0.000000e+00 : f32
    %246 = vector.broadcast %cst_44 : f32 to vector<16x128xf32>
    %247 = arith.maximumf %245, %246 : vector<16x128xf32>
    %248 = vector.extract_strided_slice %6 {offsets = [0, 0, 0], sizes = [1, 16, 16], strides = [1, 1, 1]} : vector<2x16x16xf32> to vector<1x16x16xf32>
    %249 = vector.shape_cast %248 : vector<1x16x16xf32> to vector<16x16xf32>
    %250 = tpu.iota {dimensions = array<i32: 1>} : vector<16x128xi32>
    %c2_i32 = arith.constant 2 : i32
    %251 = vector.broadcast %c2_i32 : i32 to vector<16x128xi32>
    %252 = arith.cmpi sge, %250, %251 : vector<16x128xi32>
    %c2_i32_45 = arith.constant 2 : i32
    %253 = tpu.dynamic_rotate %247 by %c2_i32_45 dim 1 : vector<16x128xf32>, i32 -> vector<16x128xf32>
    %cst_46 = arith.constant 0.000000e+00 : f32
    %254 = vector.broadcast %cst_46 : f32 to vector<16x128xf32>
    %255 = arith.select %252, %253, %254 : vector<16x128xi1>, vector<16x128xf32>
    %256 = vector.extract_strided_slice %249 {offsets = [0, 0], sizes = [16, 1], strides = [1, 1]} : vector<16x16xf32> to vector<16x1xf32>
    %257 = vector.extract_strided_slice %255 {offsets = [0, 0], sizes = [1, 128], strides = [1, 1]} : vector<16x128xf32> to vector<1x128xf32>
    %258 = vector.broadcast %256 : vector<16x1xf32> to vector<16x128xf32>
    %259 = vector.broadcast %257 : vector<1x128xf32> to vector<16x128xf32>
    %260 = arith.mulf %258, %259 : vector<16x128xf32>
    %261 = vector.extract_strided_slice %249 {offsets = [0, 1], sizes = [16, 1], strides = [1, 1]} : vector<16x16xf32> to vector<16x1xf32>
    %262 = vector.extract_strided_slice %255 {offsets = [1, 0], sizes = [1, 128], strides = [1, 1]} : vector<16x128xf32> to vector<1x128xf32>
    %263 = vector.broadcast %261 : vector<16x1xf32> to vector<16x128xf32>
    %264 = vector.broadcast %262 : vector<1x128xf32> to vector<16x128xf32>
    %265 = arith.mulf %263, %264 : vector<16x128xf32>
    %266 = vector.extract_strided_slice %249 {offsets = [0, 2], sizes = [16, 1], strides = [1, 1]} : vector<16x16xf32> to vector<16x1xf32>
    %267 = vector.extract_strided_slice %255 {offsets = [2, 0], sizes = [1, 128], strides = [1, 1]} : vector<16x128xf32> to vector<1x128xf32>
    %268 = vector.broadcast %266 : vector<16x1xf32> to vector<16x128xf32>
    %269 = vector.broadcast %267 : vector<1x128xf32> to vector<16x128xf32>
    %270 = arith.mulf %268, %269 : vector<16x128xf32>
    %271 = vector.extract_strided_slice %249 {offsets = [0, 3], sizes = [16, 1], strides = [1, 1]} : vector<16x16xf32> to vector<16x1xf32>
    %272 = vector.extract_strided_slice %255 {offsets = [3, 0], sizes = [1, 128], strides = [1, 1]} : vector<16x128xf32> to vector<1x128xf32>
    %273 = vector.broadcast %271 : vector<16x1xf32> to vector<16x128xf32>
    %274 = vector.broadcast %272 : vector<1x128xf32> to vector<16x128xf32>
    %275 = arith.mulf %273, %274 : vector<16x128xf32>
    %276 = vector.extract_strided_slice %249 {offsets = [0, 4], sizes = [16, 1], strides = [1, 1]} : vector<16x16xf32> to vector<16x1xf32>
    %277 = vector.extract_strided_slice %255 {offsets = [4, 0], sizes = [1, 128], strides = [1, 1]} : vector<16x128xf32> to vector<1x128xf32>
    %278 = vector.broadcast %276 : vector<16x1xf32> to vector<16x128xf32>
    %279 = vector.broadcast %277 : vector<1x128xf32> to vector<16x128xf32>
    %280 = arith.mulf %278, %279 : vector<16x128xf32>
    %281 = vector.extract_strided_slice %249 {offsets = [0, 5], sizes = [16, 1], strides = [1, 1]} : vector<16x16xf32> to vector<16x1xf32>
    %282 = vector.extract_strided_slice %255 {offsets = [5, 0], sizes = [1, 128], strides = [1, 1]} : vector<16x128xf32> to vector<1x128xf32>
    %283 = vector.broadcast %281 : vector<16x1xf32> to vector<16x128xf32>
    %284 = vector.broadcast %282 : vector<1x128xf32> to vector<16x128xf32>
    %285 = arith.mulf %283, %284 : vector<16x128xf32>
    %286 = vector.extract_strided_slice %249 {offsets = [0, 6], sizes = [16, 1], strides = [1, 1]} : vector<16x16xf32> to vector<16x1xf32>
    %287 = vector.extract_strided_slice %255 {offsets = [6, 0], sizes = [1, 128], strides = [1, 1]} : vector<16x128xf32> to vector<1x128xf32>
    %288 = vector.broadcast %286 : vector<16x1xf32> to vector<16x128xf32>
    %289 = vector.broadcast %287 : vector<1x128xf32> to vector<16x128xf32>
    %290 = arith.mulf %288, %289 : vector<16x128xf32>
    %291 = vector.extract_strided_slice %249 {offsets = [0, 7], sizes = [16, 1], strides = [1, 1]} : vector<16x16xf32> to vector<16x1xf32>
    %292 = vector.extract_strided_slice %255 {offsets = [7, 0], sizes = [1, 128], strides = [1, 1]} : vector<16x128xf32> to vector<1x128xf32>
    %293 = vector.broadcast %291 : vector<16x1xf32> to vector<16x128xf32>
    %294 = vector.broadcast %292 : vector<1x128xf32> to vector<16x128xf32>
    %295 = arith.mulf %293, %294 : vector<16x128xf32>
    %296 = vector.extract_strided_slice %249 {offsets = [0, 8], sizes = [16, 1], strides = [1, 1]} : vector<16x16xf32> to vector<16x1xf32>
    %297 = vector.extract_strided_slice %255 {offsets = [8, 0], sizes = [1, 128], strides = [1, 1]} : vector<16x128xf32> to vector<1x128xf32>
    %298 = vector.broadcast %296 : vector<16x1xf32> to vector<16x128xf32>
    %299 = vector.broadcast %297 : vector<1x128xf32> to vector<16x128xf32>
    %300 = arith.mulf %298, %299 : vector<16x128xf32>
    %301 = vector.extract_strided_slice %249 {offsets = [0, 9], sizes = [16, 1], strides = [1, 1]} : vector<16x16xf32> to vector<16x1xf32>
    %302 = vector.extract_strided_slice %255 {offsets = [9, 0], sizes = [1, 128], strides = [1, 1]} : vector<16x128xf32> to vector<1x128xf32>
    %303 = vector.broadcast %301 : vector<16x1xf32> to vector<16x128xf32>
    %304 = vector.broadcast %302 : vector<1x128xf32> to vector<16x128xf32>
    %305 = arith.mulf %303, %304 : vector<16x128xf32>
    %306 = vector.extract_strided_slice %249 {offsets = [0, 10], sizes = [16, 1], strides = [1, 1]} : vector<16x16xf32> to vector<16x1xf32>
    %307 = vector.extract_strided_slice %255 {offsets = [10, 0], sizes = [1, 128], strides = [1, 1]} : vector<16x128xf32> to vector<1x128xf32>
    %308 = vector.broadcast %306 : vector<16x1xf32> to vector<16x128xf32>
    %309 = vector.broadcast %307 : vector<1x128xf32> to vector<16x128xf32>
    %310 = arith.mulf %308, %309 : vector<16x128xf32>
    %311 = vector.extract_strided_slice %249 {offsets = [0, 11], sizes = [16, 1], strides = [1, 1]} : vector<16x16xf32> to vector<16x1xf32>
    %312 = vector.extract_strided_slice %255 {offsets = [11, 0], sizes = [1, 128], strides = [1, 1]} : vector<16x128xf32> to vector<1x128xf32>
    %313 = vector.broadcast %311 : vector<16x1xf32> to vector<16x128xf32>
    %314 = vector.broadcast %312 : vector<1x128xf32> to vector<16x128xf32>
    %315 = arith.mulf %313, %314 : vector<16x128xf32>
    %316 = vector.extract_strided_slice %249 {offsets = [0, 12], sizes = [16, 1], strides = [1, 1]} : vector<16x16xf32> to vector<16x1xf32>
    %317 = vector.extract_strided_slice %255 {offsets = [12, 0], sizes = [1, 128], strides = [1, 1]} : vector<16x128xf32> to vector<1x128xf32>
    %318 = vector.broadcast %316 : vector<16x1xf32> to vector<16x128xf32>
    %319 = vector.broadcast %317 : vector<1x128xf32> to vector<16x128xf32>
    %320 = arith.mulf %318, %319 : vector<16x128xf32>
    %321 = vector.extract_strided_slice %249 {offsets = [0, 13], sizes = [16, 1], strides = [1, 1]} : vector<16x16xf32> to vector<16x1xf32>
    %322 = vector.extract_strided_slice %255 {offsets = [13, 0], sizes = [1, 128], strides = [1, 1]} : vector<16x128xf32> to vector<1x128xf32>
    %323 = vector.broadcast %321 : vector<16x1xf32> to vector<16x128xf32>
    %324 = vector.broadcast %322 : vector<1x128xf32> to vector<16x128xf32>
    %325 = arith.mulf %323, %324 : vector<16x128xf32>
    %326 = vector.extract_strided_slice %249 {offsets = [0, 14], sizes = [16, 1], strides = [1, 1]} : vector<16x16xf32> to vector<16x1xf32>
    %327 = vector.extract_strided_slice %255 {offsets = [14, 0], sizes = [1, 128], strides = [1, 1]} : vector<16x128xf32> to vector<1x128xf32>
    %328 = vector.broadcast %326 : vector<16x1xf32> to vector<16x128xf32>
    %329 = vector.broadcast %327 : vector<1x128xf32> to vector<16x128xf32>
    %330 = arith.mulf %328, %329 : vector<16x128xf32>
    %331 = vector.extract_strided_slice %249 {offsets = [0, 15], sizes = [16, 1], strides = [1, 1]} : vector<16x16xf32> to vector<16x1xf32>
    %332 = vector.extract_strided_slice %255 {offsets = [15, 0], sizes = [1, 128], strides = [1, 1]} : vector<16x128xf32> to vector<1x128xf32>
    %333 = vector.broadcast %331 : vector<16x1xf32> to vector<16x128xf32>
    %334 = vector.broadcast %332 : vector<1x128xf32> to vector<16x128xf32>
    %335 = arith.mulf %333, %334 : vector<16x128xf32>
    %336 = vector.extract_strided_slice %6 {offsets = [1, 0, 0], sizes = [1, 16, 16], strides = [1, 1, 1]} : vector<2x16x16xf32> to vector<1x16x16xf32>
    %337 = vector.shape_cast %336 : vector<1x16x16xf32> to vector<16x16xf32>
    %338 = vector.extract_strided_slice %337 {offsets = [0, 0], sizes = [16, 1], strides = [1, 1]} : vector<16x16xf32> to vector<16x1xf32>
    %339 = vector.extract_strided_slice %247 {offsets = [0, 0], sizes = [1, 128], strides = [1, 1]} : vector<16x128xf32> to vector<1x128xf32>
    %340 = vector.broadcast %338 : vector<16x1xf32> to vector<16x128xf32>
    %341 = vector.broadcast %339 : vector<1x128xf32> to vector<16x128xf32>
    %342 = arith.mulf %340, %341 : vector<16x128xf32>
    %343 = vector.extract_strided_slice %337 {offsets = [0, 1], sizes = [16, 1], strides = [1, 1]} : vector<16x16xf32> to vector<16x1xf32>
    %344 = vector.extract_strided_slice %247 {offsets = [1, 0], sizes = [1, 128], strides = [1, 1]} : vector<16x128xf32> to vector<1x128xf32>
    %345 = vector.broadcast %343 : vector<16x1xf32> to vector<16x128xf32>
    %346 = vector.broadcast %344 : vector<1x128xf32> to vector<16x128xf32>
    %347 = arith.mulf %345, %346 : vector<16x128xf32>
    %348 = vector.extract_strided_slice %337 {offsets = [0, 2], sizes = [16, 1], strides = [1, 1]} : vector<16x16xf32> to vector<16x1xf32>
    %349 = vector.extract_strided_slice %247 {offsets = [2, 0], sizes = [1, 128], strides = [1, 1]} : vector<16x128xf32> to vector<1x128xf32>
    %350 = vector.broadcast %348 : vector<16x1xf32> to vector<16x128xf32>
    %351 = vector.broadcast %349 : vector<1x128xf32> to vector<16x128xf32>
    %352 = arith.mulf %350, %351 : vector<16x128xf32>
    %353 = vector.extract_strided_slice %337 {offsets = [0, 3], sizes = [16, 1], strides = [1, 1]} : vector<16x16xf32> to vector<16x1xf32>
    %354 = vector.extract_strided_slice %247 {offsets = [3, 0], sizes = [1, 128], strides = [1, 1]} : vector<16x128xf32> to vector<1x128xf32>
    %355 = vector.broadcast %353 : vector<16x1xf32> to vector<16x128xf32>
    %356 = vector.broadcast %354 : vector<1x128xf32> to vector<16x128xf32>
    %357 = arith.mulf %355, %356 : vector<16x128xf32>
    %358 = vector.extract_strided_slice %337 {offsets = [0, 4], sizes = [16, 1], strides = [1, 1]} : vector<16x16xf32> to vector<16x1xf32>
    %359 = vector.extract_strided_slice %247 {offsets = [4, 0], sizes = [1, 128], strides = [1, 1]} : vector<16x128xf32> to vector<1x128xf32>
    %360 = vector.broadcast %358 : vector<16x1xf32> to vector<16x128xf32>
    %361 = vector.broadcast %359 : vector<1x128xf32> to vector<16x128xf32>
    %362 = arith.mulf %360, %361 : vector<16x128xf32>
    %363 = vector.extract_strided_slice %337 {offsets = [0, 5], sizes = [16, 1], strides = [1, 1]} : vector<16x16xf32> to vector<16x1xf32>
    %364 = vector.extract_strided_slice %247 {offsets = [5, 0], sizes = [1, 128], strides = [1, 1]} : vector<16x128xf32> to vector<1x128xf32>
    %365 = vector.broadcast %363 : vector<16x1xf32> to vector<16x128xf32>
    %366 = vector.broadcast %364 : vector<1x128xf32> to vector<16x128xf32>
    %367 = arith.mulf %365, %366 : vector<16x128xf32>
    %368 = vector.extract_strided_slice %337 {offsets = [0, 6], sizes = [16, 1], strides = [1, 1]} : vector<16x16xf32> to vector<16x1xf32>
    %369 = vector.extract_strided_slice %247 {offsets = [6, 0], sizes = [1, 128], strides = [1, 1]} : vector<16x128xf32> to vector<1x128xf32>
    %370 = vector.broadcast %368 : vector<16x1xf32> to vector<16x128xf32>
    %371 = vector.broadcast %369 : vector<1x128xf32> to vector<16x128xf32>
    %372 = arith.mulf %370, %371 : vector<16x128xf32>
    %373 = vector.extract_strided_slice %337 {offsets = [0, 7], sizes = [16, 1], strides = [1, 1]} : vector<16x16xf32> to vector<16x1xf32>
    %374 = vector.extract_strided_slice %247 {offsets = [7, 0], sizes = [1, 128], strides = [1, 1]} : vector<16x128xf32> to vector<1x128xf32>
    %375 = vector.broadcast %373 : vector<16x1xf32> to vector<16x128xf32>
    %376 = vector.broadcast %374 : vector<1x128xf32> to vector<16x128xf32>
    %377 = arith.mulf %375, %376 : vector<16x128xf32>
    %378 = vector.extract_strided_slice %337 {offsets = [0, 8], sizes = [16, 1], strides = [1, 1]} : vector<16x16xf32> to vector<16x1xf32>
    %379 = vector.extract_strided_slice %247 {offsets = [8, 0], sizes = [1, 128], strides = [1, 1]} : vector<16x128xf32> to vector<1x128xf32>
    %380 = vector.broadcast %378 : vector<16x1xf32> to vector<16x128xf32>
    %381 = vector.broadcast %379 : vector<1x128xf32> to vector<16x128xf32>
    %382 = arith.mulf %380, %381 : vector<16x128xf32>
    %383 = vector.extract_strided_slice %337 {offsets = [0, 9], sizes = [16, 1], strides = [1, 1]} : vector<16x16xf32> to vector<16x1xf32>
    %384 = vector.extract_strided_slice %247 {offsets = [9, 0], sizes = [1, 128], strides = [1, 1]} : vector<16x128xf32> to vector<1x128xf32>
    %385 = vector.broadcast %383 : vector<16x1xf32> to vector<16x128xf32>
    %386 = vector.broadcast %384 : vector<1x128xf32> to vector<16x128xf32>
    %387 = arith.mulf %385, %386 : vector<16x128xf32>
    %388 = vector.extract_strided_slice %337 {offsets = [0, 10], sizes = [16, 1], strides = [1, 1]} : vector<16x16xf32> to vector<16x1xf32>
    %389 = vector.extract_strided_slice %247 {offsets = [10, 0], sizes = [1, 128], strides = [1, 1]} : vector<16x128xf32> to vector<1x128xf32>
    %390 = vector.broadcast %388 : vector<16x1xf32> to vector<16x128xf32>
    %391 = vector.broadcast %389 : vector<1x128xf32> to vector<16x128xf32>
    %392 = arith.mulf %390, %391 : vector<16x128xf32>
    %393 = vector.extract_strided_slice %337 {offsets = [0, 11], sizes = [16, 1], strides = [1, 1]} : vector<16x16xf32> to vector<16x1xf32>
    %394 = vector.extract_strided_slice %247 {offsets = [11, 0], sizes = [1, 128], strides = [1, 1]} : vector<16x128xf32> to vector<1x128xf32>
    %395 = vector.broadcast %393 : vector<16x1xf32> to vector<16x128xf32>
    %396 = vector.broadcast %394 : vector<1x128xf32> to vector<16x128xf32>
    %397 = arith.mulf %395, %396 : vector<16x128xf32>
    %398 = vector.extract_strided_slice %337 {offsets = [0, 12], sizes = [16, 1], strides = [1, 1]} : vector<16x16xf32> to vector<16x1xf32>
    %399 = vector.extract_strided_slice %247 {offsets = [12, 0], sizes = [1, 128], strides = [1, 1]} : vector<16x128xf32> to vector<1x128xf32>
    %400 = vector.broadcast %398 : vector<16x1xf32> to vector<16x128xf32>
    %401 = vector.broadcast %399 : vector<1x128xf32> to vector<16x128xf32>
    %402 = arith.mulf %400, %401 : vector<16x128xf32>
    %403 = vector.extract_strided_slice %337 {offsets = [0, 13], sizes = [16, 1], strides = [1, 1]} : vector<16x16xf32> to vector<16x1xf32>
    %404 = vector.extract_strided_slice %247 {offsets = [13, 0], sizes = [1, 128], strides = [1, 1]} : vector<16x128xf32> to vector<1x128xf32>
    %405 = vector.broadcast %403 : vector<16x1xf32> to vector<16x128xf32>
    %406 = vector.broadcast %404 : vector<1x128xf32> to vector<16x128xf32>
    %407 = arith.mulf %405, %406 : vector<16x128xf32>
    %408 = vector.extract_strided_slice %337 {offsets = [0, 14], sizes = [16, 1], strides = [1, 1]} : vector<16x16xf32> to vector<16x1xf32>
    %409 = vector.extract_strided_slice %247 {offsets = [14, 0], sizes = [1, 128], strides = [1, 1]} : vector<16x128xf32> to vector<1x128xf32>
    %410 = vector.broadcast %408 : vector<16x1xf32> to vector<16x128xf32>
    %411 = vector.broadcast %409 : vector<1x128xf32> to vector<16x128xf32>
    %412 = arith.mulf %410, %411 : vector<16x128xf32>
    %413 = vector.extract_strided_slice %337 {offsets = [0, 15], sizes = [16, 1], strides = [1, 1]} : vector<16x16xf32> to vector<16x1xf32>
    %414 = vector.extract_strided_slice %247 {offsets = [15, 0], sizes = [1, 128], strides = [1, 1]} : vector<16x128xf32> to vector<1x128xf32>
    %415 = vector.broadcast %413 : vector<16x1xf32> to vector<16x128xf32>
    %416 = vector.broadcast %414 : vector<1x128xf32> to vector<16x128xf32>
    %417 = arith.mulf %415, %416 : vector<16x128xf32>
    %418 = arith.addf %260, %265 : vector<16x128xf32>
    %419 = arith.addf %270, %275 : vector<16x128xf32>
    %420 = arith.addf %280, %285 : vector<16x128xf32>
    %421 = arith.addf %290, %295 : vector<16x128xf32>
    %422 = arith.addf %300, %305 : vector<16x128xf32>
    %423 = arith.addf %310, %315 : vector<16x128xf32>
    %424 = arith.addf %320, %325 : vector<16x128xf32>
    %425 = arith.addf %330, %335 : vector<16x128xf32>
    %426 = arith.addf %342, %347 : vector<16x128xf32>
    %427 = arith.addf %352, %357 : vector<16x128xf32>
    %428 = arith.addf %362, %367 : vector<16x128xf32>
    %429 = arith.addf %372, %377 : vector<16x128xf32>
    %430 = arith.addf %382, %387 : vector<16x128xf32>
    %431 = arith.addf %392, %397 : vector<16x128xf32>
    %432 = arith.addf %402, %407 : vector<16x128xf32>
    %433 = arith.addf %412, %417 : vector<16x128xf32>
    %434 = arith.addf %418, %419 : vector<16x128xf32>
    %435 = arith.addf %420, %421 : vector<16x128xf32>
    %436 = arith.addf %422, %423 : vector<16x128xf32>
    %437 = arith.addf %424, %425 : vector<16x128xf32>
    %438 = arith.addf %426, %427 : vector<16x128xf32>
    %439 = arith.addf %428, %429 : vector<16x128xf32>
    %440 = arith.addf %430, %431 : vector<16x128xf32>
    %441 = arith.addf %432, %433 : vector<16x128xf32>
    %442 = arith.addf %434, %435 : vector<16x128xf32>
    %443 = arith.addf %436, %437 : vector<16x128xf32>
    %444 = arith.addf %438, %439 : vector<16x128xf32>
    %445 = arith.addf %440, %441 : vector<16x128xf32>
    %446 = arith.addf %442, %443 : vector<16x128xf32>
    %447 = arith.addf %444, %445 : vector<16x128xf32>
    %448 = arith.addf %446, %447 : vector<16x128xf32>
    %449 = vector.broadcast %7 : vector<16x1xf32> to vector<16x128xf32>
    %450 = arith.addf %448, %449 : vector<16x128xf32>
    %451 = vector.extract_strided_slice %8 {offsets = [0, 0, 0], sizes = [1, 16, 16], strides = [1, 1, 1]} : vector<2x16x16xf32> to vector<1x16x16xf32>
    %452 = vector.shape_cast %451 : vector<1x16x16xf32> to vector<16x16xf32>
    %c2_i32_47 = arith.constant 2 : i32
    %453 = tpu.dynamic_rotate %450 by %c2_i32_47 dim 1 : vector<16x128xf32>, i32 -> vector<16x128xf32>
    %cst_48 = arith.constant 0.000000e+00 : f32
    %454 = vector.broadcast %cst_48 : f32 to vector<16x128xf32>
    %455 = arith.select %252, %453, %454 : vector<16x128xi1>, vector<16x128xf32>
    %456 = vector.extract_strided_slice %452 {offsets = [0, 0], sizes = [16, 1], strides = [1, 1]} : vector<16x16xf32> to vector<16x1xf32>
    %457 = vector.extract_strided_slice %455 {offsets = [0, 0], sizes = [1, 128], strides = [1, 1]} : vector<16x128xf32> to vector<1x128xf32>
    %458 = vector.broadcast %456 : vector<16x1xf32> to vector<16x128xf32>
    %459 = vector.broadcast %457 : vector<1x128xf32> to vector<16x128xf32>
    %460 = arith.mulf %458, %459 : vector<16x128xf32>
    %461 = vector.extract_strided_slice %452 {offsets = [0, 1], sizes = [16, 1], strides = [1, 1]} : vector<16x16xf32> to vector<16x1xf32>
    %462 = vector.extract_strided_slice %455 {offsets = [1, 0], sizes = [1, 128], strides = [1, 1]} : vector<16x128xf32> to vector<1x128xf32>
    %463 = vector.broadcast %461 : vector<16x1xf32> to vector<16x128xf32>
    %464 = vector.broadcast %462 : vector<1x128xf32> to vector<16x128xf32>
    %465 = arith.mulf %463, %464 : vector<16x128xf32>
    %466 = vector.extract_strided_slice %452 {offsets = [0, 2], sizes = [16, 1], strides = [1, 1]} : vector<16x16xf32> to vector<16x1xf32>
    %467 = vector.extract_strided_slice %455 {offsets = [2, 0], sizes = [1, 128], strides = [1, 1]} : vector<16x128xf32> to vector<1x128xf32>
    %468 = vector.broadcast %466 : vector<16x1xf32> to vector<16x128xf32>
    %469 = vector.broadcast %467 : vector<1x128xf32> to vector<16x128xf32>
    %470 = arith.mulf %468, %469 : vector<16x128xf32>
    %471 = vector.extract_strided_slice %452 {offsets = [0, 3], sizes = [16, 1], strides = [1, 1]} : vector<16x16xf32> to vector<16x1xf32>
    %472 = vector.extract_strided_slice %455 {offsets = [3, 0], sizes = [1, 128], strides = [1, 1]} : vector<16x128xf32> to vector<1x128xf32>
    %473 = vector.broadcast %471 : vector<16x1xf32> to vector<16x128xf32>
    %474 = vector.broadcast %472 : vector<1x128xf32> to vector<16x128xf32>
    %475 = arith.mulf %473, %474 : vector<16x128xf32>
    %476 = vector.extract_strided_slice %452 {offsets = [0, 4], sizes = [16, 1], strides = [1, 1]} : vector<16x16xf32> to vector<16x1xf32>
    %477 = vector.extract_strided_slice %455 {offsets = [4, 0], sizes = [1, 128], strides = [1, 1]} : vector<16x128xf32> to vector<1x128xf32>
    %478 = vector.broadcast %476 : vector<16x1xf32> to vector<16x128xf32>
    %479 = vector.broadcast %477 : vector<1x128xf32> to vector<16x128xf32>
    %480 = arith.mulf %478, %479 : vector<16x128xf32>
    %481 = vector.extract_strided_slice %452 {offsets = [0, 5], sizes = [16, 1], strides = [1, 1]} : vector<16x16xf32> to vector<16x1xf32>
    %482 = vector.extract_strided_slice %455 {offsets = [5, 0], sizes = [1, 128], strides = [1, 1]} : vector<16x128xf32> to vector<1x128xf32>
    %483 = vector.broadcast %481 : vector<16x1xf32> to vector<16x128xf32>
    %484 = vector.broadcast %482 : vector<1x128xf32> to vector<16x128xf32>
    %485 = arith.mulf %483, %484 : vector<16x128xf32>
    %486 = vector.extract_strided_slice %452 {offsets = [0, 6], sizes = [16, 1], strides = [1, 1]} : vector<16x16xf32> to vector<16x1xf32>
    %487 = vector.extract_strided_slice %455 {offsets = [6, 0], sizes = [1, 128], strides = [1, 1]} : vector<16x128xf32> to vector<1x128xf32>
    %488 = vector.broadcast %486 : vector<16x1xf32> to vector<16x128xf32>
    %489 = vector.broadcast %487 : vector<1x128xf32> to vector<16x128xf32>
    %490 = arith.mulf %488, %489 : vector<16x128xf32>
    %491 = vector.extract_strided_slice %452 {offsets = [0, 7], sizes = [16, 1], strides = [1, 1]} : vector<16x16xf32> to vector<16x1xf32>
    %492 = vector.extract_strided_slice %455 {offsets = [7, 0], sizes = [1, 128], strides = [1, 1]} : vector<16x128xf32> to vector<1x128xf32>
    %493 = vector.broadcast %491 : vector<16x1xf32> to vector<16x128xf32>
    %494 = vector.broadcast %492 : vector<1x128xf32> to vector<16x128xf32>
    %495 = arith.mulf %493, %494 : vector<16x128xf32>
    %496 = vector.extract_strided_slice %452 {offsets = [0, 8], sizes = [16, 1], strides = [1, 1]} : vector<16x16xf32> to vector<16x1xf32>
    %497 = vector.extract_strided_slice %455 {offsets = [8, 0], sizes = [1, 128], strides = [1, 1]} : vector<16x128xf32> to vector<1x128xf32>
    %498 = vector.broadcast %496 : vector<16x1xf32> to vector<16x128xf32>
    %499 = vector.broadcast %497 : vector<1x128xf32> to vector<16x128xf32>
    %500 = arith.mulf %498, %499 : vector<16x128xf32>
    %501 = vector.extract_strided_slice %452 {offsets = [0, 9], sizes = [16, 1], strides = [1, 1]} : vector<16x16xf32> to vector<16x1xf32>
    %502 = vector.extract_strided_slice %455 {offsets = [9, 0], sizes = [1, 128], strides = [1, 1]} : vector<16x128xf32> to vector<1x128xf32>
    %503 = vector.broadcast %501 : vector<16x1xf32> to vector<16x128xf32>
    %504 = vector.broadcast %502 : vector<1x128xf32> to vector<16x128xf32>
    %505 = arith.mulf %503, %504 : vector<16x128xf32>
    %506 = vector.extract_strided_slice %452 {offsets = [0, 10], sizes = [16, 1], strides = [1, 1]} : vector<16x16xf32> to vector<16x1xf32>
    %507 = vector.extract_strided_slice %455 {offsets = [10, 0], sizes = [1, 128], strides = [1, 1]} : vector<16x128xf32> to vector<1x128xf32>
    %508 = vector.broadcast %506 : vector<16x1xf32> to vector<16x128xf32>
    %509 = vector.broadcast %507 : vector<1x128xf32> to vector<16x128xf32>
    %510 = arith.mulf %508, %509 : vector<16x128xf32>
    %511 = vector.extract_strided_slice %452 {offsets = [0, 11], sizes = [16, 1], strides = [1, 1]} : vector<16x16xf32> to vector<16x1xf32>
    %512 = vector.extract_strided_slice %455 {offsets = [11, 0], sizes = [1, 128], strides = [1, 1]} : vector<16x128xf32> to vector<1x128xf32>
    %513 = vector.broadcast %511 : vector<16x1xf32> to vector<16x128xf32>
    %514 = vector.broadcast %512 : vector<1x128xf32> to vector<16x128xf32>
    %515 = arith.mulf %513, %514 : vector<16x128xf32>
    %516 = vector.extract_strided_slice %452 {offsets = [0, 12], sizes = [16, 1], strides = [1, 1]} : vector<16x16xf32> to vector<16x1xf32>
    %517 = vector.extract_strided_slice %455 {offsets = [12, 0], sizes = [1, 128], strides = [1, 1]} : vector<16x128xf32> to vector<1x128xf32>
    %518 = vector.broadcast %516 : vector<16x1xf32> to vector<16x128xf32>
    %519 = vector.broadcast %517 : vector<1x128xf32> to vector<16x128xf32>
    %520 = arith.mulf %518, %519 : vector<16x128xf32>
    %521 = vector.extract_strided_slice %452 {offsets = [0, 13], sizes = [16, 1], strides = [1, 1]} : vector<16x16xf32> to vector<16x1xf32>
    %522 = vector.extract_strided_slice %455 {offsets = [13, 0], sizes = [1, 128], strides = [1, 1]} : vector<16x128xf32> to vector<1x128xf32>
    %523 = vector.broadcast %521 : vector<16x1xf32> to vector<16x128xf32>
    %524 = vector.broadcast %522 : vector<1x128xf32> to vector<16x128xf32>
    %525 = arith.mulf %523, %524 : vector<16x128xf32>
    %526 = vector.extract_strided_slice %452 {offsets = [0, 14], sizes = [16, 1], strides = [1, 1]} : vector<16x16xf32> to vector<16x1xf32>
    %527 = vector.extract_strided_slice %455 {offsets = [14, 0], sizes = [1, 128], strides = [1, 1]} : vector<16x128xf32> to vector<1x128xf32>
    %528 = vector.broadcast %526 : vector<16x1xf32> to vector<16x128xf32>
    %529 = vector.broadcast %527 : vector<1x128xf32> to vector<16x128xf32>
    %530 = arith.mulf %528, %529 : vector<16x128xf32>
    %531 = vector.extract_strided_slice %452 {offsets = [0, 15], sizes = [16, 1], strides = [1, 1]} : vector<16x16xf32> to vector<16x1xf32>
    %532 = vector.extract_strided_slice %455 {offsets = [15, 0], sizes = [1, 128], strides = [1, 1]} : vector<16x128xf32> to vector<1x128xf32>
    %533 = vector.broadcast %531 : vector<16x1xf32> to vector<16x128xf32>
    %534 = vector.broadcast %532 : vector<1x128xf32> to vector<16x128xf32>
    %535 = arith.mulf %533, %534 : vector<16x128xf32>
    %536 = vector.extract_strided_slice %8 {offsets = [1, 0, 0], sizes = [1, 16, 16], strides = [1, 1, 1]} : vector<2x16x16xf32> to vector<1x16x16xf32>
    %537 = vector.shape_cast %536 : vector<1x16x16xf32> to vector<16x16xf32>
    %538 = vector.extract_strided_slice %537 {offsets = [0, 0], sizes = [16, 1], strides = [1, 1]} : vector<16x16xf32> to vector<16x1xf32>
    %539 = vector.extract_strided_slice %450 {offsets = [0, 0], sizes = [1, 128], strides = [1, 1]} : vector<16x128xf32> to vector<1x128xf32>
    %540 = vector.broadcast %538 : vector<16x1xf32> to vector<16x128xf32>
    %541 = vector.broadcast %539 : vector<1x128xf32> to vector<16x128xf32>
    %542 = arith.mulf %540, %541 : vector<16x128xf32>
    %543 = vector.extract_strided_slice %537 {offsets = [0, 1], sizes = [16, 1], strides = [1, 1]} : vector<16x16xf32> to vector<16x1xf32>
    %544 = vector.extract_strided_slice %450 {offsets = [1, 0], sizes = [1, 128], strides = [1, 1]} : vector<16x128xf32> to vector<1x128xf32>
    %545 = vector.broadcast %543 : vector<16x1xf32> to vector<16x128xf32>
    %546 = vector.broadcast %544 : vector<1x128xf32> to vector<16x128xf32>
    %547 = arith.mulf %545, %546 : vector<16x128xf32>
    %548 = vector.extract_strided_slice %537 {offsets = [0, 2], sizes = [16, 1], strides = [1, 1]} : vector<16x16xf32> to vector<16x1xf32>
    %549 = vector.extract_strided_slice %450 {offsets = [2, 0], sizes = [1, 128], strides = [1, 1]} : vector<16x128xf32> to vector<1x128xf32>
    %550 = vector.broadcast %548 : vector<16x1xf32> to vector<16x128xf32>
    %551 = vector.broadcast %549 : vector<1x128xf32> to vector<16x128xf32>
    %552 = arith.mulf %550, %551 : vector<16x128xf32>
    %553 = vector.extract_strided_slice %537 {offsets = [0, 3], sizes = [16, 1], strides = [1, 1]} : vector<16x16xf32> to vector<16x1xf32>
    %554 = vector.extract_strided_slice %450 {offsets = [3, 0], sizes = [1, 128], strides = [1, 1]} : vector<16x128xf32> to vector<1x128xf32>
    %555 = vector.broadcast %553 : vector<16x1xf32> to vector<16x128xf32>
    %556 = vector.broadcast %554 : vector<1x128xf32> to vector<16x128xf32>
    %557 = arith.mulf %555, %556 : vector<16x128xf32>
    %558 = vector.extract_strided_slice %537 {offsets = [0, 4], sizes = [16, 1], strides = [1, 1]} : vector<16x16xf32> to vector<16x1xf32>
    %559 = vector.extract_strided_slice %450 {offsets = [4, 0], sizes = [1, 128], strides = [1, 1]} : vector<16x128xf32> to vector<1x128xf32>
    %560 = vector.broadcast %558 : vector<16x1xf32> to vector<16x128xf32>
    %561 = vector.broadcast %559 : vector<1x128xf32> to vector<16x128xf32>
    %562 = arith.mulf %560, %561 : vector<16x128xf32>
    %563 = vector.extract_strided_slice %537 {offsets = [0, 5], sizes = [16, 1], strides = [1, 1]} : vector<16x16xf32> to vector<16x1xf32>
    %564 = vector.extract_strided_slice %450 {offsets = [5, 0], sizes = [1, 128], strides = [1, 1]} : vector<16x128xf32> to vector<1x128xf32>
    %565 = vector.broadcast %563 : vector<16x1xf32> to vector<16x128xf32>
    %566 = vector.broadcast %564 : vector<1x128xf32> to vector<16x128xf32>
    %567 = arith.mulf %565, %566 : vector<16x128xf32>
    %568 = vector.extract_strided_slice %537 {offsets = [0, 6], sizes = [16, 1], strides = [1, 1]} : vector<16x16xf32> to vector<16x1xf32>
    %569 = vector.extract_strided_slice %450 {offsets = [6, 0], sizes = [1, 128], strides = [1, 1]} : vector<16x128xf32> to vector<1x128xf32>
    %570 = vector.broadcast %568 : vector<16x1xf32> to vector<16x128xf32>
    %571 = vector.broadcast %569 : vector<1x128xf32> to vector<16x128xf32>
    %572 = arith.mulf %570, %571 : vector<16x128xf32>
    %573 = vector.extract_strided_slice %537 {offsets = [0, 7], sizes = [16, 1], strides = [1, 1]} : vector<16x16xf32> to vector<16x1xf32>
    %574 = vector.extract_strided_slice %450 {offsets = [7, 0], sizes = [1, 128], strides = [1, 1]} : vector<16x128xf32> to vector<1x128xf32>
    %575 = vector.broadcast %573 : vector<16x1xf32> to vector<16x128xf32>
    %576 = vector.broadcast %574 : vector<1x128xf32> to vector<16x128xf32>
    %577 = arith.mulf %575, %576 : vector<16x128xf32>
    %578 = vector.extract_strided_slice %537 {offsets = [0, 8], sizes = [16, 1], strides = [1, 1]} : vector<16x16xf32> to vector<16x1xf32>
    %579 = vector.extract_strided_slice %450 {offsets = [8, 0], sizes = [1, 128], strides = [1, 1]} : vector<16x128xf32> to vector<1x128xf32>
    %580 = vector.broadcast %578 : vector<16x1xf32> to vector<16x128xf32>
    %581 = vector.broadcast %579 : vector<1x128xf32> to vector<16x128xf32>
    %582 = arith.mulf %580, %581 : vector<16x128xf32>
    %583 = vector.extract_strided_slice %537 {offsets = [0, 9], sizes = [16, 1], strides = [1, 1]} : vector<16x16xf32> to vector<16x1xf32>
    %584 = vector.extract_strided_slice %450 {offsets = [9, 0], sizes = [1, 128], strides = [1, 1]} : vector<16x128xf32> to vector<1x128xf32>
    %585 = vector.broadcast %583 : vector<16x1xf32> to vector<16x128xf32>
    %586 = vector.broadcast %584 : vector<1x128xf32> to vector<16x128xf32>
    %587 = arith.mulf %585, %586 : vector<16x128xf32>
    %588 = vector.extract_strided_slice %537 {offsets = [0, 10], sizes = [16, 1], strides = [1, 1]} : vector<16x16xf32> to vector<16x1xf32>
    %589 = vector.extract_strided_slice %450 {offsets = [10, 0], sizes = [1, 128], strides = [1, 1]} : vector<16x128xf32> to vector<1x128xf32>
    %590 = vector.broadcast %588 : vector<16x1xf32> to vector<16x128xf32>
    %591 = vector.broadcast %589 : vector<1x128xf32> to vector<16x128xf32>
    %592 = arith.mulf %590, %591 : vector<16x128xf32>
    %593 = vector.extract_strided_slice %537 {offsets = [0, 11], sizes = [16, 1], strides = [1, 1]} : vector<16x16xf32> to vector<16x1xf32>
    %594 = vector.extract_strided_slice %450 {offsets = [11, 0], sizes = [1, 128], strides = [1, 1]} : vector<16x128xf32> to vector<1x128xf32>
    %595 = vector.broadcast %593 : vector<16x1xf32> to vector<16x128xf32>
    %596 = vector.broadcast %594 : vector<1x128xf32> to vector<16x128xf32>
    %597 = arith.mulf %595, %596 : vector<16x128xf32>
    %598 = vector.extract_strided_slice %537 {offsets = [0, 12], sizes = [16, 1], strides = [1, 1]} : vector<16x16xf32> to vector<16x1xf32>
    %599 = vector.extract_strided_slice %450 {offsets = [12, 0], sizes = [1, 128], strides = [1, 1]} : vector<16x128xf32> to vector<1x128xf32>
    %600 = vector.broadcast %598 : vector<16x1xf32> to vector<16x128xf32>
    %601 = vector.broadcast %599 : vector<1x128xf32> to vector<16x128xf32>
    %602 = arith.mulf %600, %601 : vector<16x128xf32>
    %603 = vector.extract_strided_slice %537 {offsets = [0, 13], sizes = [16, 1], strides = [1, 1]} : vector<16x16xf32> to vector<16x1xf32>
    %604 = vector.extract_strided_slice %450 {offsets = [13, 0], sizes = [1, 128], strides = [1, 1]} : vector<16x128xf32> to vector<1x128xf32>
    %605 = vector.broadcast %603 : vector<16x1xf32> to vector<16x128xf32>
    %606 = vector.broadcast %604 : vector<1x128xf32> to vector<16x128xf32>
    %607 = arith.mulf %605, %606 : vector<16x128xf32>
    %608 = vector.extract_strided_slice %537 {offsets = [0, 14], sizes = [16, 1], strides = [1, 1]} : vector<16x16xf32> to vector<16x1xf32>
    %609 = vector.extract_strided_slice %450 {offsets = [14, 0], sizes = [1, 128], strides = [1, 1]} : vector<16x128xf32> to vector<1x128xf32>
    %610 = vector.broadcast %608 : vector<16x1xf32> to vector<16x128xf32>
    %611 = vector.broadcast %609 : vector<1x128xf32> to vector<16x128xf32>
    %612 = arith.mulf %610, %611 : vector<16x128xf32>
    %613 = vector.extract_strided_slice %537 {offsets = [0, 15], sizes = [16, 1], strides = [1, 1]} : vector<16x16xf32> to vector<16x1xf32>
    %614 = vector.extract_strided_slice %450 {offsets = [15, 0], sizes = [1, 128], strides = [1, 1]} : vector<16x128xf32> to vector<1x128xf32>
    %615 = vector.broadcast %613 : vector<16x1xf32> to vector<16x128xf32>
    %616 = vector.broadcast %614 : vector<1x128xf32> to vector<16x128xf32>
    %617 = arith.mulf %615, %616 : vector<16x128xf32>
    %618 = arith.addf %460, %465 : vector<16x128xf32>
    %619 = arith.addf %470, %475 : vector<16x128xf32>
    %620 = arith.addf %480, %485 : vector<16x128xf32>
    %621 = arith.addf %490, %495 : vector<16x128xf32>
    %622 = arith.addf %500, %505 : vector<16x128xf32>
    %623 = arith.addf %510, %515 : vector<16x128xf32>
    %624 = arith.addf %520, %525 : vector<16x128xf32>
    %625 = arith.addf %530, %535 : vector<16x128xf32>
    %626 = arith.addf %542, %547 : vector<16x128xf32>
    %627 = arith.addf %552, %557 : vector<16x128xf32>
    %628 = arith.addf %562, %567 : vector<16x128xf32>
    %629 = arith.addf %572, %577 : vector<16x128xf32>
    %630 = arith.addf %582, %587 : vector<16x128xf32>
    %631 = arith.addf %592, %597 : vector<16x128xf32>
    %632 = arith.addf %602, %607 : vector<16x128xf32>
    %633 = arith.addf %612, %617 : vector<16x128xf32>
    %634 = arith.addf %618, %619 : vector<16x128xf32>
    %635 = arith.addf %620, %621 : vector<16x128xf32>
    %636 = arith.addf %622, %623 : vector<16x128xf32>
    %637 = arith.addf %624, %625 : vector<16x128xf32>
    %638 = arith.addf %626, %627 : vector<16x128xf32>
    %639 = arith.addf %628, %629 : vector<16x128xf32>
    %640 = arith.addf %630, %631 : vector<16x128xf32>
    %641 = arith.addf %632, %633 : vector<16x128xf32>
    %642 = arith.addf %634, %635 : vector<16x128xf32>
    %643 = arith.addf %636, %637 : vector<16x128xf32>
    %644 = arith.addf %638, %639 : vector<16x128xf32>
    %645 = arith.addf %640, %641 : vector<16x128xf32>
    %646 = arith.addf %642, %643 : vector<16x128xf32>
    %647 = arith.addf %644, %645 : vector<16x128xf32>
    %648 = arith.addf %646, %647 : vector<16x128xf32>
    %649 = vector.broadcast %9 : vector<16x1xf32> to vector<16x128xf32>
    %650 = arith.addf %648, %649 : vector<16x128xf32>
    %651 = arith.addf %650, %247 : vector<16x128xf32>
    %cst_49 = arith.constant 0.000000e+00 : f32
    %652 = vector.broadcast %cst_49 : f32 to vector<16x128xf32>
    %653 = arith.maximumf %651, %652 : vector<16x128xf32>
    %654 = vector.extract_strided_slice %10 {offsets = [0, 0, 0], sizes = [1, 16, 16], strides = [1, 1, 1]} : vector<2x16x16xf32> to vector<1x16x16xf32>
    %655 = vector.shape_cast %654 : vector<1x16x16xf32> to vector<16x16xf32>
    %656 = tpu.iota {dimensions = array<i32: 1>} : vector<16x128xi32>
    %c4_i32 = arith.constant 4 : i32
    %657 = vector.broadcast %c4_i32 : i32 to vector<16x128xi32>
    %658 = arith.cmpi sge, %656, %657 : vector<16x128xi32>
    %c4_i32_50 = arith.constant 4 : i32
    %659 = tpu.dynamic_rotate %653 by %c4_i32_50 dim 1 : vector<16x128xf32>, i32 -> vector<16x128xf32>
    %cst_51 = arith.constant 0.000000e+00 : f32
    %660 = vector.broadcast %cst_51 : f32 to vector<16x128xf32>
    %661 = arith.select %658, %659, %660 : vector<16x128xi1>, vector<16x128xf32>
    %662 = vector.extract_strided_slice %655 {offsets = [0, 0], sizes = [16, 1], strides = [1, 1]} : vector<16x16xf32> to vector<16x1xf32>
    %663 = vector.extract_strided_slice %661 {offsets = [0, 0], sizes = [1, 128], strides = [1, 1]} : vector<16x128xf32> to vector<1x128xf32>
    %664 = vector.broadcast %662 : vector<16x1xf32> to vector<16x128xf32>
    %665 = vector.broadcast %663 : vector<1x128xf32> to vector<16x128xf32>
    %666 = arith.mulf %664, %665 : vector<16x128xf32>
    %667 = vector.extract_strided_slice %655 {offsets = [0, 1], sizes = [16, 1], strides = [1, 1]} : vector<16x16xf32> to vector<16x1xf32>
    %668 = vector.extract_strided_slice %661 {offsets = [1, 0], sizes = [1, 128], strides = [1, 1]} : vector<16x128xf32> to vector<1x128xf32>
    %669 = vector.broadcast %667 : vector<16x1xf32> to vector<16x128xf32>
    %670 = vector.broadcast %668 : vector<1x128xf32> to vector<16x128xf32>
    %671 = arith.mulf %669, %670 : vector<16x128xf32>
    %672 = vector.extract_strided_slice %655 {offsets = [0, 2], sizes = [16, 1], strides = [1, 1]} : vector<16x16xf32> to vector<16x1xf32>
    %673 = vector.extract_strided_slice %661 {offsets = [2, 0], sizes = [1, 128], strides = [1, 1]} : vector<16x128xf32> to vector<1x128xf32>
    %674 = vector.broadcast %672 : vector<16x1xf32> to vector<16x128xf32>
    %675 = vector.broadcast %673 : vector<1x128xf32> to vector<16x128xf32>
    %676 = arith.mulf %674, %675 : vector<16x128xf32>
    %677 = vector.extract_strided_slice %655 {offsets = [0, 3], sizes = [16, 1], strides = [1, 1]} : vector<16x16xf32> to vector<16x1xf32>
    %678 = vector.extract_strided_slice %661 {offsets = [3, 0], sizes = [1, 128], strides = [1, 1]} : vector<16x128xf32> to vector<1x128xf32>
    %679 = vector.broadcast %677 : vector<16x1xf32> to vector<16x128xf32>
    %680 = vector.broadcast %678 : vector<1x128xf32> to vector<16x128xf32>
    %681 = arith.mulf %679, %680 : vector<16x128xf32>
    %682 = vector.extract_strided_slice %655 {offsets = [0, 4], sizes = [16, 1], strides = [1, 1]} : vector<16x16xf32> to vector<16x1xf32>
    %683 = vector.extract_strided_slice %661 {offsets = [4, 0], sizes = [1, 128], strides = [1, 1]} : vector<16x128xf32> to vector<1x128xf32>
    %684 = vector.broadcast %682 : vector<16x1xf32> to vector<16x128xf32>
    %685 = vector.broadcast %683 : vector<1x128xf32> to vector<16x128xf32>
    %686 = arith.mulf %684, %685 : vector<16x128xf32>
    %687 = vector.extract_strided_slice %655 {offsets = [0, 5], sizes = [16, 1], strides = [1, 1]} : vector<16x16xf32> to vector<16x1xf32>
    %688 = vector.extract_strided_slice %661 {offsets = [5, 0], sizes = [1, 128], strides = [1, 1]} : vector<16x128xf32> to vector<1x128xf32>
    %689 = vector.broadcast %687 : vector<16x1xf32> to vector<16x128xf32>
    %690 = vector.broadcast %688 : vector<1x128xf32> to vector<16x128xf32>
    %691 = arith.mulf %689, %690 : vector<16x128xf32>
    %692 = vector.extract_strided_slice %655 {offsets = [0, 6], sizes = [16, 1], strides = [1, 1]} : vector<16x16xf32> to vector<16x1xf32>
    %693 = vector.extract_strided_slice %661 {offsets = [6, 0], sizes = [1, 128], strides = [1, 1]} : vector<16x128xf32> to vector<1x128xf32>
    %694 = vector.broadcast %692 : vector<16x1xf32> to vector<16x128xf32>
    %695 = vector.broadcast %693 : vector<1x128xf32> to vector<16x128xf32>
    %696 = arith.mulf %694, %695 : vector<16x128xf32>
    %697 = vector.extract_strided_slice %655 {offsets = [0, 7], sizes = [16, 1], strides = [1, 1]} : vector<16x16xf32> to vector<16x1xf32>
    %698 = vector.extract_strided_slice %661 {offsets = [7, 0], sizes = [1, 128], strides = [1, 1]} : vector<16x128xf32> to vector<1x128xf32>
    %699 = vector.broadcast %697 : vector<16x1xf32> to vector<16x128xf32>
    %700 = vector.broadcast %698 : vector<1x128xf32> to vector<16x128xf32>
    %701 = arith.mulf %699, %700 : vector<16x128xf32>
    %702 = vector.extract_strided_slice %655 {offsets = [0, 8], sizes = [16, 1], strides = [1, 1]} : vector<16x16xf32> to vector<16x1xf32>
    %703 = vector.extract_strided_slice %661 {offsets = [8, 0], sizes = [1, 128], strides = [1, 1]} : vector<16x128xf32> to vector<1x128xf32>
    %704 = vector.broadcast %702 : vector<16x1xf32> to vector<16x128xf32>
    %705 = vector.broadcast %703 : vector<1x128xf32> to vector<16x128xf32>
    %706 = arith.mulf %704, %705 : vector<16x128xf32>
    %707 = vector.extract_strided_slice %655 {offsets = [0, 9], sizes = [16, 1], strides = [1, 1]} : vector<16x16xf32> to vector<16x1xf32>
    %708 = vector.extract_strided_slice %661 {offsets = [9, 0], sizes = [1, 128], strides = [1, 1]} : vector<16x128xf32> to vector<1x128xf32>
    %709 = vector.broadcast %707 : vector<16x1xf32> to vector<16x128xf32>
    %710 = vector.broadcast %708 : vector<1x128xf32> to vector<16x128xf32>
    %711 = arith.mulf %709, %710 : vector<16x128xf32>
    %712 = vector.extract_strided_slice %655 {offsets = [0, 10], sizes = [16, 1], strides = [1, 1]} : vector<16x16xf32> to vector<16x1xf32>
    %713 = vector.extract_strided_slice %661 {offsets = [10, 0], sizes = [1, 128], strides = [1, 1]} : vector<16x128xf32> to vector<1x128xf32>
    %714 = vector.broadcast %712 : vector<16x1xf32> to vector<16x128xf32>
    %715 = vector.broadcast %713 : vector<1x128xf32> to vector<16x128xf32>
    %716 = arith.mulf %714, %715 : vector<16x128xf32>
    %717 = vector.extract_strided_slice %655 {offsets = [0, 11], sizes = [16, 1], strides = [1, 1]} : vector<16x16xf32> to vector<16x1xf32>
    %718 = vector.extract_strided_slice %661 {offsets = [11, 0], sizes = [1, 128], strides = [1, 1]} : vector<16x128xf32> to vector<1x128xf32>
    %719 = vector.broadcast %717 : vector<16x1xf32> to vector<16x128xf32>
    %720 = vector.broadcast %718 : vector<1x128xf32> to vector<16x128xf32>
    %721 = arith.mulf %719, %720 : vector<16x128xf32>
    %722 = vector.extract_strided_slice %655 {offsets = [0, 12], sizes = [16, 1], strides = [1, 1]} : vector<16x16xf32> to vector<16x1xf32>
    %723 = vector.extract_strided_slice %661 {offsets = [12, 0], sizes = [1, 128], strides = [1, 1]} : vector<16x128xf32> to vector<1x128xf32>
    %724 = vector.broadcast %722 : vector<16x1xf32> to vector<16x128xf32>
    %725 = vector.broadcast %723 : vector<1x128xf32> to vector<16x128xf32>
    %726 = arith.mulf %724, %725 : vector<16x128xf32>
    %727 = vector.extract_strided_slice %655 {offsets = [0, 13], sizes = [16, 1], strides = [1, 1]} : vector<16x16xf32> to vector<16x1xf32>
    %728 = vector.extract_strided_slice %661 {offsets = [13, 0], sizes = [1, 128], strides = [1, 1]} : vector<16x128xf32> to vector<1x128xf32>
    %729 = vector.broadcast %727 : vector<16x1xf32> to vector<16x128xf32>
    %730 = vector.broadcast %728 : vector<1x128xf32> to vector<16x128xf32>
    %731 = arith.mulf %729, %730 : vector<16x128xf32>
    %732 = vector.extract_strided_slice %655 {offsets = [0, 14], sizes = [16, 1], strides = [1, 1]} : vector<16x16xf32> to vector<16x1xf32>
    %733 = vector.extract_strided_slice %661 {offsets = [14, 0], sizes = [1, 128], strides = [1, 1]} : vector<16x128xf32> to vector<1x128xf32>
    %734 = vector.broadcast %732 : vector<16x1xf32> to vector<16x128xf32>
    %735 = vector.broadcast %733 : vector<1x128xf32> to vector<16x128xf32>
    %736 = arith.mulf %734, %735 : vector<16x128xf32>
    %737 = vector.extract_strided_slice %655 {offsets = [0, 15], sizes = [16, 1], strides = [1, 1]} : vector<16x16xf32> to vector<16x1xf32>
    %738 = vector.extract_strided_slice %661 {offsets = [15, 0], sizes = [1, 128], strides = [1, 1]} : vector<16x128xf32> to vector<1x128xf32>
    %739 = vector.broadcast %737 : vector<16x1xf32> to vector<16x128xf32>
    %740 = vector.broadcast %738 : vector<1x128xf32> to vector<16x128xf32>
    %741 = arith.mulf %739, %740 : vector<16x128xf32>
    %742 = vector.extract_strided_slice %10 {offsets = [1, 0, 0], sizes = [1, 16, 16], strides = [1, 1, 1]} : vector<2x16x16xf32> to vector<1x16x16xf32>
    %743 = vector.shape_cast %742 : vector<1x16x16xf32> to vector<16x16xf32>
    %744 = vector.extract_strided_slice %743 {offsets = [0, 0], sizes = [16, 1], strides = [1, 1]} : vector<16x16xf32> to vector<16x1xf32>
    %745 = vector.extract_strided_slice %653 {offsets = [0, 0], sizes = [1, 128], strides = [1, 1]} : vector<16x128xf32> to vector<1x128xf32>
    %746 = vector.broadcast %744 : vector<16x1xf32> to vector<16x128xf32>
    %747 = vector.broadcast %745 : vector<1x128xf32> to vector<16x128xf32>
    %748 = arith.mulf %746, %747 : vector<16x128xf32>
    %749 = vector.extract_strided_slice %743 {offsets = [0, 1], sizes = [16, 1], strides = [1, 1]} : vector<16x16xf32> to vector<16x1xf32>
    %750 = vector.extract_strided_slice %653 {offsets = [1, 0], sizes = [1, 128], strides = [1, 1]} : vector<16x128xf32> to vector<1x128xf32>
    %751 = vector.broadcast %749 : vector<16x1xf32> to vector<16x128xf32>
    %752 = vector.broadcast %750 : vector<1x128xf32> to vector<16x128xf32>
    %753 = arith.mulf %751, %752 : vector<16x128xf32>
    %754 = vector.extract_strided_slice %743 {offsets = [0, 2], sizes = [16, 1], strides = [1, 1]} : vector<16x16xf32> to vector<16x1xf32>
    %755 = vector.extract_strided_slice %653 {offsets = [2, 0], sizes = [1, 128], strides = [1, 1]} : vector<16x128xf32> to vector<1x128xf32>
    %756 = vector.broadcast %754 : vector<16x1xf32> to vector<16x128xf32>
    %757 = vector.broadcast %755 : vector<1x128xf32> to vector<16x128xf32>
    %758 = arith.mulf %756, %757 : vector<16x128xf32>
    %759 = vector.extract_strided_slice %743 {offsets = [0, 3], sizes = [16, 1], strides = [1, 1]} : vector<16x16xf32> to vector<16x1xf32>
    %760 = vector.extract_strided_slice %653 {offsets = [3, 0], sizes = [1, 128], strides = [1, 1]} : vector<16x128xf32> to vector<1x128xf32>
    %761 = vector.broadcast %759 : vector<16x1xf32> to vector<16x128xf32>
    %762 = vector.broadcast %760 : vector<1x128xf32> to vector<16x128xf32>
    %763 = arith.mulf %761, %762 : vector<16x128xf32>
    %764 = vector.extract_strided_slice %743 {offsets = [0, 4], sizes = [16, 1], strides = [1, 1]} : vector<16x16xf32> to vector<16x1xf32>
    %765 = vector.extract_strided_slice %653 {offsets = [4, 0], sizes = [1, 128], strides = [1, 1]} : vector<16x128xf32> to vector<1x128xf32>
    %766 = vector.broadcast %764 : vector<16x1xf32> to vector<16x128xf32>
    %767 = vector.broadcast %765 : vector<1x128xf32> to vector<16x128xf32>
    %768 = arith.mulf %766, %767 : vector<16x128xf32>
    %769 = vector.extract_strided_slice %743 {offsets = [0, 5], sizes = [16, 1], strides = [1, 1]} : vector<16x16xf32> to vector<16x1xf32>
    %770 = vector.extract_strided_slice %653 {offsets = [5, 0], sizes = [1, 128], strides = [1, 1]} : vector<16x128xf32> to vector<1x128xf32>
    %771 = vector.broadcast %769 : vector<16x1xf32> to vector<16x128xf32>
    %772 = vector.broadcast %770 : vector<1x128xf32> to vector<16x128xf32>
    %773 = arith.mulf %771, %772 : vector<16x128xf32>
    %774 = vector.extract_strided_slice %743 {offsets = [0, 6], sizes = [16, 1], strides = [1, 1]} : vector<16x16xf32> to vector<16x1xf32>
    %775 = vector.extract_strided_slice %653 {offsets = [6, 0], sizes = [1, 128], strides = [1, 1]} : vector<16x128xf32> to vector<1x128xf32>
    %776 = vector.broadcast %774 : vector<16x1xf32> to vector<16x128xf32>
    %777 = vector.broadcast %775 : vector<1x128xf32> to vector<16x128xf32>
    %778 = arith.mulf %776, %777 : vector<16x128xf32>
    %779 = vector.extract_strided_slice %743 {offsets = [0, 7], sizes = [16, 1], strides = [1, 1]} : vector<16x16xf32> to vector<16x1xf32>
    %780 = vector.extract_strided_slice %653 {offsets = [7, 0], sizes = [1, 128], strides = [1, 1]} : vector<16x128xf32> to vector<1x128xf32>
    %781 = vector.broadcast %779 : vector<16x1xf32> to vector<16x128xf32>
    %782 = vector.broadcast %780 : vector<1x128xf32> to vector<16x128xf32>
    %783 = arith.mulf %781, %782 : vector<16x128xf32>
    %784 = vector.extract_strided_slice %743 {offsets = [0, 8], sizes = [16, 1], strides = [1, 1]} : vector<16x16xf32> to vector<16x1xf32>
    %785 = vector.extract_strided_slice %653 {offsets = [8, 0], sizes = [1, 128], strides = [1, 1]} : vector<16x128xf32> to vector<1x128xf32>
    %786 = vector.broadcast %784 : vector<16x1xf32> to vector<16x128xf32>
    %787 = vector.broadcast %785 : vector<1x128xf32> to vector<16x128xf32>
    %788 = arith.mulf %786, %787 : vector<16x128xf32>
    %789 = vector.extract_strided_slice %743 {offsets = [0, 9], sizes = [16, 1], strides = [1, 1]} : vector<16x16xf32> to vector<16x1xf32>
    %790 = vector.extract_strided_slice %653 {offsets = [9, 0], sizes = [1, 128], strides = [1, 1]} : vector<16x128xf32> to vector<1x128xf32>
    %791 = vector.broadcast %789 : vector<16x1xf32> to vector<16x128xf32>
    %792 = vector.broadcast %790 : vector<1x128xf32> to vector<16x128xf32>
    %793 = arith.mulf %791, %792 : vector<16x128xf32>
    %794 = vector.extract_strided_slice %743 {offsets = [0, 10], sizes = [16, 1], strides = [1, 1]} : vector<16x16xf32> to vector<16x1xf32>
    %795 = vector.extract_strided_slice %653 {offsets = [10, 0], sizes = [1, 128], strides = [1, 1]} : vector<16x128xf32> to vector<1x128xf32>
    %796 = vector.broadcast %794 : vector<16x1xf32> to vector<16x128xf32>
    %797 = vector.broadcast %795 : vector<1x128xf32> to vector<16x128xf32>
    %798 = arith.mulf %796, %797 : vector<16x128xf32>
    %799 = vector.extract_strided_slice %743 {offsets = [0, 11], sizes = [16, 1], strides = [1, 1]} : vector<16x16xf32> to vector<16x1xf32>
    %800 = vector.extract_strided_slice %653 {offsets = [11, 0], sizes = [1, 128], strides = [1, 1]} : vector<16x128xf32> to vector<1x128xf32>
    %801 = vector.broadcast %799 : vector<16x1xf32> to vector<16x128xf32>
    %802 = vector.broadcast %800 : vector<1x128xf32> to vector<16x128xf32>
    %803 = arith.mulf %801, %802 : vector<16x128xf32>
    %804 = vector.extract_strided_slice %743 {offsets = [0, 12], sizes = [16, 1], strides = [1, 1]} : vector<16x16xf32> to vector<16x1xf32>
    %805 = vector.extract_strided_slice %653 {offsets = [12, 0], sizes = [1, 128], strides = [1, 1]} : vector<16x128xf32> to vector<1x128xf32>
    %806 = vector.broadcast %804 : vector<16x1xf32> to vector<16x128xf32>
    %807 = vector.broadcast %805 : vector<1x128xf32> to vector<16x128xf32>
    %808 = arith.mulf %806, %807 : vector<16x128xf32>
    %809 = vector.extract_strided_slice %743 {offsets = [0, 13], sizes = [16, 1], strides = [1, 1]} : vector<16x16xf32> to vector<16x1xf32>
    %810 = vector.extract_strided_slice %653 {offsets = [13, 0], sizes = [1, 128], strides = [1, 1]} : vector<16x128xf32> to vector<1x128xf32>
    %811 = vector.broadcast %809 : vector<16x1xf32> to vector<16x128xf32>
    %812 = vector.broadcast %810 : vector<1x128xf32> to vector<16x128xf32>
    %813 = arith.mulf %811, %812 : vector<16x128xf32>
    %814 = vector.extract_strided_slice %743 {offsets = [0, 14], sizes = [16, 1], strides = [1, 1]} : vector<16x16xf32> to vector<16x1xf32>
    %815 = vector.extract_strided_slice %653 {offsets = [14, 0], sizes = [1, 128], strides = [1, 1]} : vector<16x128xf32> to vector<1x128xf32>
    %816 = vector.broadcast %814 : vector<16x1xf32> to vector<16x128xf32>
    %817 = vector.broadcast %815 : vector<1x128xf32> to vector<16x128xf32>
    %818 = arith.mulf %816, %817 : vector<16x128xf32>
    %819 = vector.extract_strided_slice %743 {offsets = [0, 15], sizes = [16, 1], strides = [1, 1]} : vector<16x16xf32> to vector<16x1xf32>
    %820 = vector.extract_strided_slice %653 {offsets = [15, 0], sizes = [1, 128], strides = [1, 1]} : vector<16x128xf32> to vector<1x128xf32>
    %821 = vector.broadcast %819 : vector<16x1xf32> to vector<16x128xf32>
    %822 = vector.broadcast %820 : vector<1x128xf32> to vector<16x128xf32>
    %823 = arith.mulf %821, %822 : vector<16x128xf32>
    %824 = arith.addf %666, %671 : vector<16x128xf32>
    %825 = arith.addf %676, %681 : vector<16x128xf32>
    %826 = arith.addf %686, %691 : vector<16x128xf32>
    %827 = arith.addf %696, %701 : vector<16x128xf32>
    %828 = arith.addf %706, %711 : vector<16x128xf32>
    %829 = arith.addf %716, %721 : vector<16x128xf32>
    %830 = arith.addf %726, %731 : vector<16x128xf32>
    %831 = arith.addf %736, %741 : vector<16x128xf32>
    %832 = arith.addf %748, %753 : vector<16x128xf32>
    %833 = arith.addf %758, %763 : vector<16x128xf32>
    %834 = arith.addf %768, %773 : vector<16x128xf32>
    %835 = arith.addf %778, %783 : vector<16x128xf32>
    %836 = arith.addf %788, %793 : vector<16x128xf32>
    %837 = arith.addf %798, %803 : vector<16x128xf32>
    %838 = arith.addf %808, %813 : vector<16x128xf32>
    %839 = arith.addf %818, %823 : vector<16x128xf32>
    %840 = arith.addf %824, %825 : vector<16x128xf32>
    %841 = arith.addf %826, %827 : vector<16x128xf32>
    %842 = arith.addf %828, %829 : vector<16x128xf32>
    %843 = arith.addf %830, %831 : vector<16x128xf32>
    %844 = arith.addf %832, %833 : vector<16x128xf32>
    %845 = arith.addf %834, %835 : vector<16x128xf32>
    %846 = arith.addf %836, %837 : vector<16x128xf32>
    %847 = arith.addf %838, %839 : vector<16x128xf32>
    %848 = arith.addf %840, %841 : vector<16x128xf32>
    %849 = arith.addf %842, %843 : vector<16x128xf32>
    %850 = arith.addf %844, %845 : vector<16x128xf32>
    %851 = arith.addf %846, %847 : vector<16x128xf32>
    %852 = arith.addf %848, %849 : vector<16x128xf32>
    %853 = arith.addf %850, %851 : vector<16x128xf32>
    %854 = arith.addf %852, %853 : vector<16x128xf32>
    %855 = vector.broadcast %11 : vector<16x1xf32> to vector<16x128xf32>
    %856 = arith.addf %854, %855 : vector<16x128xf32>
    %857 = vector.extract_strided_slice %12 {offsets = [0, 0, 0], sizes = [1, 16, 16], strides = [1, 1, 1]} : vector<2x16x16xf32> to vector<1x16x16xf32>
    %858 = vector.shape_cast %857 : vector<1x16x16xf32> to vector<16x16xf32>
    %c4_i32_52 = arith.constant 4 : i32
    %859 = tpu.dynamic_rotate %856 by %c4_i32_52 dim 1 : vector<16x128xf32>, i32 -> vector<16x128xf32>
    %cst_53 = arith.constant 0.000000e+00 : f32
    %860 = vector.broadcast %cst_53 : f32 to vector<16x128xf32>
    %861 = arith.select %658, %859, %860 : vector<16x128xi1>, vector<16x128xf32>
    %862 = vector.extract_strided_slice %858 {offsets = [0, 0], sizes = [16, 1], strides = [1, 1]} : vector<16x16xf32> to vector<16x1xf32>
    %863 = vector.extract_strided_slice %861 {offsets = [0, 0], sizes = [1, 128], strides = [1, 1]} : vector<16x128xf32> to vector<1x128xf32>
    %864 = vector.broadcast %862 : vector<16x1xf32> to vector<16x128xf32>
    %865 = vector.broadcast %863 : vector<1x128xf32> to vector<16x128xf32>
    %866 = arith.mulf %864, %865 : vector<16x128xf32>
    %867 = vector.extract_strided_slice %858 {offsets = [0, 1], sizes = [16, 1], strides = [1, 1]} : vector<16x16xf32> to vector<16x1xf32>
    %868 = vector.extract_strided_slice %861 {offsets = [1, 0], sizes = [1, 128], strides = [1, 1]} : vector<16x128xf32> to vector<1x128xf32>
    %869 = vector.broadcast %867 : vector<16x1xf32> to vector<16x128xf32>
    %870 = vector.broadcast %868 : vector<1x128xf32> to vector<16x128xf32>
    %871 = arith.mulf %869, %870 : vector<16x128xf32>
    %872 = vector.extract_strided_slice %858 {offsets = [0, 2], sizes = [16, 1], strides = [1, 1]} : vector<16x16xf32> to vector<16x1xf32>
    %873 = vector.extract_strided_slice %861 {offsets = [2, 0], sizes = [1, 128], strides = [1, 1]} : vector<16x128xf32> to vector<1x128xf32>
    %874 = vector.broadcast %872 : vector<16x1xf32> to vector<16x128xf32>
    %875 = vector.broadcast %873 : vector<1x128xf32> to vector<16x128xf32>
    %876 = arith.mulf %874, %875 : vector<16x128xf32>
    %877 = vector.extract_strided_slice %858 {offsets = [0, 3], sizes = [16, 1], strides = [1, 1]} : vector<16x16xf32> to vector<16x1xf32>
    %878 = vector.extract_strided_slice %861 {offsets = [3, 0], sizes = [1, 128], strides = [1, 1]} : vector<16x128xf32> to vector<1x128xf32>
    %879 = vector.broadcast %877 : vector<16x1xf32> to vector<16x128xf32>
    %880 = vector.broadcast %878 : vector<1x128xf32> to vector<16x128xf32>
    %881 = arith.mulf %879, %880 : vector<16x128xf32>
    %882 = vector.extract_strided_slice %858 {offsets = [0, 4], sizes = [16, 1], strides = [1, 1]} : vector<16x16xf32> to vector<16x1xf32>
    %883 = vector.extract_strided_slice %861 {offsets = [4, 0], sizes = [1, 128], strides = [1, 1]} : vector<16x128xf32> to vector<1x128xf32>
    %884 = vector.broadcast %882 : vector<16x1xf32> to vector<16x128xf32>
    %885 = vector.broadcast %883 : vector<1x128xf32> to vector<16x128xf32>
    %886 = arith.mulf %884, %885 : vector<16x128xf32>
    %887 = vector.extract_strided_slice %858 {offsets = [0, 5], sizes = [16, 1], strides = [1, 1]} : vector<16x16xf32> to vector<16x1xf32>
    %888 = vector.extract_strided_slice %861 {offsets = [5, 0], sizes = [1, 128], strides = [1, 1]} : vector<16x128xf32> to vector<1x128xf32>
    %889 = vector.broadcast %887 : vector<16x1xf32> to vector<16x128xf32>
    %890 = vector.broadcast %888 : vector<1x128xf32> to vector<16x128xf32>
    %891 = arith.mulf %889, %890 : vector<16x128xf32>
    %892 = vector.extract_strided_slice %858 {offsets = [0, 6], sizes = [16, 1], strides = [1, 1]} : vector<16x16xf32> to vector<16x1xf32>
    %893 = vector.extract_strided_slice %861 {offsets = [6, 0], sizes = [1, 128], strides = [1, 1]} : vector<16x128xf32> to vector<1x128xf32>
    %894 = vector.broadcast %892 : vector<16x1xf32> to vector<16x128xf32>
    %895 = vector.broadcast %893 : vector<1x128xf32> to vector<16x128xf32>
    %896 = arith.mulf %894, %895 : vector<16x128xf32>
    %897 = vector.extract_strided_slice %858 {offsets = [0, 7], sizes = [16, 1], strides = [1, 1]} : vector<16x16xf32> to vector<16x1xf32>
    %898 = vector.extract_strided_slice %861 {offsets = [7, 0], sizes = [1, 128], strides = [1, 1]} : vector<16x128xf32> to vector<1x128xf32>
    %899 = vector.broadcast %897 : vector<16x1xf32> to vector<16x128xf32>
    %900 = vector.broadcast %898 : vector<1x128xf32> to vector<16x128xf32>
    %901 = arith.mulf %899, %900 : vector<16x128xf32>
    %902 = vector.extract_strided_slice %858 {offsets = [0, 8], sizes = [16, 1], strides = [1, 1]} : vector<16x16xf32> to vector<16x1xf32>
    %903 = vector.extract_strided_slice %861 {offsets = [8, 0], sizes = [1, 128], strides = [1, 1]} : vector<16x128xf32> to vector<1x128xf32>
    %904 = vector.broadcast %902 : vector<16x1xf32> to vector<16x128xf32>
    %905 = vector.broadcast %903 : vector<1x128xf32> to vector<16x128xf32>
    %906 = arith.mulf %904, %905 : vector<16x128xf32>
    %907 = vector.extract_strided_slice %858 {offsets = [0, 9], sizes = [16, 1], strides = [1, 1]} : vector<16x16xf32> to vector<16x1xf32>
    %908 = vector.extract_strided_slice %861 {offsets = [9, 0], sizes = [1, 128], strides = [1, 1]} : vector<16x128xf32> to vector<1x128xf32>
    %909 = vector.broadcast %907 : vector<16x1xf32> to vector<16x128xf32>
    %910 = vector.broadcast %908 : vector<1x128xf32> to vector<16x128xf32>
    %911 = arith.mulf %909, %910 : vector<16x128xf32>
    %912 = vector.extract_strided_slice %858 {offsets = [0, 10], sizes = [16, 1], strides = [1, 1]} : vector<16x16xf32> to vector<16x1xf32>
    %913 = vector.extract_strided_slice %861 {offsets = [10, 0], sizes = [1, 128], strides = [1, 1]} : vector<16x128xf32> to vector<1x128xf32>
    %914 = vector.broadcast %912 : vector<16x1xf32> to vector<16x128xf32>
    %915 = vector.broadcast %913 : vector<1x128xf32> to vector<16x128xf32>
    %916 = arith.mulf %914, %915 : vector<16x128xf32>
    %917 = vector.extract_strided_slice %858 {offsets = [0, 11], sizes = [16, 1], strides = [1, 1]} : vector<16x16xf32> to vector<16x1xf32>
    %918 = vector.extract_strided_slice %861 {offsets = [11, 0], sizes = [1, 128], strides = [1, 1]} : vector<16x128xf32> to vector<1x128xf32>
    %919 = vector.broadcast %917 : vector<16x1xf32> to vector<16x128xf32>
    %920 = vector.broadcast %918 : vector<1x128xf32> to vector<16x128xf32>
    %921 = arith.mulf %919, %920 : vector<16x128xf32>
    %922 = vector.extract_strided_slice %858 {offsets = [0, 12], sizes = [16, 1], strides = [1, 1]} : vector<16x16xf32> to vector<16x1xf32>
    %923 = vector.extract_strided_slice %861 {offsets = [12, 0], sizes = [1, 128], strides = [1, 1]} : vector<16x128xf32> to vector<1x128xf32>
    %924 = vector.broadcast %922 : vector<16x1xf32> to vector<16x128xf32>
    %925 = vector.broadcast %923 : vector<1x128xf32> to vector<16x128xf32>
    %926 = arith.mulf %924, %925 : vector<16x128xf32>
    %927 = vector.extract_strided_slice %858 {offsets = [0, 13], sizes = [16, 1], strides = [1, 1]} : vector<16x16xf32> to vector<16x1xf32>
    %928 = vector.extract_strided_slice %861 {offsets = [13, 0], sizes = [1, 128], strides = [1, 1]} : vector<16x128xf32> to vector<1x128xf32>
    %929 = vector.broadcast %927 : vector<16x1xf32> to vector<16x128xf32>
    %930 = vector.broadcast %928 : vector<1x128xf32> to vector<16x128xf32>
    %931 = arith.mulf %929, %930 : vector<16x128xf32>
    %932 = vector.extract_strided_slice %858 {offsets = [0, 14], sizes = [16, 1], strides = [1, 1]} : vector<16x16xf32> to vector<16x1xf32>
    %933 = vector.extract_strided_slice %861 {offsets = [14, 0], sizes = [1, 128], strides = [1, 1]} : vector<16x128xf32> to vector<1x128xf32>
    %934 = vector.broadcast %932 : vector<16x1xf32> to vector<16x128xf32>
    %935 = vector.broadcast %933 : vector<1x128xf32> to vector<16x128xf32>
    %936 = arith.mulf %934, %935 : vector<16x128xf32>
    %937 = vector.extract_strided_slice %858 {offsets = [0, 15], sizes = [16, 1], strides = [1, 1]} : vector<16x16xf32> to vector<16x1xf32>
    %938 = vector.extract_strided_slice %861 {offsets = [15, 0], sizes = [1, 128], strides = [1, 1]} : vector<16x128xf32> to vector<1x128xf32>
    %939 = vector.broadcast %937 : vector<16x1xf32> to vector<16x128xf32>
    %940 = vector.broadcast %938 : vector<1x128xf32> to vector<16x128xf32>
    %941 = arith.mulf %939, %940 : vector<16x128xf32>
    %942 = vector.extract_strided_slice %12 {offsets = [1, 0, 0], sizes = [1, 16, 16], strides = [1, 1, 1]} : vector<2x16x16xf32> to vector<1x16x16xf32>
    %943 = vector.shape_cast %942 : vector<1x16x16xf32> to vector<16x16xf32>
    %944 = vector.extract_strided_slice %943 {offsets = [0, 0], sizes = [16, 1], strides = [1, 1]} : vector<16x16xf32> to vector<16x1xf32>
    %945 = vector.extract_strided_slice %856 {offsets = [0, 0], sizes = [1, 128], strides = [1, 1]} : vector<16x128xf32> to vector<1x128xf32>
    %946 = vector.broadcast %944 : vector<16x1xf32> to vector<16x128xf32>
    %947 = vector.broadcast %945 : vector<1x128xf32> to vector<16x128xf32>
    %948 = arith.mulf %946, %947 : vector<16x128xf32>
    %949 = vector.extract_strided_slice %943 {offsets = [0, 1], sizes = [16, 1], strides = [1, 1]} : vector<16x16xf32> to vector<16x1xf32>
    %950 = vector.extract_strided_slice %856 {offsets = [1, 0], sizes = [1, 128], strides = [1, 1]} : vector<16x128xf32> to vector<1x128xf32>
    %951 = vector.broadcast %949 : vector<16x1xf32> to vector<16x128xf32>
    %952 = vector.broadcast %950 : vector<1x128xf32> to vector<16x128xf32>
    %953 = arith.mulf %951, %952 : vector<16x128xf32>
    %954 = vector.extract_strided_slice %943 {offsets = [0, 2], sizes = [16, 1], strides = [1, 1]} : vector<16x16xf32> to vector<16x1xf32>
    %955 = vector.extract_strided_slice %856 {offsets = [2, 0], sizes = [1, 128], strides = [1, 1]} : vector<16x128xf32> to vector<1x128xf32>
    %956 = vector.broadcast %954 : vector<16x1xf32> to vector<16x128xf32>
    %957 = vector.broadcast %955 : vector<1x128xf32> to vector<16x128xf32>
    %958 = arith.mulf %956, %957 : vector<16x128xf32>
    %959 = vector.extract_strided_slice %943 {offsets = [0, 3], sizes = [16, 1], strides = [1, 1]} : vector<16x16xf32> to vector<16x1xf32>
    %960 = vector.extract_strided_slice %856 {offsets = [3, 0], sizes = [1, 128], strides = [1, 1]} : vector<16x128xf32> to vector<1x128xf32>
    %961 = vector.broadcast %959 : vector<16x1xf32> to vector<16x128xf32>
    %962 = vector.broadcast %960 : vector<1x128xf32> to vector<16x128xf32>
    %963 = arith.mulf %961, %962 : vector<16x128xf32>
    %964 = vector.extract_strided_slice %943 {offsets = [0, 4], sizes = [16, 1], strides = [1, 1]} : vector<16x16xf32> to vector<16x1xf32>
    %965 = vector.extract_strided_slice %856 {offsets = [4, 0], sizes = [1, 128], strides = [1, 1]} : vector<16x128xf32> to vector<1x128xf32>
    %966 = vector.broadcast %964 : vector<16x1xf32> to vector<16x128xf32>
    %967 = vector.broadcast %965 : vector<1x128xf32> to vector<16x128xf32>
    %968 = arith.mulf %966, %967 : vector<16x128xf32>
    %969 = vector.extract_strided_slice %943 {offsets = [0, 5], sizes = [16, 1], strides = [1, 1]} : vector<16x16xf32> to vector<16x1xf32>
    %970 = vector.extract_strided_slice %856 {offsets = [5, 0], sizes = [1, 128], strides = [1, 1]} : vector<16x128xf32> to vector<1x128xf32>
    %971 = vector.broadcast %969 : vector<16x1xf32> to vector<16x128xf32>
    %972 = vector.broadcast %970 : vector<1x128xf32> to vector<16x128xf32>
    %973 = arith.mulf %971, %972 : vector<16x128xf32>
    %974 = vector.extract_strided_slice %943 {offsets = [0, 6], sizes = [16, 1], strides = [1, 1]} : vector<16x16xf32> to vector<16x1xf32>
    %975 = vector.extract_strided_slice %856 {offsets = [6, 0], sizes = [1, 128], strides = [1, 1]} : vector<16x128xf32> to vector<1x128xf32>
    %976 = vector.broadcast %974 : vector<16x1xf32> to vector<16x128xf32>
    %977 = vector.broadcast %975 : vector<1x128xf32> to vector<16x128xf32>
    %978 = arith.mulf %976, %977 : vector<16x128xf32>
    %979 = vector.extract_strided_slice %943 {offsets = [0, 7], sizes = [16, 1], strides = [1, 1]} : vector<16x16xf32> to vector<16x1xf32>
    %980 = vector.extract_strided_slice %856 {offsets = [7, 0], sizes = [1, 128], strides = [1, 1]} : vector<16x128xf32> to vector<1x128xf32>
    %981 = vector.broadcast %979 : vector<16x1xf32> to vector<16x128xf32>
    %982 = vector.broadcast %980 : vector<1x128xf32> to vector<16x128xf32>
    %983 = arith.mulf %981, %982 : vector<16x128xf32>
    %984 = vector.extract_strided_slice %943 {offsets = [0, 8], sizes = [16, 1], strides = [1, 1]} : vector<16x16xf32> to vector<16x1xf32>
    %985 = vector.extract_strided_slice %856 {offsets = [8, 0], sizes = [1, 128], strides = [1, 1]} : vector<16x128xf32> to vector<1x128xf32>
    %986 = vector.broadcast %984 : vector<16x1xf32> to vector<16x128xf32>
    %987 = vector.broadcast %985 : vector<1x128xf32> to vector<16x128xf32>
    %988 = arith.mulf %986, %987 : vector<16x128xf32>
    %989 = vector.extract_strided_slice %943 {offsets = [0, 9], sizes = [16, 1], strides = [1, 1]} : vector<16x16xf32> to vector<16x1xf32>
    %990 = vector.extract_strided_slice %856 {offsets = [9, 0], sizes = [1, 128], strides = [1, 1]} : vector<16x128xf32> to vector<1x128xf32>
    %991 = vector.broadcast %989 : vector<16x1xf32> to vector<16x128xf32>
    %992 = vector.broadcast %990 : vector<1x128xf32> to vector<16x128xf32>
    %993 = arith.mulf %991, %992 : vector<16x128xf32>
    %994 = vector.extract_strided_slice %943 {offsets = [0, 10], sizes = [16, 1], strides = [1, 1]} : vector<16x16xf32> to vector<16x1xf32>
    %995 = vector.extract_strided_slice %856 {offsets = [10, 0], sizes = [1, 128], strides = [1, 1]} : vector<16x128xf32> to vector<1x128xf32>
    %996 = vector.broadcast %994 : vector<16x1xf32> to vector<16x128xf32>
    %997 = vector.broadcast %995 : vector<1x128xf32> to vector<16x128xf32>
    %998 = arith.mulf %996, %997 : vector<16x128xf32>
    %999 = vector.extract_strided_slice %943 {offsets = [0, 11], sizes = [16, 1], strides = [1, 1]} : vector<16x16xf32> to vector<16x1xf32>
    %1000 = vector.extract_strided_slice %856 {offsets = [11, 0], sizes = [1, 128], strides = [1, 1]} : vector<16x128xf32> to vector<1x128xf32>
    %1001 = vector.broadcast %999 : vector<16x1xf32> to vector<16x128xf32>
    %1002 = vector.broadcast %1000 : vector<1x128xf32> to vector<16x128xf32>
    %1003 = arith.mulf %1001, %1002 : vector<16x128xf32>
    %1004 = vector.extract_strided_slice %943 {offsets = [0, 12], sizes = [16, 1], strides = [1, 1]} : vector<16x16xf32> to vector<16x1xf32>
    %1005 = vector.extract_strided_slice %856 {offsets = [12, 0], sizes = [1, 128], strides = [1, 1]} : vector<16x128xf32> to vector<1x128xf32>
    %1006 = vector.broadcast %1004 : vector<16x1xf32> to vector<16x128xf32>
    %1007 = vector.broadcast %1005 : vector<1x128xf32> to vector<16x128xf32>
    %1008 = arith.mulf %1006, %1007 : vector<16x128xf32>
    %1009 = vector.extract_strided_slice %943 {offsets = [0, 13], sizes = [16, 1], strides = [1, 1]} : vector<16x16xf32> to vector<16x1xf32>
    %1010 = vector.extract_strided_slice %856 {offsets = [13, 0], sizes = [1, 128], strides = [1, 1]} : vector<16x128xf32> to vector<1x128xf32>
    %1011 = vector.broadcast %1009 : vector<16x1xf32> to vector<16x128xf32>
    %1012 = vector.broadcast %1010 : vector<1x128xf32> to vector<16x128xf32>
    %1013 = arith.mulf %1011, %1012 : vector<16x128xf32>
    %1014 = vector.extract_strided_slice %943 {offsets = [0, 14], sizes = [16, 1], strides = [1, 1]} : vector<16x16xf32> to vector<16x1xf32>
    %1015 = vector.extract_strided_slice %856 {offsets = [14, 0], sizes = [1, 128], strides = [1, 1]} : vector<16x128xf32> to vector<1x128xf32>
    %1016 = vector.broadcast %1014 : vector<16x1xf32> to vector<16x128xf32>
    %1017 = vector.broadcast %1015 : vector<1x128xf32> to vector<16x128xf32>
    %1018 = arith.mulf %1016, %1017 : vector<16x128xf32>
    %1019 = vector.extract_strided_slice %943 {offsets = [0, 15], sizes = [16, 1], strides = [1, 1]} : vector<16x16xf32> to vector<16x1xf32>
    %1020 = vector.extract_strided_slice %856 {offsets = [15, 0], sizes = [1, 128], strides = [1, 1]} : vector<16x128xf32> to vector<1x128xf32>
    %1021 = vector.broadcast %1019 : vector<16x1xf32> to vector<16x128xf32>
    %1022 = vector.broadcast %1020 : vector<1x128xf32> to vector<16x128xf32>
    %1023 = arith.mulf %1021, %1022 : vector<16x128xf32>
    %1024 = arith.addf %866, %871 : vector<16x128xf32>
    %1025 = arith.addf %876, %881 : vector<16x128xf32>
    %1026 = arith.addf %886, %891 : vector<16x128xf32>
    %1027 = arith.addf %896, %901 : vector<16x128xf32>
    %1028 = arith.addf %906, %911 : vector<16x128xf32>
    %1029 = arith.addf %916, %921 : vector<16x128xf32>
    %1030 = arith.addf %926, %931 : vector<16x128xf32>
    %1031 = arith.addf %936, %941 : vector<16x128xf32>
    %1032 = arith.addf %948, %953 : vector<16x128xf32>
    %1033 = arith.addf %958, %963 : vector<16x128xf32>
    %1034 = arith.addf %968, %973 : vector<16x128xf32>
    %1035 = arith.addf %978, %983 : vector<16x128xf32>
    %1036 = arith.addf %988, %993 : vector<16x128xf32>
    %1037 = arith.addf %998, %1003 : vector<16x128xf32>
    %1038 = arith.addf %1008, %1013 : vector<16x128xf32>
    %1039 = arith.addf %1018, %1023 : vector<16x128xf32>
    %1040 = arith.addf %1024, %1025 : vector<16x128xf32>
    %1041 = arith.addf %1026, %1027 : vector<16x128xf32>
    %1042 = arith.addf %1028, %1029 : vector<16x128xf32>
    %1043 = arith.addf %1030, %1031 : vector<16x128xf32>
    %1044 = arith.addf %1032, %1033 : vector<16x128xf32>
    %1045 = arith.addf %1034, %1035 : vector<16x128xf32>
    %1046 = arith.addf %1036, %1037 : vector<16x128xf32>
    %1047 = arith.addf %1038, %1039 : vector<16x128xf32>
    %1048 = arith.addf %1040, %1041 : vector<16x128xf32>
    %1049 = arith.addf %1042, %1043 : vector<16x128xf32>
    %1050 = arith.addf %1044, %1045 : vector<16x128xf32>
    %1051 = arith.addf %1046, %1047 : vector<16x128xf32>
    %1052 = arith.addf %1048, %1049 : vector<16x128xf32>
    %1053 = arith.addf %1050, %1051 : vector<16x128xf32>
    %1054 = arith.addf %1052, %1053 : vector<16x128xf32>
    %1055 = vector.broadcast %13 : vector<16x1xf32> to vector<16x128xf32>
    %1056 = arith.addf %1054, %1055 : vector<16x128xf32>
    %1057 = arith.addf %1056, %653 : vector<16x128xf32>
    %cst_54 = arith.constant 0.000000e+00 : f32
    %1058 = vector.broadcast %cst_54 : f32 to vector<16x128xf32>
    %1059 = arith.maximumf %1057, %1058 : vector<16x128xf32>
    %1060 = vector.extract_strided_slice %14 {offsets = [0, 0], sizes = [1, 1], strides = [1, 1]} : vector<1x16xf32> to vector<1x1xf32>
    %1061 = vector.extract_strided_slice %1059 {offsets = [0, 0], sizes = [1, 128], strides = [1, 1]} : vector<16x128xf32> to vector<1x128xf32>
    %1062 = vector.broadcast %1060 : vector<1x1xf32> to vector<1x128xf32>
    %1063 = arith.mulf %1062, %1061 : vector<1x128xf32>
    %1064 = vector.extract_strided_slice %14 {offsets = [0, 1], sizes = [1, 1], strides = [1, 1]} : vector<1x16xf32> to vector<1x1xf32>
    %1065 = vector.extract_strided_slice %1059 {offsets = [1, 0], sizes = [1, 128], strides = [1, 1]} : vector<16x128xf32> to vector<1x128xf32>
    %1066 = vector.broadcast %1064 : vector<1x1xf32> to vector<1x128xf32>
    %1067 = arith.mulf %1066, %1065 : vector<1x128xf32>
    %1068 = vector.extract_strided_slice %14 {offsets = [0, 2], sizes = [1, 1], strides = [1, 1]} : vector<1x16xf32> to vector<1x1xf32>
    %1069 = vector.extract_strided_slice %1059 {offsets = [2, 0], sizes = [1, 128], strides = [1, 1]} : vector<16x128xf32> to vector<1x128xf32>
    %1070 = vector.broadcast %1068 : vector<1x1xf32> to vector<1x128xf32>
    %1071 = arith.mulf %1070, %1069 : vector<1x128xf32>
    %1072 = vector.extract_strided_slice %14 {offsets = [0, 3], sizes = [1, 1], strides = [1, 1]} : vector<1x16xf32> to vector<1x1xf32>
    %1073 = vector.extract_strided_slice %1059 {offsets = [3, 0], sizes = [1, 128], strides = [1, 1]} : vector<16x128xf32> to vector<1x128xf32>
    %1074 = vector.broadcast %1072 : vector<1x1xf32> to vector<1x128xf32>
    %1075 = arith.mulf %1074, %1073 : vector<1x128xf32>
    %1076 = vector.extract_strided_slice %14 {offsets = [0, 4], sizes = [1, 1], strides = [1, 1]} : vector<1x16xf32> to vector<1x1xf32>
    %1077 = vector.extract_strided_slice %1059 {offsets = [4, 0], sizes = [1, 128], strides = [1, 1]} : vector<16x128xf32> to vector<1x128xf32>
    %1078 = vector.broadcast %1076 : vector<1x1xf32> to vector<1x128xf32>
    %1079 = arith.mulf %1078, %1077 : vector<1x128xf32>
    %1080 = vector.extract_strided_slice %14 {offsets = [0, 5], sizes = [1, 1], strides = [1, 1]} : vector<1x16xf32> to vector<1x1xf32>
    %1081 = vector.extract_strided_slice %1059 {offsets = [5, 0], sizes = [1, 128], strides = [1, 1]} : vector<16x128xf32> to vector<1x128xf32>
    %1082 = vector.broadcast %1080 : vector<1x1xf32> to vector<1x128xf32>
    %1083 = arith.mulf %1082, %1081 : vector<1x128xf32>
    %1084 = vector.extract_strided_slice %14 {offsets = [0, 6], sizes = [1, 1], strides = [1, 1]} : vector<1x16xf32> to vector<1x1xf32>
    %1085 = vector.extract_strided_slice %1059 {offsets = [6, 0], sizes = [1, 128], strides = [1, 1]} : vector<16x128xf32> to vector<1x128xf32>
    %1086 = vector.broadcast %1084 : vector<1x1xf32> to vector<1x128xf32>
    %1087 = arith.mulf %1086, %1085 : vector<1x128xf32>
    %1088 = vector.extract_strided_slice %14 {offsets = [0, 7], sizes = [1, 1], strides = [1, 1]} : vector<1x16xf32> to vector<1x1xf32>
    %1089 = vector.extract_strided_slice %1059 {offsets = [7, 0], sizes = [1, 128], strides = [1, 1]} : vector<16x128xf32> to vector<1x128xf32>
    %1090 = vector.broadcast %1088 : vector<1x1xf32> to vector<1x128xf32>
    %1091 = arith.mulf %1090, %1089 : vector<1x128xf32>
    %1092 = vector.extract_strided_slice %14 {offsets = [0, 8], sizes = [1, 1], strides = [1, 1]} : vector<1x16xf32> to vector<1x1xf32>
    %1093 = vector.extract_strided_slice %1059 {offsets = [8, 0], sizes = [1, 128], strides = [1, 1]} : vector<16x128xf32> to vector<1x128xf32>
    %1094 = vector.broadcast %1092 : vector<1x1xf32> to vector<1x128xf32>
    %1095 = arith.mulf %1094, %1093 : vector<1x128xf32>
    %1096 = vector.extract_strided_slice %14 {offsets = [0, 9], sizes = [1, 1], strides = [1, 1]} : vector<1x16xf32> to vector<1x1xf32>
    %1097 = vector.extract_strided_slice %1059 {offsets = [9, 0], sizes = [1, 128], strides = [1, 1]} : vector<16x128xf32> to vector<1x128xf32>
    %1098 = vector.broadcast %1096 : vector<1x1xf32> to vector<1x128xf32>
    %1099 = arith.mulf %1098, %1097 : vector<1x128xf32>
    %1100 = vector.extract_strided_slice %14 {offsets = [0, 10], sizes = [1, 1], strides = [1, 1]} : vector<1x16xf32> to vector<1x1xf32>
    %1101 = vector.extract_strided_slice %1059 {offsets = [10, 0], sizes = [1, 128], strides = [1, 1]} : vector<16x128xf32> to vector<1x128xf32>
    %1102 = vector.broadcast %1100 : vector<1x1xf32> to vector<1x128xf32>
    %1103 = arith.mulf %1102, %1101 : vector<1x128xf32>
    %1104 = vector.extract_strided_slice %14 {offsets = [0, 11], sizes = [1, 1], strides = [1, 1]} : vector<1x16xf32> to vector<1x1xf32>
    %1105 = vector.extract_strided_slice %1059 {offsets = [11, 0], sizes = [1, 128], strides = [1, 1]} : vector<16x128xf32> to vector<1x128xf32>
    %1106 = vector.broadcast %1104 : vector<1x1xf32> to vector<1x128xf32>
    %1107 = arith.mulf %1106, %1105 : vector<1x128xf32>
    %1108 = vector.extract_strided_slice %14 {offsets = [0, 12], sizes = [1, 1], strides = [1, 1]} : vector<1x16xf32> to vector<1x1xf32>
    %1109 = vector.extract_strided_slice %1059 {offsets = [12, 0], sizes = [1, 128], strides = [1, 1]} : vector<16x128xf32> to vector<1x128xf32>
    %1110 = vector.broadcast %1108 : vector<1x1xf32> to vector<1x128xf32>
    %1111 = arith.mulf %1110, %1109 : vector<1x128xf32>
    %1112 = vector.extract_strided_slice %14 {offsets = [0, 13], sizes = [1, 1], strides = [1, 1]} : vector<1x16xf32> to vector<1x1xf32>
    %1113 = vector.extract_strided_slice %1059 {offsets = [13, 0], sizes = [1, 128], strides = [1, 1]} : vector<16x128xf32> to vector<1x128xf32>
    %1114 = vector.broadcast %1112 : vector<1x1xf32> to vector<1x128xf32>
    %1115 = arith.mulf %1114, %1113 : vector<1x128xf32>
    %1116 = vector.extract_strided_slice %14 {offsets = [0, 14], sizes = [1, 1], strides = [1, 1]} : vector<1x16xf32> to vector<1x1xf32>
    %1117 = vector.extract_strided_slice %1059 {offsets = [14, 0], sizes = [1, 128], strides = [1, 1]} : vector<16x128xf32> to vector<1x128xf32>
    %1118 = vector.broadcast %1116 : vector<1x1xf32> to vector<1x128xf32>
    %1119 = arith.mulf %1118, %1117 : vector<1x128xf32>
    %1120 = vector.extract_strided_slice %14 {offsets = [0, 15], sizes = [1, 1], strides = [1, 1]} : vector<1x16xf32> to vector<1x1xf32>
    %1121 = vector.extract_strided_slice %1059 {offsets = [15, 0], sizes = [1, 128], strides = [1, 1]} : vector<16x128xf32> to vector<1x128xf32>
    %1122 = vector.broadcast %1120 : vector<1x1xf32> to vector<1x128xf32>
    %1123 = arith.mulf %1122, %1121 : vector<1x128xf32>
    %1124 = arith.addf %1063, %1067 : vector<1x128xf32>
    %1125 = arith.addf %1071, %1075 : vector<1x128xf32>
    %1126 = arith.addf %1079, %1083 : vector<1x128xf32>
    %1127 = arith.addf %1087, %1091 : vector<1x128xf32>
    %1128 = arith.addf %1095, %1099 : vector<1x128xf32>
    %1129 = arith.addf %1103, %1107 : vector<1x128xf32>
    %1130 = arith.addf %1111, %1115 : vector<1x128xf32>
    %1131 = arith.addf %1119, %1123 : vector<1x128xf32>
    %1132 = arith.addf %1124, %1125 : vector<1x128xf32>
    %1133 = arith.addf %1126, %1127 : vector<1x128xf32>
    %1134 = arith.addf %1128, %1129 : vector<1x128xf32>
    %1135 = arith.addf %1130, %1131 : vector<1x128xf32>
    %1136 = arith.addf %1132, %1133 : vector<1x128xf32>
    %1137 = arith.addf %1134, %1135 : vector<1x128xf32>
    %1138 = arith.addf %1136, %1137 : vector<1x128xf32>
    %1139 = vector.broadcast %15 : vector<1x1xf32> to vector<1x128xf32>
    %1140 = arith.addf %1138, %1139 : vector<1x128xf32>
    %c0_55 = arith.constant 0 : index
    %c0_56 = arith.constant 0 : index
    %c0_57 = arith.constant 0 : index
    %1141 = vector.load %arg18[%c0_55, %c0_56, %c0_57] : memref<1x1x128xf32, #tpu.memory_space<vmem>>, vector<1x1x128xf32>
    %1142 = vector.shape_cast %1141 : vector<1x1x128xf32> to vector<1x128xf32>
    %1143 = vector.shape_cast %1140 : vector<1x128xf32> to vector<1x1x128xf32>
    tpu.vector_store %arg18[%c0_55, %c0_56, %c0_57], %1143 {strides = array<i32>} : memref<1x1x128xf32, #tpu.memory_space<vmem>>, vector<1x1x128xf32>,
    return
  }
  func.func @transform_0(%arg0: i32) -> (i32, i32, i32) {
    %c0_i32 = arith.constant 0 : i32
    %c0_i32_0 = arith.constant 0 : i32
    %c0_i32_1 = arith.constant 0 : i32
    return %arg0, %c0_i32, %c0_i32_0 : i32, i32, i32
  }
  func.func @transform_1(%arg0: i32) -> (i32, i32, i32) {
    %c0_i32 = arith.constant 0 : i32
    %c0_i32_0 = arith.constant 0 : i32
    %c0_i32_1 = arith.constant 0 : i32
    %c0_i32_2 = arith.constant 0 : i32
    return %c0_i32, %c0_i32_0, %c0_i32_1 : i32, i32, i32
  }
  func.func @transform_2(%arg0: i32) -> (i32, i32) {
    %c0_i32 = arith.constant 0 : i32
    %c0_i32_0 = arith.constant 0 : i32
    %c0_i32_1 = arith.constant 0 : i32
    return %c0_i32, %c0_i32_0 : i32, i32
  }
  func.func @transform_3(%arg0: i32) -> (i32, i32, i32) {
    %c0_i32 = arith.constant 0 : i32
    %c0_i32_0 = arith.constant 0 : i32
    %c0_i32_1 = arith.constant 0 : i32
    %c0_i32_2 = arith.constant 0 : i32
    return %c0_i32, %c0_i32_0, %c0_i32_1 : i32, i32, i32
  }
  func.func @transform_4(%arg0: i32) -> (i32, i32) {
    %c0_i32 = arith.constant 0 : i32
    %c0_i32_0 = arith.constant 0 : i32
    %c0_i32_1 = arith.constant 0 : i32
    return %c0_i32, %c0_i32_0 : i32, i32
  }
  func.func @transform_5(%arg0: i32) -> (i32, i32) {
    %c0_i32 = arith.constant 0 : i32
    %c0_i32_0 = arith.constant 0 : i32
    %c0_i32_1 = arith.constant 0 : i32
    return %c0_i32, %c0_i32_0 : i32, i32
  }
  func.func @transform_6(%arg0: i32) -> (i32, i32) {
    %c0_i32 = arith.constant 0 : i32
    %c0_i32_0 = arith.constant 0 : i32
    %c0_i32_1 = arith.constant 0 : i32
    return %c0_i32, %c0_i32_0 : i32, i32
  }
  func.func @transform_7(%arg0: i32) -> (i32, i32, i32) {
    %c0_i32 = arith.constant 0 : i32
    %c0_i32_0 = arith.constant 0 : i32
    %c0_i32_1 = arith.constant 0 : i32
    %c0_i32_2 = arith.constant 0 : i32
    return %c0_i32, %c0_i32_0, %c0_i32_1 : i32, i32, i32
  }
  func.func @transform_8(%arg0: i32) -> (i32, i32) {
    %c0_i32 = arith.constant 0 : i32
    %c0_i32_0 = arith.constant 0 : i32
    %c0_i32_1 = arith.constant 0 : i32
    return %c0_i32, %c0_i32_0 : i32, i32
  }
  func.func @transform_9(%arg0: i32) -> (i32, i32, i32) {
    %c0_i32 = arith.constant 0 : i32
    %c0_i32_0 = arith.constant 0 : i32
    %c0_i32_1 = arith.constant 0 : i32
    %c0_i32_2 = arith.constant 0 : i32
    return %c0_i32, %c0_i32_0, %c0_i32_1 : i32, i32, i32
  }
  func.func @transform_10(%arg0: i32) -> (i32, i32) {
    %c0_i32 = arith.constant 0 : i32
    %c0_i32_0 = arith.constant 0 : i32
    %c0_i32_1 = arith.constant 0 : i32
    return %c0_i32, %c0_i32_0 : i32, i32
  }
  func.func @transform_11(%arg0: i32) -> (i32, i32, i32) {
    %c0_i32 = arith.constant 0 : i32
    %c0_i32_0 = arith.constant 0 : i32
    %c0_i32_1 = arith.constant 0 : i32
    %c0_i32_2 = arith.constant 0 : i32
    return %c0_i32, %c0_i32_0, %c0_i32_1 : i32, i32, i32
  }
  func.func @transform_12(%arg0: i32) -> (i32, i32) {
    %c0_i32 = arith.constant 0 : i32
    %c0_i32_0 = arith.constant 0 : i32
    %c0_i32_1 = arith.constant 0 : i32
    return %c0_i32, %c0_i32_0 : i32, i32
  }
  func.func @transform_13(%arg0: i32) -> (i32, i32, i32) {
    %c0_i32 = arith.constant 0 : i32
    %c0_i32_0 = arith.constant 0 : i32
    %c0_i32_1 = arith.constant 0 : i32
    %c0_i32_2 = arith.constant 0 : i32
    return %c0_i32, %c0_i32_0, %c0_i32_1 : i32, i32, i32
  }
  func.func @transform_14(%arg0: i32) -> (i32, i32) {
    %c0_i32 = arith.constant 0 : i32
    %c0_i32_0 = arith.constant 0 : i32
    %c0_i32_1 = arith.constant 0 : i32
    return %c0_i32, %c0_i32_0 : i32, i32
  }
  func.func @transform_15(%arg0: i32) -> (i32, i32) {
    %c0_i32 = arith.constant 0 : i32
    %c0_i32_0 = arith.constant 0 : i32
    %c0_i32_1 = arith.constant 0 : i32
    return %c0_i32, %c0_i32_0 : i32, i32
  }
  func.func @transform_16(%arg0: i32) -> (i32, i32) {
    %c0_i32 = arith.constant 0 : i32
    %c0_i32_0 = arith.constant 0 : i32
    %c0_i32_1 = arith.constant 0 : i32
    return %c0_i32, %c0_i32_0 : i32, i32
  }
  func.func @transform_17(%arg0: i32) -> (i32, i32, i32) {
    %c0_i32 = arith.constant 0 : i32
    %c0_i32_0 = arith.constant 0 : i32
    %c0_i32_1 = arith.constant 0 : i32
    return %arg0, %c0_i32, %c0_i32_0 : i32, i32, i32
  }
}

</mosaic_0001>

<bundles_post_ra>
// kernel: tcn_forward.1
= control target key start
LH: loop header
LB: loop body
LE: loop exit
PB: predicated region body
PF: predicated region fallthrough
CT: control target
= control target key end

     0   :  { %s3998_s26 = smov 0   ;;  %s6353_s0 = inlined_call_operand.vmem [shape: f32[2,1,128], index: 0, kind: input, shape index: {}]   ;;  %s6354_s1 = inlined_call_operand.vmem [shape: f32[2,16,1], index: 1, kind: input, shape index: {}]   ;;  %s6355_s2 = inlined_call_operand.vmem [shape: f32[16,1], index: 2, kind: input, shape index: {}]   ;;  %s6356_s3 = inlined_call_operand.vmem [shape: f32[2,16,16], index: 3, kind: input, shape index: {}]   ;;  %s6357_s4 = inlined_call_operand.vmem [shape: f32[16,1], index: 4, kind: input, shape index: {}]   ;;  %s6358_s5 = inlined_call_operand.vmem [shape: f32[16,1], index: 5, kind: input, shape index: {}]   ;;  %s6359_s6 = inlined_call_operand.vmem [shape: f32[16,1], index: 6, kind: input, shape index: {}]   ;;  %s6360_s7 = inlined_call_operand.vmem [shape: f32[2,16,16], index: 7, kind: input, shape index: {}]   ;;  %s6361_s8 = inlined_call_operand.vmem [shape: f32[16,1], index: 8, kind: input, shape index: {}]   ;;  %s6362_s9 = inlined_call_operand.vmem [shape: f32[2,16,16], index: 9, kind: input, shape index: {}]   ;;  %s6363_s10 = inlined_call_operand.vmem [shape: f32[16,1], index: 10, kind: input, shape index: {}]   ;;  %s6364_s11 = inlined_call_operand.vmem [shape: f32[2,16,16], index: 11, kind: input, shape index: {}]   ;;  %s6365_s12 = inlined_call_operand.vmem [shape: f32[16,1], index: 12, kind: input, shape index: {}]   ;;  %s6366_s13 = inlined_call_operand.vmem [shape: f32[2,16,16], index: 13, kind: input, shape index: {}]   ;;  %s6367_s14 = inlined_call_operand.vmem [shape: f32[16,1], index: 14, kind: input, shape index: {}]   ;;  %s6368_s15 = inlined_call_operand.vmem [shape: f32[1,16], index: 15, kind: input, shape index: {}]   ;;  %s6369_s16 = inlined_call_operand.<no memory space> [shape: f32[1,1], index: 16, kind: input, shape index: {}]   ;;  %s6370_s17 = inlined_call_operand.vmem [shape: f32[2,1,128], index: 17, kind: output, shape index: {}]  }
   0x1   :  { %6562 = sst [smem:[#allocation57_spill]] %s6353_s0  ;;  %v22_v0 = vstv %s6369_s16 }
   0x2   :  { %6563 = sst [smem:[#allocation58_spill]] %s6354_s1  ;;  %23 = vst [vmem:[#allocation2] sm:$0x1] %v22_v0 }
   0x3 LB: > { %s3593_s27 = sadd.s32 4294967295, %s3884_s26   ;;  %p3597_p0 = scmp.ge.s32.totalorder %s3884_s26, 1  ;;  %s3884_s26 = sphi %s3998_s26, %s29_s26  }
   0x4   : > { %p487_p1 = scmp.lt.s32.totalorder %s3884_s26, 3 }
   0x6   : > { %p488_p2 = pnand %p3597_p0, %p487_p1 }
   0x8   : > { %491 = sbr.rel (%p488_p2) target bundleno = 1711 (0x6af), region = 88 }
   0xf   : > { %s6564_s0 = sld [smem:[#allocation58_spill]]  ;;  %p535_p3 = scmp.lt.s32.totalorder %s3593_s27, 1  ;;  %v6378_v2 = vmov 0   ;;  %v546_v7 = vld [vmem:[%s6355_s2 + $0x8] sm:$0xff]  ;;  %v545_v8 = vld [vmem:[%s6355_s2] sm:$0xff]  ;;  %v6374_v10 = vmov 2   ;;  %v584_v28 = vlaneseq }
  0x10   : > { %3628 = vset.pattern.permute.xlu1 %v6378_v2  ;;  %3627 = vset.pattern.permute.xlu0 %v6378_v2  ;;  %s6565_s1 = sld [smem:[#allocation57_spill]]  ;;  %s3887_s21 = smov 1   ;;  %v4039_v9 = vld [vmem:[%s6356_s3 + $0x8] sm:$0xff]  ;;  %v6392_v11 = vmov 1   ;;  %v6388_v12 = vmov 8   ;;  %v4051_v13 = vld [vmem:[%s6356_s3] sm:$0xff] }
  0x11   : > { %s7041_s27 = smov (!%p535_p3, %s3593_s27), 1  ;;  %v4060_v14 = vld [vmem:[%s6356_s3 + $0x18] sm:$0xff]  ;;  %v6386_v15 = vmov 3   ;;  %v4068_v16 = vld [vmem:[%s6356_s3 + $0x10] sm:$0xff]  ;;  %v6380_v17 = vmov 4   ;;  %v6372_v18 = vmov 5  }
  0x12   : > { %v6376_v19 = vmov 6   ;;  %v6382_v20 = vmov 7   ;;  %v6394_v21 = vmov 9   ;;  %v6398_v22 = vmov 10   ;;  %v552_v60 = vld [vmem:[%s6357_s4 + $0x8] sm:$0xff]  ;;  %v555_v62 = vld [vmem:[%s6359_s6] sm:$0xff]  ;;  %s540_s18 = scalar_lea.vmem %s6370_s17, %s7041_s27 }
  0x13   : > { %v6402_v23 = vmov 11   ;;  %v6404_v24 = vmov 12   ;;  %v6396_v25 = vmov 13   ;;  %v6390_v26 = vmov 14   ;;  %s3903_s16 = smov 2   ;;  %s3904_s24 = smov 4  }
  0x14   : > { %v6384_v27 = vmov 15   ;;  %v4112_v29 = vand.u32 127, %v584_v28  ;;  %v4115_v30 = vshrl.u32 %v584_v28, 7  ;;  %v554_v28 = vld [vmem:[%s6358_s5 + $0x8] sm:$0xff] }
  0x15   : > { %v542_v1 = vld [vmem:[%s6564_s0 + $0x8] sm:$0xff]  ;;  %v543_v3 = vld [vmem:[%s6564_s0 + $0x10] sm:$0xff]  ;;  %v544_v5 = vld [vmem:[%s6564_s0 + $0x18] sm:$0xff] }
  0x16   : > { %597 = vperm.xlu1 %3628, %v542_v1   ;;  %s537_s20 = scalar_lea.vmem %s6565_s1, %s7041_s27  ;;  %v541_v6 = vld [vmem:[%s6564_s0] sm:$0xff]  ;;  %6566 = vst [vmem:[#allocation3_spill] sm:$0xff] %v4112_v29  ;;  %vm586_vm0 = vcmp.ge.s32.totalorder %v4112_v29, 1  ;;  %v4120_v33 = vsub.s32 0, %v4115_v30  ;;  %v4218_v1 = vld [vmem:[%s6360_s7 + $0x8] sm:$0xff] }
  0x17   : > { %v4020_v4 = vld [vmem:[%s537_s20] sm:$0x1]  ;;  %6572 = vst [vmem:[#allocation9_spill] sm:$0xff] %v4218_v1 }
  0x18   : > { %587 = vrot.lane.b32.xlu0 %v4020_v4, %s3887_s21  ;;  %6567 = vst [vmem:[#allocation4_spill] sm:$0xff] %v4120_v33  ;;  %v4127_v36 = vrot.slane %v4020_v4, %v4120_v33 }
  0x1a   : > { %608 = vperm.xlu1 %3628, %v543_v3   ;;  %6568 = vst [vmem:[#allocation5_spill] sm:$0xff] %v4127_v36 }
  0x1c   : > { %592 = vperm.xlu0 %3627, %v541_v6   ;;  %v551_v6 = vld [vmem:[%s6357_s4] sm:$0xff] }
  0x1e   : > { %613 = vperm.xlu1 %3628, %v544_v5  }
  0x20   : > { %628 = vperm.xlu0 %3627, %v545_v8  }
  0x22   : > { %633 = vperm.xlu1 %3628, %v546_v7  }
  0x24   : > { %3631 = vset.pattern.permute.xlu0 %v6374_v10 }
  0x25   : > { %679 = vperm.xlu0 %3631, %v4039_v9  }
  0x26   : > { %651 = vperm.xlu1 %3628, %v4039_v9  }
  0x29   : > { %3638 = vset.pattern.permute.xlu0 %v6388_v12 }
  0x2a   : > { %3629 = vset.pattern.permute.xlu1 %v6392_v11  ;;  %763 = vperm.xlu0 %3638, %v4039_v9  }
  0x2b   : > { %665 = vperm.xlu1 %3629, %v4039_v9  }
  0x2e   : > { %3639 = vset.pattern.permute.xlu0 %v6392_v11 }
  0x2f   : > { %3630 = vset.pattern.permute.xlu1 %v6374_v10  ;;  %661 = vperm.xlu0 %3639, %v4051_v13  }
  0x30   : > { %675 = vperm.xlu1 %3630, %v4051_v13  }
  0x33   : > { %891 = vperm.xlu0 %3639, %v4060_v14  }
  0x34   : > { %3632 = vset.pattern.permute.xlu1 %v6386_v15 }
  0x35   : > { %689 = vperm.xlu1 %3632, %v4051_v13  }
  0x37   : > { %3650 = vset.pattern.permute.xlu0 %v6386_v15 }
  0x38   : > { %915 = vperm.xlu0 %3650, %v4068_v16  }
  0x39   : > { %693 = vperm.xlu1 %3632, %v4039_v9  }
  0x3c   : > { %3651 = vset.pattern.permute.xlu0 %v6380_v17 }
  0x3d   : > { %3633 = vset.pattern.permute.xlu1 %v6380_v17  ;;  %703 = vperm.xlu0 %3651, %v4051_v13  }
  0x3e   : > { %707 = vperm.xlu1 %3633, %v4039_v9  }
  0x41   : > { %933 = vperm.xlu0 %3651, %v4060_v14  }
  0x42   : > { %3634 = vset.pattern.permute.xlu1 %v6372_v18 }
  0x43   : > { %717 = vperm.xlu1 %3634, %v4051_v13  }
  0x45   : > { %3655 = vset.pattern.permute.xlu0 %v6376_v19 }
  0x46   : > { %957 = vperm.xlu0 %3655, %v4068_v16  }
  0x47   : > { %3635 = vset.pattern.permute.xlu1 %v6376_v19 }
  0x48   : > { %731 = vperm.xlu1 %3635, %v4051_v13  }
  0x4a   : > { %3656 = vset.pattern.permute.xlu0 %v6382_v20 }
  0x4b   : > { %745 = vperm.xlu0 %3656, %v4051_v13  }
  0x4c   : > { %735 = vperm.xlu1 %3635, %v4039_v9  }
  0x50   : > { %3636 = vset.pattern.permute.xlu1 %v6382_v20 }
  0x51   : > { %749 = vperm.xlu1 %3636, %v4039_v9  }
  0x55   : > { %3637 = vset.pattern.permute.xlu1 %v6388_v12 }
  0x56   : > { %759 = vperm.xlu1 %3637, %v4051_v13  }
  0x5a   : > { %3640 = vset.pattern.permute.xlu1 %v6394_v21 }
  0x5b   : > { %773 = vperm.xlu1 %3640, %v4051_v13  }
  0x5f   : > { %777 = vperm.xlu1 %3640, %v4039_v9  }
  0x63   : > { %3641 = vset.pattern.permute.xlu1 %v6398_v22 }
  0x64   : > { %791 = vperm.xlu1 %3641, %v4039_v9  }
  0x68   : > { %3642 = vset.pattern.permute.xlu1 %v6402_v23 }
  0x69   : > { %801 = vperm.xlu1 %3642, %v4051_v13  }
  0x6d   : > { %3643 = vset.pattern.permute.xlu1 %v6404_v24 }
  0x6e   : > { %815 = vperm.xlu1 %3643, %v4051_v13  }
  0x72   : > { %819 = vperm.xlu1 %3643, %v4039_v9  }
  0x76   : > { %3644 = vset.pattern.permute.xlu1 %v6396_v25 }
  0x77   : > { %833 = vperm.xlu1 %3644, %v4039_v9  }
  0x7b   : > { %3645 = vset.pattern.permute.xlu1 %v6390_v26 }
  0x7c   : > { %843 = vperm.xlu1 %3645, %v4051_v13  }
  0x80   : > { %3646 = vset.pattern.permute.xlu1 %v6384_v27 }
  0x81   : > { %857 = vperm.xlu1 %3646, %v4051_v13  }
  0x85   : > { %861 = vperm.xlu1 %3646, %v4039_v9  }
  0x89   : > { %3647 = vset.pattern.permute.xlu1 %v6378_v2 }
  0x8a   : > { %877 = vperm.xlu1 %3647, %v4060_v14   ;;  %v588_v32 = vpop.permute.xlu0 %587 }
  0x8b   : > { %v589_v34 = vsel %vm586_vm0, %v588_v32, 0.0 }
  0x8c   : > { %v603_v37 = vrot.slane %v589_v34, %v4120_v33 }
  0x8e   : > { %3648 = vset.pattern.permute.xlu1 %v6392_v11 }
  0x8f   : > { %887 = vperm.xlu1 %3648, %v4068_v16  }
  0x93   : > { %3649 = vset.pattern.permute.xlu1 %v6374_v10 }
  0x94   : > { %901 = vperm.xlu1 %3649, %v4068_v16  }
  0x95   : > { %v598_v31 = vpop.permute.xlu1 %597 }
  0x96   : > { %v605_v49 = vmul.f32 %v603_v37, %v598_v31  ;;  %v556_v31 = vld [vmem:[%s6359_s6 + $0x8] sm:$0xff] }
  0x98   : > { %905 = vperm.xlu1 %3649, %v4060_v14  }
  0x99   : > { %v609_v35 = vpop.permute.xlu1 %608 }
  0x9a   : > { %v622_v40 = vmul.f32 %v4127_v36, %v609_v35 }
  0x9b   : > { %v593_v39 = vpop.permute.xlu0 %592 }
  0x9c   : > { %3652 = vset.pattern.permute.xlu1 %v6386_v15  ;;  %v604_v41 = vmul.f32 %v603_v37, %v593_v39  ;;  %v4276_v39 = vld [vmem:[%s6360_s7] sm:$0xff] }
  0x9d   : > { %919 = vperm.xlu1 %3652, %v4060_v14   ;;  %v614_v38 = vpop.permute.xlu1 %613  ;;  %6582 = vst [vmem:[#allocation19_spill] sm:$0xff] %v4276_v39 }
  0x9e   : > { %v624_v42 = vadd.f32 %v622_v40, %v604_v41  ;;  %v623_v47 = vmul.f32 %v4127_v36, %v614_v38  ;;  %v4359_v36 = vsub.s32 3, %v4115_v30 }
  0x9f   : > { %v629_v44 = vpop.permute.xlu0 %628 }
  0xa0   : > { %v4134_v45 = vadd.f32 %v629_v44, %v624_v42  ;;  %v625_v50 = vadd.f32 %v623_v47, %v605_v49  ;;  %6593 = vst [vmem:[#allocation30_spill] sm:$0xff] %v4359_v36 }
  0xa1   : > { %3653 = vset.pattern.permute.xlu1 %v6380_v17  ;;  %v634_v43 = vpop.permute.xlu1 %633 }
  0xa2   : > { %929 = vperm.xlu1 %3653, %v4068_v16   ;;  %638 = vrot.lane.b32.xlu0 %v4134_v45, %s3887_s21  ;;  %v4155_v52 = vadd.f32 %v634_v43, %v625_v50 }
  0xa4   : > { %v4238_v7 = vpop.permute.xlu0 %679 }
  0xa5   : > { %v4139_v46 = vpop.permute.xlu1 %651 }
  0xa6   : > { %3654 = vset.pattern.permute.xlu1 %v6372_v18  ;;  %975 = vperm.xlu0 %3656, %v4060_v14  }
  0xa7   : > { %943 = vperm.xlu1 %3654, %v4068_v16  }
  0xaa   : > { %v4145_v48 = vpop.permute.xlu1 %665  ;;  %3660 = vset.pattern.permute.xlu0 %v6394_v21 }
  0xab   : > { %947 = vperm.xlu1 %3654, %v4060_v14   ;;  %999 = vperm.xlu0 %3660, %v4068_v16  }
  0xaf   : > { %3657 = vset.pattern.permute.xlu1 %v6376_v19  ;;  %v4151_v51 = vpop.permute.xlu1 %675  ;;  %3661 = vset.pattern.permute.xlu0 %v6398_v22 }
  0xb0   : > { %961 = vperm.xlu1 %3657, %v4060_v14   ;;  %787 = vperm.xlu0 %3661, %v4051_v13  }
  0xb4   : > { %v4158_v53 = vpop.permute.xlu1 %689  ;;  %640 = vrot.lane.b32.xlu1 %v4155_v52, %s3887_s21  ;;  %1017 = vperm.xlu0 %3661, %v4060_v14  }
  0xb5   : > { %3658 = vset.pattern.permute.xlu1 %v6382_v20 }
  0xb8   : > { %v4164_v54 = vpop.permute.xlu1 %693  ;;  %971 = vperm.xlu1 %3658, %v4068_v16   ;;  %3665 = vset.pattern.permute.xlu0 %v6404_v24 }
  0xb9   : > { %1041 = vperm.xlu0 %3665, %v4068_v16  }
  0xbc   : > { %3659 = vset.pattern.permute.xlu1 %v6388_v12 }
  0xbd   : > { %v4170_v55 = vpop.permute.xlu1 %707  ;;  %985 = vperm.xlu1 %3659, %v4068_v16   ;;  %3666 = vset.pattern.permute.xlu0 %v6396_v25 }
  0xbe   : > { %829 = vperm.xlu0 %3666, %v4051_v13  }
  0xc1   : > { %989 = vperm.xlu1 %3659, %v4060_v14  }
  0xc2   : > { %v4176_v56 = vpop.permute.xlu1 %717  ;;  %1059 = vperm.xlu0 %3666, %v4060_v14  }
  0xc5   : > { %3662 = vset.pattern.permute.xlu1 %v6394_v21 }
  0xc6   : > { %1003 = vperm.xlu1 %3662, %v4060_v14   ;;  %3670 = vset.pattern.permute.xlu0 %v6384_v27 }
  0xc7   : > { %v4181_v57 = vpop.permute.xlu1 %731  ;;  %1083 = vperm.xlu0 %3670, %v4068_v16  }
  0xca   : > { %3663 = vset.pattern.permute.xlu1 %v6398_v22 }
  0xcb   : > { %v4186_v58 = vpop.permute.xlu1 %735  ;;  %1013 = vperm.xlu1 %3663, %v4068_v16   ;;  %3671 = vset.pattern.permute.xlu0 %v6378_v2 }
  0xcc   : > { %646 = vperm.xlu0 %3671, %v4051_v13   ;;  %v553_v13 = vld [vmem:[%s6358_s5] sm:$0xff] }
  0xcf   : > { %3664 = vset.pattern.permute.xlu1 %v6402_v23 }
  0xd0   : > { %v4192_v59 = vpop.permute.xlu1 %749  ;;  %1027 = vperm.xlu1 %3664, %v4068_v16   ;;  %872 = vperm.xlu0 %3671, %v4068_v16  }
  0xd4   : > { %1031 = vperm.xlu1 %3664, %v4060_v14   ;;  %1165 = vperm.xlu0 %3671, %v552_v60  }
  0xd5   : > { %v4200_v61 = vpop.permute.xlu1 %759 }
  0xd6   : > { %6569 = vst [vmem:[#allocation6_spill] sm:$0xff] %v4200_v61 }
  0xd8   : > { %3667 = vset.pattern.permute.xlu1 %v6404_v24  ;;  %1184 = vperm.xlu0 %3671, %v555_v62  }
  0xd9   : > { %1045 = vperm.xlu1 %3667, %v4060_v14  }
  0xda   : > { %v4207_v63 = vpop.permute.xlu1 %773 }
  0xdb   : > { %6570 = vst [vmem:[#allocation7_spill] sm:$0xff] %v4207_v63 }
  0xdc   : > { %3674 = vset.pattern.permute.xlu0 %v6372_v18 }
  0xdd   : > { %3668 = vset.pattern.permute.xlu1 %v6396_v25  ;;  %721 = vperm.xlu0 %3674, %v4039_v9  }
  0xde   : > { %v4210_v0 = vpop.permute.xlu1 %777  ;;  %1055 = vperm.xlu1 %3668, %v4068_v16  }
  0xdf   : > { %6571 = vst [vmem:[#allocation8_spill] sm:$0xff] %v4210_v0 }
  0xe1   : > { %1282 = vperm.xlu0 %3674, %v4218_v1  }
  0xe2   : > { %3669 = vset.pattern.permute.xlu1 %v6390_v26 }
  0xe3   : > { %v4221_v3 = vpop.permute.xlu1 %791  ;;  %1069 = vperm.xlu1 %3669, %v4068_v16  }
  0xe4   : > { %6573 = vst [vmem:[#allocation10_spill] sm:$0xff] %v4221_v3  ;;  %v4370_v3 = vsub.s32 5, %v4115_v30 }
  0xe5   : > { %3680 = vset.pattern.permute.xlu0 %v6402_v23 }
  0xe6   : > { %805 = vperm.xlu0 %3680, %v4039_v9   ;;  %6597 = vst [vmem:[#allocation34_spill] sm:$0xff] %v4370_v3 }
  0xe7   : > { %1073 = vperm.xlu1 %3669, %v4060_v14  }
  0xe8   : > { %v4227_v4 = vpop.permute.xlu1 %801 }
  0xe9   : > { %6574 = vst [vmem:[#allocation11_spill] sm:$0xff] %v4227_v4 }
  0xea   : > { %1366 = vperm.xlu0 %3680, %v4218_v1  }
  0xeb   : > { %3672 = vset.pattern.permute.xlu1 %v6384_v27 }
  0xec   : > { %1087 = vperm.xlu1 %3672, %v4060_v14   ;;  %v4248_v14 = vpop.permute.xlu0 %763 }
  0xed   : > { %v4233_v5 = vpop.permute.xlu1 %815  ;;  %6577 = vst [vmem:[#allocation14_spill] sm:$0xff] %v4248_v14 }
  0xee   : > { %6575 = vst [vmem:[#allocation12_spill] sm:$0xff] %v4233_v5  ;;  %3687 = vset.pattern.permute.xlu0 %v6390_v26 }
  0xef   : > { %847 = vperm.xlu0 %3687, %v4039_v9  }
  0xf0   : > { %3673 = vset.pattern.permute.xlu1 %v6378_v2  ;;  %v4258_v32 = vpop.permute.xlu0 %661 }
  0xf1   : > { %v4242_v8 = vpop.permute.xlu1 %819  ;;  %1160 = vperm.xlu1 %3673, %v551_v6  }
  0xf2   : > { %6576 = vst [vmem:[#allocation13_spill] sm:$0xff] %v4242_v8  ;;  %v4367_v8 = vsub.s32 2, %v4115_v30 }
  0xf4   : > { %v4264_v35 = vpop.permute.xlu0 %891  ;;  %6596 = vst [vmem:[#allocation33_spill] sm:$0xff] %v4367_v8  ;;  %v4411_v4 = vrot.slane %v4155_v52, %v4367_v8 }
  0xf5   : > { %1172 = vperm.xlu1 %3673, %v553_v13  }
  0xf6   : > { %v4250_v16 = vpop.permute.xlu1 %833  ;;  %6602 = vst [vmem:[#allocation39_spill] sm:$0xff] %v4411_v4 }
  0xf7   : > { %6578 = vst [vmem:[#allocation15_spill] sm:$0xff] %v4250_v16  ;;  %v4393_v16 = vrot.slane %v4134_v45, %v4120_v33 }
  0xf8   : > { %v4271_v38 = vpop.permute.xlu0 %915 }
  0xf9   : > { %1177 = vperm.xlu1 %3673, %v554_v28  }
  0xfb   : > { %v4260_v9 = vpop.permute.xlu1 %843 }
  0xfc   : > { %6579 = vst [vmem:[#allocation16_spill] sm:$0xff] %v4260_v9  ;;  %v4282_v41 = vpop.permute.xlu0 %703 }
  0xfd   : > { %1189 = vperm.xlu1 %3673, %v556_v31  }
 0x100   : > { %v4262_v34 = vpop.permute.xlu1 %857  ;;  %v4288_v43 = vpop.permute.xlu0 %933 }
 0x101   : > { %6580 = vst [vmem:[#allocation17_spill] sm:$0xff] %v4262_v34  ;;  %1212 = vperm.xlu1 %3673, %v4218_v1  }
 0x104   : > { %v4267_v37 = vpop.permute.xlu1 %861  ;;  %v4296_v49 = vpop.permute.xlu0 %957 }
 0x105   : > { %6581 = vst [vmem:[#allocation18_spill] sm:$0xff] %v4267_v37  ;;  %3675 = vset.pattern.permute.xlu1 %v6392_v11  ;;  %v4362_v37 = vsub.s32 4, %v4115_v30 }
 0x106   : > { %1226 = vperm.xlu1 %3675, %v4218_v1  }
 0x107   : > { %6594 = vst [vmem:[#allocation31_spill] sm:$0xff] %v4362_v37 }
 0x108   : > { %v4301_v60 = vpop.permute.xlu0 %745 }
 0x109   : > { %v4278_v40 = vpop.permute.xlu1 %877 }
 0x10a   : > { %3676 = vset.pattern.permute.xlu1 %v6374_v10 }
 0x10b   : > { %1236 = vperm.xlu1 %3676, %v4276_v39  }
 0x10e   : > { %v4284_v42 = vpop.permute.xlu1 %887 }
 0x10f   : > { %3677 = vset.pattern.permute.xlu1 %v6386_v15 }
 0x110   : > { %1250 = vperm.xlu1 %3677, %v4276_v39  }
 0x113   : > { %v4290_v44 = vpop.permute.xlu1 %901 }
 0x114   : > { %1254 = vperm.xlu1 %3677, %v4218_v1   ;;  %v639_v6 = vpop.permute.xlu0 %638 }
 0x117   : > { %v4293_v47 = vpop.permute.xlu1 %905 }
 0x118   : > { %3678 = vset.pattern.permute.xlu1 %v6380_v17 }
 0x119   : > { %1268 = vperm.xlu1 %3678, %v4218_v1  }
 0x11c   : > { %v4299_v50 = vpop.permute.xlu1 %919 }
 0x11d   : > { %3679 = vset.pattern.permute.xlu1 %v6372_v18 }
 0x11e   : > { %1278 = vperm.xlu1 %3679, %v4276_v39  }
 0x121   : > { %v4305_v62 = vpop.permute.xlu1 %929 }
 0x122   : > { %3681 = vset.pattern.permute.xlu1 %v6376_v19 }
 0x123   : > { %1292 = vperm.xlu1 %3681, %v4276_v39  }
 0x125   : > { %v4311_v28 = vpop.permute.xlu0 %975 }
 0x126   : > { %v4309_v13 = vpop.permute.xlu1 %943 }
 0x127   : > { %1296 = vperm.xlu1 %3681, %v4218_v1  }
 0x12a   : > { %v4314_v31 = vpop.permute.xlu1 %947  ;;  %v4317_v18 = vpop.permute.xlu0 %999 }
 0x12b   : > { %3682 = vset.pattern.permute.xlu1 %v6382_v20 }
 0x12c   : > { %1310 = vperm.xlu1 %3682, %v4218_v1  }
 0x12f   : > { %v4320_v10 = vpop.permute.xlu1 %961  ;;  %v4323_v19 = vpop.permute.xlu0 %787 }
 0x130   : > { %3683 = vset.pattern.permute.xlu1 %v6388_v12  ;;  %6583 = vst [vmem:[#allocation20_spill] sm:$0xff] %v4323_v19  ;;  %v4415_v19 = vrot.slane %v4155_v52, %v4362_v37 }
 0x131   : > { %1320 = vperm.xlu1 %3683, %v4276_v39  }
 0x132   : > { %6603 = vst [vmem:[#allocation40_spill] sm:$0xff] %v4415_v19 }
 0x133   : > { %v4326_v2 = vpop.permute.xlu1 %640  ;;  %v4328_v17 = vpop.permute.xlu0 %1017 }
 0x134   : > { %6584 = vst [vmem:[#allocation21_spill] sm:$0xff] %v4328_v17  ;;  %v953_v17 = vrot.slane %v4134_v45, %v4370_v3 }
 0x135   : > { %3684 = vset.pattern.permute.xlu1 %v6394_v21 }
 0x136   : > { %1334 = vperm.xlu1 %3684, %v4276_v39  }
 0x137   : > { %v4332_v20 = vpop.permute.xlu1 %971 }
 0x138   : > { %v4334_v27 = vpop.permute.xlu0 %1041 }
 0x139   : > { %6585 = vst [vmem:[#allocation22_spill] sm:$0xff] %v4334_v27  ;;  %v4430_v27 = vrot.slane %v4155_v52, %v4370_v3 }
 0x13a   : > { %1338 = vperm.xlu1 %3684, %v4218_v1  }
 0x13b   : > { %6607 = vst [vmem:[#allocation43_spill] sm:$0xff] %v4430_v27 }
 0x13c   : > { %v4337_v15 = vpop.permute.xlu1 %985 }
 0x13d   : > { %6586 = vst [vmem:[#allocation23_spill] sm:$0xff] %v4337_v15  ;;  %v4340_v12 = vpop.permute.xlu0 %829 }
 0x13e   : > { %3685 = vset.pattern.permute.xlu1 %v6398_v22  ;;  %6587 = vst [vmem:[#allocation24_spill] sm:$0xff] %v4340_v12  ;;  %v4356_v22 = vsub.s32 1, %v4115_v30 }
 0x13f   : > { %1352 = vperm.xlu1 %3685, %v4218_v1  }
 0x140   : > { %v4343_v26 = vpop.permute.xlu1 %989  ;;  %6592 = vst [vmem:[#allocation29_spill] sm:$0xff] %v4356_v22  ;;  %v897_v14 = vrot.slane %v4134_v45, %v4356_v22 }
 0x141   : > { %6588 = vst [vmem:[#allocation25_spill] sm:$0xff] %v4343_v26  ;;  %v4345_v11 = vpop.permute.xlu0 %1059  ;;  %v939_v26 = vrot.slane %v4134_v45, %v4362_v37 }
 0x142   : > { %6589 = vst [vmem:[#allocation26_spill] sm:$0xff] %v4345_v11  ;;  %v925_v11 = vrot.slane %v4134_v45, %v4359_v36  ;;  %v899_v27 = vmul.f32 %v897_v14, %v4264_v35 }
 0x143   : > { %3686 = vset.pattern.permute.xlu1 %v6402_v23 }
 0x144   : > { %1362 = vperm.xlu1 %3686, %v4276_v39  }
 0x145   : > { %v4349_v21 = vpop.permute.xlu1 %1003 }
 0x146   : > { %6590 = vst [vmem:[#allocation27_spill] sm:$0xff] %v4349_v21  ;;  %v4351_v25 = vpop.permute.xlu0 %1083  ;;  %v642_v21 = vsel %vm586_vm0, %v639_v6, 0.0  ;;  %v4407_v6 = vrot.slane %v4155_v52, %v4356_v22 }
 0x147   : > { %6591 = vst [vmem:[#allocation28_spill] sm:$0xff] %v4351_v25  ;;  %v713_v34 = vrot.slane %v642_v21, %v4362_v37  ;;  %v4419_v9 = vrot.slane %v642_v21, %v4370_v3  ;;  %v4426_v25 = vrot.slane %v4155_v52, %v4120_v33  ;;  %v4433_v19 = vrot.slane %v642_v21, %v4120_v33 }
 0x148   : > { %3688 = vset.pattern.permute.xlu1 %v6404_v24  ;;  %v4373_v24 = vsub.s32 6, %v4115_v30  ;;  %v671_v4 = vrot.slane %v642_v21, %v4356_v22  ;;  %v4450_v22 = vrot.slane %v4155_v52, %v4359_v36 }
 0x149   : > { %1376 = vperm.xlu1 %3688, %v4276_v39   ;;  %v4376_v39 = vsub.s32 7, %v4115_v30  ;;  %6604 = vst [vmem:[#allocation41_spill] sm:$0xff] %v4419_v9  ;;  %6606 = vst [vmem:[#allocation42_spill] sm:$0xff] %v4426_v25  ;;  %v699_v25 = vrot.slane %v642_v21, %v4359_v36  ;;  %v941_v36 = vmul.f32 %v939_v26, %v4288_v43 }
 0x14a   : > { %v4364_v23 = vpop.permute.xlu1 %1013  ;;  %6598 = vst [vmem:[#allocation35_spill] sm:$0xff] %v4373_v24  ;;  %v967_v30 = vrot.slane %v4134_v45, %v4373_v24 }
 0x14b   : > { %6595 = vst [vmem:[#allocation32_spill] sm:$0xff] %v4364_v23  ;;  %6599 = vst [vmem:[#allocation36_spill] sm:$0xff] %v4376_v39  ;;  %v4378_v0 = vpop.permute.xlu0 %646  ;;  %v4403_v61 = vrot.slane %v4134_v45, %v4376_v39  ;;  %v755_v5 = vrot.slane %v642_v21, %v4376_v39  ;;  %v885_v23 = vmul.f32 %v4393_v16, %v4278_v40 }
 0x14c   : > { %6600 = vst [vmem:[#allocation37_spill] sm:$0xff] %v4378_v0  ;;  %v6605_v0 = vmov 13   ;;  %v4440_v15 = vrot.slane %v4155_v52, %v4376_v39  ;;  %v4454_v40 = vrot.slane %v4155_v52, %v4373_v24  ;;  %v673_v52 = vmul.f32 %v671_v4, %v4145_v48 }
 0x14d   : > { %1380 = vperm.xlu1 %3688, %v4218_v1   ;;  %v911_v1 = vrot.slane %v4134_v45, %v4367_v8  ;;  %v741_v45 = vrot.slane %v642_v21, %v4373_v24  ;;  %v756_v35 = vmul.f32 %v755_v5, %v4301_v60  ;;  %v927_v60 = vmul.f32 %v925_v11, %v4299_v50 }
 0x14e   : > { %6608 = vst [vmem:[#allocation44_spill] sm:$0xff] %v4440_v15  ;;  %6610 = vst [vmem:[#allocation46_spill] sm:$0xff] %v4454_v40  ;;  %v714_v15 = vmul.f32 %v713_v34, %v4282_v41  ;;  %v4469_v40 = vadd.f32 %v899_v27, %v885_v23 }
 0x14f   : > { %v4399_v63 = vpop.permute.xlu1 %1027  ;;  %v873_v12 = vpop.permute.xlu0 %872  ;;  %v912_v33 = vmul.f32 %v911_v1, %v4290_v44  ;;  %v926_v44 = vmul.f32 %v925_v11, %v4271_v38  ;;  %v913_v48 = vmul.f32 %v911_v1, %v4293_v47 }
 0x150   : > { %6601 = vst [vmem:[#allocation38_spill] sm:$0xff] %v4399_v63  ;;  %v884_v1 = vmul.f32 %v4393_v16, %v873_v12  ;;  %v6616_v50 = vld [vmem:[#allocation42_spill] sm:$0xff] }
 0x151   : > { %3689 = vset.pattern.permute.xlu1 %v6605_v0  ;;  %v685_v0 = vrot.slane %v642_v21, %v4367_v8  ;;  %v728_v21 = vmul.f32 %v4419_v9, %v4176_v56  ;;  %v659_v8 = vmul.f32 %v4433_v19, %v4139_v46  ;;  %v700_v56 = vmul.f32 %v699_v25, %v4158_v53 }
 0x152   : > { %v701_v46 = vmul.f32 %v699_v25, %v4164_v54  ;;  %v1114_v9 = vadd.f32 %v926_v44, %v912_v33  ;;  %v955_v53 = vmul.f32 %v953_v17, %v4314_v31  ;;  %v4491_v25 = vmul.f32 %v713_v34, %v4170_v55  ;;  %v6620_v31 = vld [vmem:[#allocation39_spill] sm:$0xff]  ;;  %v6622_v44 = vld [vmem:[#allocation29_spill] sm:$0xff] }
 0x153   : > { %v4444_v63 = vpop.permute.xlu1 %1031  ;;  %v4456_v39 = vpop.permute.xlu0 %1165  ;;  %v686_v41 = vmul.f32 %v685_v0, %v4151_v51  ;;  %v687_v43 = vmul.f32 %v685_v0, %v4238_v7  ;;  %v1100_v23 = vadd.f32 %v728_v21, %v714_v15  ;;  %v954_v51 = vmul.f32 %v953_v17, %v4309_v13  ;;  %v6621_v21 = vld [vmem:[#allocation43_spill] sm:$0xff] }
 0x154   : > { %6609 = vst [vmem:[#allocation45_spill] sm:$0xff] %v4444_v63  ;;  %6611 = vst [vmem:[#allocation47_spill] sm:$0xff] %v4456_v39  ;;  %v742_v63 = vmul.f32 %v741_v45, %v4181_v57  ;;  %v968_v39 = vmul.f32 %v967_v30, %v4296_v49  ;;  %v898_v57 = vmul.f32 %v897_v14, %v4284_v42  ;;  %v643_v17 = vsel %vm586_vm0, %v4326_v2, 0.0 }
 0x155   : > { %v672_v14 = vmul.f32 %v671_v4, %v4258_v32  ;;  %v4485_v11 = vadd.f32 %v673_v52, %v659_v8  ;;  %v969_v42 = vmul.f32 %v967_v30, %v4320_v10  ;;  %v4488_v0 = vadd.f32 %v700_v56, %v686_v41  ;;  %v6623_v56 = vld [vmem:[#allocation22_spill] sm:$0xff] }
 0x156   : > { %v1102_v27 = vadd.f32 %v756_v35, %v742_v63  ;;  %v4494_v33 = vmul.f32 %v741_v45, %v4186_v58  ;;  %v4496_v15 = vadd.f32 %v927_v60, %v913_v48  ;;  %v940_v54 = vmul.f32 %v939_v26, %v4305_v62  ;;  %v6624_v60 = vld [vmem:[#allocation40_spill] sm:$0xff] }
 0x157   : > { %v4480_v49 = vpop.permute.xlu0 %1184  ;;  %v4502_v63 = vadd.f32 %v701_v46, %v687_v43  ;;  %v983_v10 = vmul.f32 %v4403_v61, %v4311_v28  ;;  %v4508_v4 = vmul.f32 %v755_v5, %v4192_v59  ;;  %v1117_v8 = vadd.f32 %v955_v53, %v941_v36  ;;  %v6614_v16 = vld [vmem:[#allocation38_spill] sm:$0xff]  ;;  %v6615_v5 = vld [vmem:[#allocation23_spill] sm:$0xff]  ;;  %v6619_v28 = vld [vmem:[#allocation32_spill] sm:$0xff] }
 0x158   : > { %v4475_v38 = vpop.permute.xlu1 %1045  ;;  %6612 = vst [vmem:[#allocation48_spill] sm:$0xff] %v4480_v49  ;;  %v4510_v58 = vadd.f32 %v1102_v27, %v1100_v23  ;;  %v1116_v7 = vadd.f32 %v954_v51, %v940_v54  ;;  %v1010_v26 = vmul.f32 %v4407_v6, %v4317_v18  ;;  %v982_v2 = vmul.f32 %v4403_v61, %v4332_v20  ;;  %v6617_v18 = vld [vmem:[#allocation36_spill] sm:$0xff]  ;;  %v6626_v23 = vld [vmem:[#allocation33_spill] sm:$0xff]  ;;  %v6627_v51 = vld [vmem:[#allocation30_spill] sm:$0xff] }
 0x159   : > { %6613 = vst [vmem:[#allocation49_spill] sm:$0xff] %v4502_v63  ;;  %v1119_v34 = vadd.f32 %v983_v10, %v969_v42  ;;  %v4517_v47 = vrot.slane %v643_v17, %v4362_v37  ;;  %v839_v12 = vrot.slane %v643_v17, %v4370_v3  ;;  %v1038_v59 = vmul.f32 %v4450_v22, %v6614_v16  ;;  %v6618_v20 = vld [vmem:[#allocation4_spill] sm:$0xff]  ;;  %v6630_v16 = vld [vmem:[#allocation37_spill] sm:$0xff] }
 0x15a   : > { %v996_v62 = vmul.f32 %v6616_v50, %v6615_v5  ;;  %v4525_v36 = vrot.slane %v643_v17, %v4373_v24  ;;  %v4528_v13 = vrot.slane %v643_v17, %v6617_v18  ;;  %v769_v61 = vrot.slane %v643_v17, %v6618_v20  ;;  %v6628_v42 = vld [vmem:[#allocation28_spill] sm:$0xff]  ;;  %v6634_v3 = vld [vmem:[#allocation17_spill] sm:$0xff] }
 0x15b   : > { %v1024_v30 = vmul.f32 %v6620_v31, %v6619_v28  ;;  %v1112_v45 = vadd.f32 %v898_v57, %v884_v1  ;;  %v783_v52 = vrot.slane %v643_v17, %v6622_v44  ;;  %v1118_v41 = vadd.f32 %v982_v2, %v968_v39  ;;  %v6629_v54 = vld [vmem:[#allocation44_spill] sm:$0xff]  ;;  %v6640_v63 = vld [vmem:[#allocation21_spill] sm:$0xff] }
 0x15c   : > { %v722_v32 = vpop.permute.xlu0 %721  ;;  %v1052_v43 = vmul.f32 %v6624_v60, %v6623_v56  ;;  %v797_v27 = vrot.slane %v643_v17, %v6626_v23  ;;  %v811_v53 = vrot.slane %v643_v17, %v6627_v51  ;;  %v1094_v10 = vmul.f32 %v6629_v54, %v6628_v42  ;;  %v6632_v2 = vld [vmem:[#allocation12_spill] sm:$0xff] }
 0x15d   : > { %v1056_v55 = vpop.permute.xlu1 %1055  ;;  %v658_v57 = vmul.f32 %v4433_v19, %v6630_v16  ;;  %v1122_v1 = vadd.f32 %v1038_v59, %v1024_v30  ;;  %v1120_v39 = vadd.f32 %v1010_v26, %v996_v62  ;;  %v826_v28 = vmul.f32 %v4517_v47, %v6632_v2  ;;  %v6633_v56 = vld [vmem:[#allocation16_spill] sm:$0xff]  ;;  %v6637_v30 = vld [vmem:[#allocation11_spill] sm:$0xff]  ;;  %v6638_v26 = vld [vmem:[#allocation6_spill] sm:$0xff] }
 0x15e   : > { %v1066_v35 = vmul.f32 %v6621_v21, %v1056_v55  ;;  %v6631_v55 = vld [vmem:[#allocation46_spill] sm:$0xff]  ;;  %v868_v18 = vmul.f32 %v4528_v13, %v6634_v3  ;;  %v6635_v17 = vld [vmem:[#allocation24_spill] sm:$0xff]  ;;  %v1136_v24 = vadd.f32 %v1114_v9, %v1112_v45  ;;  %v770_v62 = vmul.f32 %v769_v61, %v6638_v26  ;;  %v6639_v16 = vld [vmem:[#allocation7_spill] sm:$0xff] }
 0x15f   : > { %v840_v23 = vmul.f32 %v839_v12, %v6635_v17  ;;  %v6636_v19 = vld [vmem:[#allocation20_spill] sm:$0xff]  ;;  %v784_v2 = vmul.f32 %v783_v52, %v6639_v16  ;;  %v1138_v51 = vadd.f32 %v1118_v41, %v1116_v7  ;;  %v1096_v44 = vadd.f32 %v672_v14, %v658_v57  ;;  %v6641_v45 = vld [vmem:[#allocation15_spill] sm:$0xff] }
 0x160   : > { %v4537_v48 = vpop.permute.xlu0 %1282  ;;  %v1124_v42 = vadd.f32 %v1066_v35, %v1052_v43  ;;  %v798_v59 = vmul.f32 %v797_v27, %v6636_v19  ;;  %v1139_v3 = vadd.f32 %v1119_v34, %v1117_v8  ;;  %v1025_v9 = vmul.f32 %v6620_v31, %v6640_v63  ;;  %v6642_v43 = vld [vmem:[#allocation45_spill] sm:$0xff]  ;;  %v6643_v26 = vld [vmem:[#allocation27_spill] sm:$0xff] }
 0x161   : > { %6625 = vst [vmem:[#allocation38_spill] sm:$0xff] %v4537_v48  ;;  %v854_v48 = vmul.f32 %v4525_v36, %v6633_v56  ;;  %v1140_v56 = vadd.f32 %v1122_v1, %v1120_v39  ;;  %v841_v35 = vmul.f32 %v839_v12, %v6641_v45  ;;  %v1108_v17 = vadd.f32 %v840_v23, %v826_v28  ;;  %v6644_v34 = vld [vmem:[#allocation25_spill] sm:$0xff]  ;;  %v6649_v39 = vld [vmem:[#allocation10_spill] sm:$0xff] }
 0x162   : > { %v1070_v46 = vpop.permute.xlu1 %1069  ;;  %v1148_v19 = vadd.f32 %v1138_v51, %v1136_v24  ;;  %v1011_v7 = vmul.f32 %v4407_v6, %v6643_v26  ;;  %v1053_v14 = vmul.f32 %v6624_v60, %v4475_v38  ;;  %v1104_v8 = vadd.f32 %v784_v2, %v770_v62  ;;  %v6645_v31 = vld [vmem:[#allocation41_spill] sm:$0xff]  ;;  %v6647_v51 = vld [vmem:[#allocation14_spill] sm:$0xff] }
 0x163   : > { %v1080_v5 = vmul.f32 %v6631_v55, %v1070_v46  ;;  %v812_v46 = vmul.f32 %v811_v53, %v6637_v30  ;;  %v997_v63 = vmul.f32 %v6616_v50, %v6644_v34  ;;  %v1128_v12 = vadd.f32 %v4488_v0, %v1096_v44  ;;  %v6648_v50 = vld [vmem:[#allocation8_spill] sm:$0xff]  ;;  %v6650_v62 = vld [vmem:[#allocation13_spill] sm:$0xff]  ;;  %v6651_v2 = vld [vmem:[#allocation18_spill] sm:$0xff] }
 0x164   : > { %v729_v41 = vmul.f32 %v6645_v31, %v722_v32  ;;  %v771_v57 = vmul.f32 %v769_v61, %v6647_v51  ;;  %v785_v1 = vmul.f32 %v783_v52, %v6648_v50  ;;  %v799_v28 = vmul.f32 %v797_v27, %v6649_v39  ;;  %v6653_v26 = vld [vmem:[#allocation5_spill] sm:$0xff] }
 0x165   : > { %v1126_v20 = vadd.f32 %v1094_v10, %v1080_v5  ;;  %v806_v49 = vpop.permute.xlu0 %805  ;;  %v1039_v10 = vmul.f32 %v4450_v22, %v6642_v43  ;;  %v1110_v5 = vadd.f32 %v868_v18, %v854_v48  ;;  %v1121_v44 = vadd.f32 %v1011_v7, %v997_v63 }
 0x166   : > { %v1074_v37 = vpop.permute.xlu1 %1073  ;;  %v813_v0 = vmul.f32 %v811_v53, %v806_v49  ;;  %v1103_v49 = vadd.f32 %v4508_v4, %v4494_v33  ;;  %v6661_v51 = vmov 14   ;;  %v6662_v50 = vmov 3  }
 0x167   : > { %v1142_v29 = vadd.f32 %v1126_v20, %v1124_v42  ;;  %v1106_v20 = vadd.f32 %v812_v46, %v798_v59  ;;  %v1123_v6 = vadd.f32 %v1039_v10, %v1025_v9  ;;  %v1081_v23 = vmul.f32 %v6631_v55, %v1074_v37  ;;  %v6652_v10 = vld [vmem:[#allocation49_spill] sm:$0xff] }
 0x168   : > { %v1134_v60 = vadd.f32 %v1110_v5, %v1108_v17  ;;  %v1101_v59 = vadd.f32 %v729_v41, %v4491_v25  ;;  %v827_v37 = vmul.f32 %v4517_v47, %v6650_v62  ;;  %v1107_v27 = vadd.f32 %v813_v0, %v799_v28  ;;  %v6656_v41 = vld [vmem:[#allocation47_spill] sm:$0xff] }
 0x169   : > { %v1150_v30 = vadd.f32 %v1142_v29, %v1140_v56  ;;  %v4570_v18 = vpop.permute.xlu0 %1366  ;;  %v6646_v29 = vld [vmem:[#allocation26_spill] sm:$0xff]  ;;  %v1132_v46 = vadd.f32 %v1106_v20, %v1104_v8  ;;  %v1141_v61 = vadd.f32 %v1123_v6, %v1121_v44  ;;  %v869_v25 = vmul.f32 %v4528_v13, %v6651_v2  ;;  %v6658_v6 = vld [vmem:[#allocation9_spill] sm:$0xff] }
 0x16a   : > { %v1067_v48 = vmul.f32 %v6621_v21, %v6646_v29  ;;  %v1144_v21 = vadd.f32 %v4510_v58, %v1128_v12  ;;  %v1105_v9 = vadd.f32 %v785_v1, %v771_v57  ;;  %v1131_v45 = vadd.f32 %v1103_v49, %v1101_v59  ;;  %v4619_v57 = vld [vmem:[%s6360_s7 + $0x10] sm:$0xff] }
 0x16b   : > { %v1088_v22 = vpop.permute.xlu1 %1087  ;;  %v1154_v24 = vadd.f32 %v1150_v30, %v1148_v19  ;;  %v1146_v16 = vadd.f32 %v1134_v60, %v1132_v46  ;;  %v1129_v33 = vadd.f32 %v6652_v10, %v4485_v11  ;;  %v4611_v60 = vld [vmem:[%s6360_s7 + $0x18] sm:$0xff]  ;;  %v6663_v1 = vmov 15   ;;  %v4734_v10 = vld [vmem:[%s6362_s9] sm:$0xff] }
 0x16c   : > { %v1095_v38 = vmul.f32 %v6629_v54, %v1088_v22  ;;  %v1125_v32 = vadd.f32 %v1067_v48, %v1053_v14  ;;  %v1137_v54 = vadd.f32 %v4496_v15, %v4469_v40  ;;  %v1109_v40 = vadd.f32 %v841_v35, %v827_v37  ;;  %6677 = vst [vmem:[#allocation39_spill] sm:$0xff] %v4734_v10 }
 0x16d   : > { %v1152_v43 = vadd.f32 %v1146_v16, %v1144_v21  ;;  %v1133_v17 = vadd.f32 %v1107_v27, %v1105_v9  ;;  %v1145_v13 = vadd.f32 %v1131_v45, %v1129_v33  ;;  %v6664_v0 = vmov 4   ;;  %v4704_v9 = vld [vmem:[%s6362_s9 + $0x8] sm:$0xff] }
 0x16e   : > { %v1127_v42 = vadd.f32 %v1095_v38, %v1081_v23  ;;  %v848_v55 = vpop.permute.xlu0 %847  ;;  %v1149_v56 = vadd.f32 %v1139_v3, %v1137_v54  ;;  %v6654_v3 = vld [vmem:[#allocation48_spill] sm:$0xff]  ;;  %v6659_v23 = vmov 1   ;;  %v6660_v38 = vld [vmem:[#allocation19_spill] sm:$0xff]  ;;  %v6665_v44 = vmov 0   ;;  %6675 = vst [vmem:[#allocation32_spill] sm:$0xff] %v4704_v9 }
 0x16f   : > { %v855_v58 = vmul.f32 %v4525_v36, %v848_v55  ;;  %v1156_v19 = vadd.f32 %v1154_v24, %v1152_v43  ;;  %v6667_v28 = vmov 7   ;;  %v6668_v59 = vmov 2  }
 0x170   : > { %v1143_v52 = vadd.f32 %v1127_v42, %v1125_v32  ;;  %v1161_v53 = vpop.permute.xlu1 %1160  ;;  %v6666_v32 = vmov 6   ;;  %v6669_v21 = vmov 9   ;;  %v6670_v37 = vmov 10  }
 0x171   : > { %v1111_v15 = vadd.f32 %v869_v25, %v855_v58  ;;  %v1168_v14 = vadd.f32 %v1161_v53, %v1156_v19  ;;  %v6672_v49 = vmov 12   ;;  %v6673_v53 = vmov 13   ;;  %v562_v25 = vld [vmem:[%s6361_s8 + $0x8] sm:$0xff] }
 0x172   : > { %v1151_v47 = vadd.f32 %v1143_v52, %v1141_v61  ;;  %v6671_v61 = vmov 5   ;;  %v6674_v16 = vmov 8  }
 0x173   : > { %v1135_v30 = vadd.f32 %v1111_v15, %v1109_v40 }
 0x174   : > { %v1173_v4 = vpop.permute.xlu1 %1172  ;;  %v1155_v5 = vadd.f32 %v1151_v47, %v1149_v56  ;;  %v6676_v47 = vmov 11  }
 0x175   : > { %v1180_v7 = vmul.f32 %v1173_v4, %v6653_v26  ;;  %v1147_v36 = vadd.f32 %v1135_v30, %v1133_v17  ;;  %v4744_v4 = vld [vmem:[%s6362_s9 + $0x18] sm:$0xff]  ;;  %v4755_v17 = vld [vmem:[%s6362_s9 + $0x10] sm:$0xff] }
 0x176   : > { %6678 = vst [vmem:[#allocation43_spill] sm:$0xff] %v4744_v4  ;;  %6679 = vst [vmem:[#allocation22_spill] sm:$0xff] %v4755_v17 }
 0x177   : > { %v1192_v20 = vadd.f32 %v6654_v3, %v1180_v7  ;;  %v1153_v63 = vadd.f32 %v1147_v36, %v1145_v13 }
 0x178   : > { %v1178_v8 = vpop.permute.xlu1 %1177 }
 0x179   : > { %v1194_v34 = vadd.f32 %v1192_v20, %v1168_v14  ;;  %v1181_v12 = vmul.f32 %v1178_v8, %v6653_v26  ;;  %v1157_v11 = vadd.f32 %v1155_v5, %v1153_v63  ;;  %v561_v5 = vld [vmem:[%s6361_s8] sm:$0xff] }
 0x17b   : > { %v4594_v35 = vmax.f32 %v1194_v34, 0.0  ;;  %v1169_v22 = vadd.f32 %v6656_v41, %v1157_v11 }
 0x17c   : > { %v1190_v31 = vpop.permute.xlu1 %1189 }
 0x17d   : > { %6655 = vst [vmem:[#allocation23_spill] sm:$0xff] %v4594_v35  ;;  %v1193_v24 = vadd.f32 %v1190_v31, %v1181_v12  ;;  %1199 = vrot.lane.b32.xlu0 %v4594_v35, %s3903_s16 }
 0x17f   : > { %v1195_v29 = vadd.f32 %v1193_v24, %v1169_v22 }
 0x180   : > { %v4633_v39 = vpop.permute.xlu1 %1212 }
 0x181   : > { %v4600_v48 = vmax.f32 %v1195_v29, 0.0  ;;  %1408 = vperm.xlu0 %3687, %v6658_v6  }
 0x183   : > { %6657 = vst [vmem:[#allocation42_spill] sm:$0xff] %v4600_v48  ;;  %1201 = vrot.lane.b32.xlu1 %v4600_v48, %s3903_s16 }
 0x185   : > { %3691 = vset.pattern.permute.xlu0 %v6659_v23  ;;  %v4639_v42 = vpop.permute.xlu1 %1226 }
 0x186   : > { %1222 = vperm.xlu0 %3691, %v6660_v38  }
 0x187   : > { %1394 = vperm.xlu1 %3689, %v6658_v6  }
 0x18a   : > { %1452 = vperm.xlu0 %3691, %v4611_v60   ;;  %v4645_v46 = vpop.permute.xlu1 %1236 }
 0x18b   : > { %3690 = vset.pattern.permute.xlu1 %v6661_v51 }
 0x18c   : > { %1404 = vperm.xlu1 %3690, %v6660_v38  }
 0x18e   : > { %3696 = vset.pattern.permute.xlu0 %v6662_v50 }
 0x18f   : > { %1476 = vperm.xlu0 %3696, %v4619_v57   ;;  %v4651_v62 = vpop.permute.xlu1 %1250 }
 0x190   : > { %3692 = vset.pattern.permute.xlu1 %v6663_v1 }
 0x191   : > { %1418 = vperm.xlu1 %3692, %v6660_v38  }
 0x193   : > { %3697 = vset.pattern.permute.xlu0 %v6664_v0  ;;  %v4658_v54 = vpop.permute.xlu1 %1254 }
 0x194   : > { %1264 = vperm.xlu0 %3697, %v6660_v38  }
 0x195   : > { %1422 = vperm.xlu1 %3692, %v6658_v6  }
 0x198   : > { %1494 = vperm.xlu0 %3697, %v4611_v60   ;;  %v4664_v52 = vpop.permute.xlu1 %1268 }
 0x199   : > { %3693 = vset.pattern.permute.xlu1 %v6665_v44 }
 0x19a   : > { %1438 = vperm.xlu1 %3693, %v4611_v60  }
 0x19c   : > { %3701 = vset.pattern.permute.xlu0 %v6666_v32 }
 0x19d   : > { %1518 = vperm.xlu0 %3701, %v4619_v57   ;;  %v4671_v55 = vpop.permute.xlu1 %1278 }
 0x19e   : > { %3694 = vset.pattern.permute.xlu1 %v6659_v23 }
 0x19f   : > { %1448 = vperm.xlu1 %3694, %v4619_v57  }
 0x1a1   : > { %3702 = vset.pattern.permute.xlu0 %v6667_v28 }
 0x1a2   : > { %1306 = vperm.xlu0 %3702, %v6660_v38   ;;  %v4677_v27 = vpop.permute.xlu1 %1292 }
 0x1a3   : > { %3695 = vset.pattern.permute.xlu1 %v6668_v59 }
 0x1a4   : > { %1462 = vperm.xlu1 %3695, %v4619_v57  }
 0x1a6   : > { %1536 = vperm.xlu0 %3702, %v4611_v60   ;;  %v4684_v2 = vpop.permute.xlu1 %1296 }
 0x1a8   : > { %1466 = vperm.xlu1 %3695, %v4611_v60  }
 0x1aa   : > { %3706 = vset.pattern.permute.xlu0 %v6669_v21 }
 0x1ab   : > { %1560 = vperm.xlu0 %3706, %v4619_v57   ;;  %v4692_v58 = vpop.permute.xlu1 %1310 }
 0x1ac   : > { %3698 = vset.pattern.permute.xlu1 %v6662_v50 }
 0x1ad   : > { %1480 = vperm.xlu1 %3698, %v4611_v60  }
 0x1af   : > { %3707 = vset.pattern.permute.xlu0 %v6670_v37 }
 0x1b0   : > { %1348 = vperm.xlu0 %3707, %v6660_v38   ;;  %v4698_v56 = vpop.permute.xlu1 %1320 }
 0x1b1   : > { %3699 = vset.pattern.permute.xlu1 %v6664_v0 }
 0x1b2   : > { %1490 = vperm.xlu1 %3699, %v4619_v57  }
 0x1b4   : > { %1578 = vperm.xlu0 %3707, %v4611_v60  }
 0x1b5   : > { %v4709_v45 = vpop.permute.xlu1 %1334 }
 0x1b6   : > { %3700 = vset.pattern.permute.xlu1 %v6671_v61 }
 0x1b7   : > { %1504 = vperm.xlu1 %3700, %v4619_v57  }
 0x1b8   : > { %3711 = vset.pattern.permute.xlu0 %v6672_v49 }
 0x1b9   : > { %1602 = vperm.xlu0 %3711, %v4619_v57   ;;  %v4714_v43 = vpop.permute.xlu1 %1338 }
 0x1bb   : > { %1508 = vperm.xlu1 %3700, %v4611_v60  }
 0x1bd   : > { %3712 = vset.pattern.permute.xlu0 %v6673_v53 }
 0x1be   : > { %1390 = vperm.xlu0 %3712, %v6660_v38   ;;  %v4719_v40 = vpop.permute.xlu1 %1352 }
 0x1bf   : > { %3703 = vset.pattern.permute.xlu1 %v6666_v32 }
 0x1c0   : > { %1522 = vperm.xlu1 %3703, %v4611_v60  }
 0x1c2   : > { %1620 = vperm.xlu0 %3712, %v4611_v60  }
 0x1c3   : > { %v4727_v15 = vpop.permute.xlu1 %1362 }
 0x1c4   : > { %3704 = vset.pattern.permute.xlu1 %v6667_v28 }
 0x1c5   : > { %1532 = vperm.xlu1 %3704, %v4619_v57  }
 0x1c6   : > { %3716 = vset.pattern.permute.xlu0 %v6663_v1 }
 0x1c7   : > { %1644 = vperm.xlu0 %3716, %v4619_v57  }
 0x1c8   : > { %v4739_v33 = vpop.permute.xlu1 %1376 }
 0x1c9   : > { %3705 = vset.pattern.permute.xlu1 %v6674_v16 }
 0x1ca   : > { %1546 = vperm.xlu1 %3705, %v4619_v57  }
 0x1cb   : > { %3717 = vset.pattern.permute.xlu0 %v6665_v44 }
 0x1cc   : > { %1207 = vperm.xlu0 %3717, %v6660_v38   ;;  %v4759_v30 = vpop.permute.xlu1 %1380 }
 0x1ce   : > { %1550 = vperm.xlu1 %3705, %v4611_v60  }
 0x1d0   : > { %1433 = vperm.xlu0 %3717, %v4619_v57  }
 0x1d2   : > { %3708 = vset.pattern.permute.xlu1 %v6669_v21 }
 0x1d3   : > { %1564 = vperm.xlu1 %3708, %v4611_v60  }
 0x1d4   : > { %1726 = vperm.xlu0 %3717, %v562_v25  }
 0x1d7   : > { %3709 = vset.pattern.permute.xlu1 %v6670_v37 }
 0x1d8   : > { %1574 = vperm.xlu1 %3709, %v4619_v57   ;;  %3720 = vset.pattern.permute.xlu0 %v6668_v59 }
 0x1d9   : > { %1240 = vperm.xlu0 %3720, %v6658_v6  }
 0x1dc   : > { %3710 = vset.pattern.permute.xlu1 %v6676_v47 }
 0x1dd   : > { %1588 = vperm.xlu1 %3710, %v4619_v57   ;;  %1772 = vperm.xlu0 %3720, %v4704_v9  }
 0x1e1   : > { %1592 = vperm.xlu1 %3710, %v4611_v60   ;;  %3723 = vset.pattern.permute.xlu0 %v6674_v16 }
 0x1e2   : > { %1324 = vperm.xlu0 %3723, %v6658_v6  }
 0x1e5   : > { %3713 = vset.pattern.permute.xlu1 %v6672_v49 }
 0x1e6   : > { %1606 = vperm.xlu1 %3713, %v4611_v60   ;;  %1856 = vperm.xlu0 %3723, %v4704_v9  }
 0x1ea   : > { %3714 = vset.pattern.permute.xlu1 %v6673_v53  ;;  %3733 = vset.pattern.permute.xlu0 %v6676_v47 }
 0x1eb   : > { %1616 = vperm.xlu1 %3714, %v4619_v57   ;;  %1898 = vperm.xlu0 %3733, %v4704_v9  }
 0x1ef   : > { %3715 = vset.pattern.permute.xlu1 %v6661_v51  ;;  %3737 = vset.pattern.permute.xlu0 %v6661_v51  ;;  %v4757_v19 = vpop.permute.xlu0 %1199 }
 0x1f0   : > { %1630 = vperm.xlu1 %3715, %v4619_v57   ;;  %1940 = vperm.xlu0 %3737, %v4704_v9  }
 0x1f4   : > { %1634 = vperm.xlu1 %3715, %v4611_v60   ;;  %3738 = vset.pattern.permute.xlu0 %v6659_v23 }
 0x1f5   : > { %1754 = vperm.xlu0 %3738, %v4734_v10   ;;  %v4766_v7 = vpop.permute.xlu1 %1201 }
 0x1f8   : > { %3718 = vset.pattern.permute.xlu1 %v6663_v1 }
 0x1f9   : > { %1648 = vperm.xlu1 %3718, %v4611_v60   ;;  %1984 = vperm.xlu0 %3738, %v4744_v4  }
 0x1fd   : > { %3719 = vset.pattern.permute.xlu1 %v6665_v44  ;;  %3743 = vset.pattern.permute.xlu0 %v6662_v50 }
 0x1fe   : > { %1721 = vperm.xlu1 %3719, %v561_v5   ;;  %2008 = vperm.xlu0 %3743, %v4755_v17  }
 0x200   : > { %v4764_v26 = vpop.permute.xlu0 %1408 }
 0x202   : > { %1744 = vperm.xlu1 %3719, %v4704_v9   ;;  %3744 = vset.pattern.permute.xlu0 %v6664_v0 }
 0x203   : > { %1796 = vperm.xlu0 %3744, %v4734_v10  }
 0x205   : > { %v4771_v13 = vpop.permute.xlu0 %1222 }
 0x206   : > { %v4773_v14 = vpop.permute.xlu1 %1394  ;;  %3721 = vset.pattern.permute.xlu1 %v6659_v23  ;;  %v6704_v23 = vld [vmem:[#allocation30_spill] sm:$0xff] }
 0x207   : > { %2026 = vperm.xlu0 %3744, %v4744_v4   ;;  %1758 = vperm.xlu1 %3721, %v4704_v9  }
 0x209   : > { %v4778_v36 = vpop.permute.xlu0 %1452 }
 0x20b   : > { %v4780_v3 = vpop.permute.xlu1 %1404  ;;  %3748 = vset.pattern.permute.xlu0 %v6666_v32  ;;  %3722 = vset.pattern.permute.xlu1 %v6668_v59 }
 0x20c   : > { %2050 = vperm.xlu0 %3748, %v4755_v17   ;;  %1768 = vperm.xlu1 %3722, %v4734_v10  }
 0x20e   : > { %v4786_v20 = vpop.permute.xlu0 %1476 }
 0x210   : > { %v4788_v8 = vpop.permute.xlu1 %1418  ;;  %3749 = vset.pattern.permute.xlu0 %v6667_v28  ;;  %3724 = vset.pattern.permute.xlu1 %v6662_v50  ;;  %v6701_v50 = vld [vmem:[#allocation3_spill] sm:$0xff] }
 0x211   : > { %1838 = vperm.xlu0 %3749, %v4734_v10   ;;  %1782 = vperm.xlu1 %3724, %v4734_v10   ;;  %vm1198_vm1 = vcmp.ge.s32.totalorder %v6701_v50, 2 }
 0x213   : > { %v4794_v34 = vpop.permute.xlu0 %1264 }
 0x214   : > { %v4796_v63 = vpop.permute.xlu1 %1422 }
 0x215   : > { %2068 = vperm.xlu0 %3749, %v4744_v4   ;;  %1786 = vperm.xlu1 %3724, %v4704_v9  }
 0x217   : > { %v4800_v12 = vpop.permute.xlu0 %1494 }
 0x219   : > { %v4802_v11 = vpop.permute.xlu1 %1438  ;;  %3753 = vset.pattern.permute.xlu0 %v6669_v21  ;;  %3725 = vset.pattern.permute.xlu1 %v6664_v0 }
 0x21a   : > { %2092 = vperm.xlu0 %3753, %v4755_v17  }
 0x21c   : > { %v4807_v31 = vpop.permute.xlu0 %1518 }
 0x21d   : > { %6680 = vst [vmem:[#allocation40_spill] sm:$0xff] %v4807_v31 }
 0x21e   : > { %v4809_v41 = vpop.permute.xlu1 %1448  ;;  %3754 = vset.pattern.permute.xlu0 %v6670_v37 }
 0x21f   : > { %6681 = vst [vmem:[#allocation28_spill] sm:$0xff] %v4809_v41  ;;  %1880 = vperm.xlu0 %3754, %v4734_v10  }
 0x221   : > { %v4813_v22 = vpop.permute.xlu0 %1306 }
 0x223   : > { %v4815_v24 = vpop.permute.xlu1 %1462  ;;  %2110 = vperm.xlu0 %3754, %v4744_v4  }
 0x225   : > { %v4818_v29 = vpop.permute.xlu0 %1536 }
 0x226   : > { %6682 = vst [vmem:[#allocation44_spill] sm:$0xff] %v4818_v29  ;;  %v6707_v29 = vld [vmem:[#allocation4_spill] sm:$0xff] }
 0x227   : > { %v4820_v6 = vpop.permute.xlu1 %1466  ;;  %3758 = vset.pattern.permute.xlu0 %v6672_v49 }
 0x228   : > { %6683 = vst [vmem:[#allocation37_spill] sm:$0xff] %v4820_v6  ;;  %2134 = vperm.xlu0 %3758, %v4755_v17  }
 0x22a   : > { %v4824_v38 = vpop.permute.xlu0 %1560 }
 0x22b   : > { %6684 = vst [vmem:[#allocation46_spill] sm:$0xff] %v4824_v38 }
 0x22c   : > { %v4826_v60 = vpop.permute.xlu1 %1480  ;;  %3759 = vset.pattern.permute.xlu0 %v6673_v53 }
 0x22d   : > { %6685 = vst [vmem:[#allocation12_spill] sm:$0xff] %v4826_v60  ;;  %1922 = vperm.xlu0 %3759, %v4734_v10   ;;  %v6714_v60 = vld [vmem:[#allocation34_spill] sm:$0xff] }
 0x22f   : > { %v4830_v57 = vpop.permute.xlu0 %1348 }
 0x230   : > { %6686 = vst [vmem:[#allocation16_spill] sm:$0xff] %v4830_v57  ;;  %v1204_v57 = vsel %vm1198_vm1, %v4766_v7, 0.0 }
 0x231   : > { %v4832_v25 = vpop.permute.xlu1 %1490  ;;  %2152 = vperm.xlu0 %3759, %v4744_v4   ;;  %v568_v4 = vld [vmem:[%s6363_s10 + $0x8] sm:$0xff] }
 0x232   : > { %6687 = vst [vmem:[#allocation17_spill] sm:$0xff] %v4832_v25  ;;  %v6712_v25 = vld [vmem:[#allocation36_spill] sm:$0xff] }
 0x233   : > { %v4835_v5 = vpop.permute.xlu0 %1578 }
 0x234   : > { %6688 = vst [vmem:[#allocation24_spill] sm:$0xff] %v4835_v5  ;;  %v4883_v5 = vrot.slane %v4594_v35, %v6704_v23 }
 0x235   : > { %3763 = vset.pattern.permute.xlu0 %v6663_v1 }
 0x236   : > { %v4838_v59 = vpop.permute.xlu1 %1504  ;;  %2176 = vperm.xlu0 %3763, %v4755_v17  }
 0x237   : > { %6689 = vst [vmem:[#allocation20_spill] sm:$0xff] %v4838_v59 }
 0x238   : > { %v4841_v49 = vpop.permute.xlu0 %1602 }
 0x239   : > { %6690 = vst [vmem:[#allocation11_spill] sm:$0xff] %v4841_v49 }
 0x23a   : > { %v4843_v37 = vpop.permute.xlu1 %1508  ;;  %3764 = vset.pattern.permute.xlu0 %v6665_v44 }
 0x23b   : > { %6691 = vst [vmem:[#allocation6_spill] sm:$0xff] %v4843_v37  ;;  %1739 = vperm.xlu0 %3764, %v4734_v10  }
 0x23d   : > { %v4847_v53 = vpop.permute.xlu0 %1390 }
 0x23e   : > { %6692 = vst [vmem:[#allocation7_spill] sm:$0xff] %v4847_v53  ;;  %v4921_v53 = vrot.slane %v4594_v35, %v6714_v60 }
 0x23f   : > { %v4849_v21 = vpop.permute.xlu1 %1522  ;;  %1965 = vperm.xlu0 %3764, %v4755_v17  }
 0x240   : > { %6693 = vst [vmem:[#allocation21_spill] sm:$0xff] %v4849_v21  ;;  %v4893_v21 = vrot.slane %v4594_v35, %v6707_v29  ;;  %6717 = vst [vmem:[#allocation47_spill] sm:$0xff] %v4921_v53 }
 0x241   : > { %v4855_v1 = vpop.permute.xlu0 %1620 }
 0x242   : > { %6694 = vst [vmem:[#allocation15_spill] sm:$0xff] %v4855_v1  ;;  %6708 = vst [vmem:[#allocation13_spill] sm:$0xff] %v4893_v21  ;;  %v4963_v21 = vrot.slane %v1204_v57, %v6707_v29 }
 0x243   : > { %2258 = vperm.xlu0 %3764, %v568_v4   ;;  %v1203_v4 = vsel %vm1198_vm1, %v4757_v19, 0.0  ;;  %v6709_v19 = vld [vmem:[#allocation35_spill] sm:$0xff] }
 0x244   : > { %v4857_v28 = vpop.permute.xlu1 %1532  ;;  %v4897_v51 = vrot.slane %v4594_v35, %v6709_v19  ;;  %v1302_v38 = vrot.slane %v1203_v4, %v6709_v19  ;;  %v1260_v50 = vrot.slane %v1203_v4, %v6704_v23 }
 0x245   : > { %6695 = vst [vmem:[#allocation45_spill] sm:$0xff] %v4857_v28  ;;  %v1316_v28 = vrot.slane %v1203_v4, %v6712_v25 }
 0x246   : > { %v4863_v32 = vpop.permute.xlu0 %1644  ;;  %6710 = vst [vmem:[#allocation18_spill] sm:$0xff] %v4897_v51  ;;  %v1304_v51 = vmul.f32 %v1302_v38, %v4684_v2  ;;  %v4974_v2 = vrot.slane %v4600_v48, %v6709_v19 }
 0x247   : > { %3767 = vset.pattern.permute.xlu0 %v6671_v61  ;;  %6697 = vst [vmem:[#allocation25_spill] sm:$0xff] %v4863_v32  ;;  %v6703_v61 = vld [vmem:[#allocation29_spill] sm:$0xff] }
 0x248   : > { %1814 = vperm.xlu0 %3767, %v4704_v9   ;;  %v4879_v9 = vrot.slane %v4594_v35, %v6703_v61  ;;  %v6711_v32 = vld [vmem:[#allocation33_spill] sm:$0xff]  ;;  %v4913_v6 = vrot.slane %v4600_v48, %v6703_v61  ;;  %v1232_v41 = vrot.slane %v1203_v4, %v6703_v61 }
 0x249   : > { %v4861_v44 = vpop.permute.xlu1 %1546  ;;  %v4901_v49 = vrot.slane %v4594_v35, %v6711_v32  ;;  %v4917_v47 = vrot.slane %v4600_v48, %v6711_v32  ;;  %v4949_v7 = vrot.slane %v1203_v4, %v6711_v32  ;;  %v4959_v31 = vrot.slane %v1204_v57, %v6711_v32 }
 0x24a   : > { %6696 = vst [vmem:[#allocation27_spill] sm:$0xff] %v4861_v44  ;;  %v4905_v44 = vrot.slane %v4594_v35, %v6712_v25  ;;  %6715 = vst [vmem:[#allocation5_spill] sm:$0xff] %v4913_v6  ;;  %v4933_v6 = vrot.slane %v4600_v48, %v6714_v60 }
 0x24b   : > { %v4867_v17 = vpop.permute.xlu0 %1207  ;;  %6716 = vst [vmem:[#allocation48_spill] sm:$0xff] %v4917_v47  ;;  %v4937_v47 = vrot.slane %v4600_v48, %v6712_v25 }
 0x24c   : > { %6699 = vst [vmem:[#allocation26_spill] sm:$0xff] %v4867_v17  ;;  %6713 = vst [vmem:[#allocation49_spill] sm:$0xff] %v4905_v44  ;;  %v6724_v17 = vld [vmem:[#allocation38_spill] sm:$0xff] }
 0x24d   : > { %v4865_v10 = vpop.permute.xlu1 %1550  ;;  %6719 = vst [vmem:[#allocation19_spill] sm:$0xff] %v4933_v6  ;;  %6720 = vst [vmem:[#allocation50_spill] sm:$0xff] %v4937_v47 }
 0x24e   : > { %6698 = vst [vmem:[#allocation41_spill] sm:$0xff] %v4865_v10  ;;  %v6705_v10 = vld [vmem:[#allocation31_spill] sm:$0xff] }
 0x24f   : > { %v4875_v1 = vpop.permute.xlu0 %1433  ;;  %v4887_v37 = vrot.slane %v4594_v35, %v6705_v10  ;;  %v1274_v59 = vrot.slane %v1203_v4, %v6705_v10  ;;  %v4925_v44 = vrot.slane %v4600_v48, %v6705_v10  ;;  %v4941_v35 = vrot.slane %v4600_v48, %v6707_v29 }
 0x250   : > { %6702 = vst [vmem:[#allocation8_spill] sm:$0xff] %v4875_v1 }
 0x251   : > { %6718 = vst [vmem:[#allocation9_spill] sm:$0xff] %v4925_v44  ;;  %6721 = vst [vmem:[#allocation51_spill] sm:$0xff] %v4941_v35  ;;  %v4944_v44 = vrot.slane %v1203_v4, %v6707_v29  ;;  %v1276_v6 = vmul.f32 %v1274_v59, %v4664_v52  ;;  %v1318_v35 = vmul.f32 %v1316_v28, %v4692_v58 }
 0x252   : > { %v4869_v0 = vpop.permute.xlu1 %1564  ;;  %v1386_v58 = vrot.slane %v1204_v57, %v6705_v10  ;;  %v1247_v29 = vmul.f32 %v4949_v7, %v4645_v46  ;;  %v4993_v10 = vld [vmem:[%s6364_s11 + $0x8] sm:$0xff] }
 0x253   : > { %6700 = vst [vmem:[#allocation14_spill] sm:$0xff] %v4869_v0  ;;  %v4946_v53 = vpop.permute.xlu0 %1726  ;;  %v1220_v32 = vmul.f32 %v4944_v44, %v4633_v39  ;;  %6727 = vst [vmem:[#allocation55_spill] sm:$0xff] %v4993_v10  ;;  %v1360_v39 = vmul.f32 %v4959_v31, %v4719_v40  ;;  %2351 = vperm.xlu0 %3767, %v4993_v10  }
 0x254   : > { %6722 = vst [vmem:[#allocation52_spill] sm:$0xff] %v4946_v53  ;;  %v1372_v53 = vrot.slane %v1204_v57, %v6704_v23  ;;  %v1388_v40 = vmul.f32 %v1386_v58, %v4759_v30 }
 0x257   : > { %v4889_v0 = vpop.permute.xlu1 %1574  ;;  %3776 = vset.pattern.permute.xlu0 %v6674_v16 }
 0x258   : > { %6706 = vst [vmem:[#allocation10_spill] sm:$0xff] %v4889_v0  ;;  %v1288_v0 = vrot.slane %v1203_v4, %v6714_v60  ;;  %v1344_v4 = vrot.slane %v1204_v57, %v6703_v61  ;;  %v4997_v46 = vpop.permute.xlu0 %1240  ;;  %2393 = vperm.xlu0 %3776, %v4993_v10  }
 0x25a   : > { %v1290_v47 = vmul.f32 %v1288_v0, %v6724_v17  ;;  %v1289_v52 = vmul.f32 %v1288_v0, %v4671_v55  ;;  %v4970_v17 = vrot.slane %v4600_v48, %v6704_v23  ;;  %v1400_v0 = vrot.slane %v1204_v57, %v6714_v60 }
 0x25b   : > { %v1303_v23 = vmul.f32 %v1302_v38, %v4677_v27  ;;  %v4988_v48 = vadd.f32 %v1318_v35, %v1304_v51  ;;  %v1414_v35 = vrot.slane %v1204_v57, %v6709_v19  ;;  %v1428_v51 = vrot.slane %v1204_v57, %v6712_v25  ;;  %v6753_v25 = vld [vmem:[#allocation11_spill] sm:$0xff] }
 0x25c   : > { %v4952_v1 = vpop.permute.xlu1 %1588  ;;  %v4985_v55 = vadd.f32 %v1290_v47, %v1276_v6  ;;  %v1345_v47 = vmul.f32 %v1344_v4, %v4709_v45  ;;  %v1374_v6 = vmul.f32 %v1372_v53, %v4570_v18  ;;  %v1317_v27 = vmul.f32 %v1316_v28, %v4813_v22  ;;  %v6731_v22 = vld [vmem:[#allocation18_spill] sm:$0xff] }
 0x25d   : > { %6723 = vst [vmem:[#allocation53_spill] sm:$0xff] %v4952_v1  ;;  %v1234_v1 = vmul.f32 %v1232_v41, %v4639_v42  ;;  %v1261_v42 = vmul.f32 %v1260_v50, %v4651_v62  ;;  %6726 = vst [vmem:[#allocation54_spill] sm:$0xff] %v4988_v48  ;;  %v1331_v62 = vmul.f32 %v4963_v21, %v4698_v56 }
 0x25e   : > { %6725 = vst [vmem:[#allocation38_spill] sm:$0xff] %v4985_v55  ;;  %v5008_v38 = vmul.f32 %v1260_v50, %v4658_v54  ;;  %v1402_v60 = vmul.f32 %v1400_v0, %v4773_v14  ;;  %v1429_v18 = vmul.f32 %v1428_v51, %v4788_v8  ;;  %v1275_v48 = vmul.f32 %v1274_v59, %v4794_v34  ;;  %v6755_v55 = vld [vmem:[#allocation25_spill] sm:$0xff] }
 0x25f   : > { %v5012_v56 = vadd.f32 %v1234_v1, %v1220_v32  ;;  %v5014_v45 = vadd.f32 %v1261_v42, %v1247_v29  ;;  %v1430_v19 = vmul.f32 %v1428_v51, %v4796_v63  ;;  %v1387_v57 = vmul.f32 %v1386_v58, %v4739_v33  ;;  %v6729_v63 = vld [vmem:[#allocation13_spill] sm:$0xff]  ;;  %v6735_v42 = vld [vmem:[#allocation16_spill] sm:$0xff] }
 0x260   : > { %v4982_v61 = vpop.permute.xlu1 %1592  ;;  %v1373_v50 = vmul.f32 %v1372_v53, %v4727_v15  ;;  %v5024_v54 = vmul.f32 %v1344_v4, %v4714_v43  ;;  %v5026_v30 = vadd.f32 %v1345_v47, %v1331_v62  ;;  %v5028_v1 = vadd.f32 %v1374_v6, %v1360_v39  ;;  %v6736_v39 = vld [vmem:[#allocation7_spill] sm:$0xff]  ;;  %v6738_v6 = vld [vmem:[#allocation37_spill] sm:$0xff] }
 0x261   : > { %v1416_v32 = vmul.f32 %v1414_v35, %v4764_v26  ;;  %v1233_v59 = vmul.f32 %v1232_v41, %v4771_v13  ;;  %v1415_v14 = vmul.f32 %v1414_v35, %v4780_v3  ;;  %v1663_v33 = vadd.f32 %v1317_v27, %v1303_v23  ;;  %v5045_v26 = vpop.permute.xlu0 %1772  ;;  %v6740_v51 = vld [vmem:[#allocation49_spill] sm:$0xff] }
 0x262   : > { %v5035_v8 = vadd.f32 %v1402_v60, %v1388_v40  ;;  %v5039_v53 = vmul.f32 %v4879_v9, %v4778_v36  ;;  %v1487_v43 = vmul.f32 %v4883_v5, %v4786_v20  ;;  %v1473_v15 = vmul.f32 %v4901_v49, %v4815_v24  ;;  %6728 = vst [vmem:[#allocation56_spill] sm:$0xff] %v5045_v26  ;;  %v6730_v36 = vld [vmem:[#allocation40_spill] sm:$0xff]  ;;  %v6732_v20 = vld [vmem:[#allocation26_spill] sm:$0xff]  ;;  %v6752_v26 = vld [vmem:[#allocation17_spill] sm:$0xff] }
 0x263   : > { %v1671_v13 = vadd.f32 %v1429_v18, %v1415_v14  ;;  %v1661_v34 = vadd.f32 %v1289_v52, %v1275_v48  ;;  %v5047_v3 = vadd.f32 %v1430_v19, %v1416_v32  ;;  %v1502_v23 = vmul.f32 %v4887_v37, %v4800_v12  ;;  %v6733_v24 = vld [vmem:[#allocation8_spill] sm:$0xff]  ;;  %v6743_v32 = vld [vmem:[#allocation5_spill] sm:$0xff] }
 0x264   : > { %v5053_v41 = vmul.f32 %v6729_v63, %v4802_v11  ;;  %v1529_v29 = vmul.f32 %v6731_v22, %v6730_v36  ;;  %v1219_v60 = vmul.f32 %v4944_v44, %v6732_v20  ;;  %v1445_v4 = vmul.f32 %v6729_v63, %v6733_v24  ;;  %v6734_v48 = vld [vmem:[#allocation28_spill] sm:$0xff]  ;;  %v6739_v44 = vld [vmem:[#allocation45_spill] sm:$0xff]  ;;  %v6748_v63 = vld [vmem:[#allocation51_spill] sm:$0xff] }
 0x265   : > { %v5020_v28 = vpop.permute.xlu1 %1606  ;;  %v1459_v19 = vmul.f32 %v4879_v9, %v6734_v48  ;;  %v1691_v52 = vadd.f32 %v1663_v33, %v1661_v34  ;;  %v1359_v12 = vmul.f32 %v4959_v31, %v6735_v42  ;;  %v1401_v11 = vmul.f32 %v1400_v0, %v6736_v39  ;;  %v6741_v40 = vld [vmem:[#allocation53_spill] sm:$0xff]  ;;  %v6742_v9 = vld [vmem:[#allocation46_spill] sm:$0xff]  ;;  %v6744_v31 = vld [vmem:[#allocation12_spill] sm:$0xff]  ;;  %v1325_v39 = vpop.permute.xlu0 %1324 }
 0x266   : > { %v6737_v62 = vmov 11   ;;  %v1675_v47 = vadd.f32 %v1487_v43, %v1473_v15  ;;  %v1474_v35 = vmul.f32 %v4901_v49, %v6738_v6  ;;  %v1543_v27 = vmul.f32 %v6740_v51, %v6739_v44  ;;  %v6745_v33 = vld [vmem:[#allocation20_spill] sm:$0xff]  ;;  %v6746_v34 = vld [vmem:[#allocation47_spill] sm:$0xff]  ;;  %v6749_v24 = vld [vmem:[#allocation10_spill] sm:$0xff] }
 0x267   : > { %3780 = vset.pattern.permute.xlu0 %v6737_v62  ;;  %v1599_v18 = vmul.f32 %v4970_v17, %v6741_v40  ;;  %v1571_v14 = vmul.f32 %v6743_v32, %v6742_v9  ;;  %v1488_v0 = vmul.f32 %v4883_v5, %v6744_v31  ;;  %v1515_v43 = vmul.f32 %v6746_v34, %v6745_v33  ;;  %v6747_v15 = vld [vmem:[#allocation27_spill] sm:$0xff]  ;;  %v6750_v48 = vld [vmem:[#allocation48_spill] sm:$0xff]  ;;  %v6754_v5 = vld [vmem:[#allocation9_spill] sm:$0xff] }
 0x268   : > { %2435 = vperm.xlu0 %3780, %v4993_v10   ;;  %v1557_v49 = vmul.f32 %v6748_v63, %v6747_v15  ;;  %v1657_v36 = vadd.f32 %v1233_v59, %v1219_v60  ;;  %v1673_v20 = vadd.f32 %v1459_v19, %v1445_v4  ;;  %v1585_v42 = vmul.f32 %v6750_v48, %v6749_v24  ;;  %v6751_v6 = vld [vmem:[#allocation19_spill] sm:$0xff]  ;;  %v6756_v15 = vld [vmem:[#allocation50_spill] sm:$0xff] }
 0x269   : > { %v1667_v40 = vadd.f32 %v1373_v50, %v1359_v12  ;;  %v1501_v9 = vmul.f32 %v4887_v37, %v6752_v26  ;;  %v1613_v31 = vmul.f32 %v6754_v5, %v6753_v25  ;;  %v1669_v62 = vadd.f32 %v1401_v11, %v1387_v57 }
 0x26a   : > { %v1617_v58 = vpop.permute.xlu1 %1616  ;;  %v1679_v16 = vadd.f32 %v1543_v27, %v1529_v29  ;;  %v1655_v59 = vmul.f32 %v6756_v15, %v6755_v55  ;;  %v1683_v60 = vadd.f32 %v1599_v18, %v1585_v42  ;;  %v6757_v19 = vmov 14   ;;  %v6759_v55 = vld [vmem:[#allocation44_spill] sm:$0xff]  ;;  %v6760_v18 = vld [vmem:[#allocation6_spill] sm:$0xff] }
 0x26b   : > { %v1627_v44 = vmul.f32 %v6751_v6, %v1617_v58  ;;  %v1677_v24 = vadd.f32 %v1515_v43, %v1501_v9  ;;  %v6758_v58 = vld [vmem:[#allocation21_spill] sm:$0xff]  ;;  %v1681_v12 = vadd.f32 %v1571_v14, %v1557_v49  ;;  %v1332_v37 = vmul.f32 %v4963_v21, %v1325_v39 }
 0x26c   : > { %3784 = vset.pattern.permute.xlu0 %v6757_v19  ;;  %v1530_v50 = vmul.f32 %v6731_v22, %v6758_v58  ;;  %v1697_v25 = vadd.f32 %v1675_v47, %v1673_v20  ;;  %v1689_v57 = vadd.f32 %v5014_v45, %v1657_v36  ;;  %v1544_v11 = vmul.f32 %v6740_v51, %v6759_v55  ;;  %v6761_v47 = vld [vmem:[#allocation24_spill] sm:$0xff]  ;;  %v6768_v58 = vld [vmem:[#allocation54_spill] sm:$0xff] }
 0x26d   : > { %2477 = vperm.xlu0 %3784, %v4993_v10   ;;  %v1685_v26 = vadd.f32 %v1627_v44, %v1613_v31  ;;  %v1676_v27 = vadd.f32 %v1488_v0, %v1474_v35  ;;  %v1516_v43 = vmul.f32 %v6746_v34, %v6760_v18  ;;  %v1248_v22 = vmul.f32 %v4949_v7, %v4997_v46  ;;  %v6772_v18 = vld [vmem:[#allocation52_spill] sm:$0xff] }
 0x26e   : > { %v1695_v49 = vadd.f32 %v1671_v13, %v1669_v62  ;;  %v1699_v21 = vadd.f32 %v1679_v16, %v1677_v24  ;;  %v1701_v42 = vadd.f32 %v1683_v60, %v1681_v12  ;;  %v1586_v45 = vmul.f32 %v6750_v48, %v6761_v47  ;;  %v6763_v16 = vld [vmem:[#allocation14_spill] sm:$0xff] }
 0x26f   : > { %v1631_v33 = vpop.permute.xlu1 %1630  ;;  %v1600_v36 = vmul.f32 %v4970_v17, %v4982_v61  ;;  %v1693_v51 = vadd.f32 %v1667_v40, %v5026_v30  ;;  %v1666_v35 = vadd.f32 %v5024_v54, %v1332_v37  ;;  %v6762_v0 = vmov 1   ;;  %v6764_v61 = vld [vmem:[#allocation15_spill] sm:$0xff]  ;;  %v6765_v30 = vld [vmem:[#allocation41_spill] sm:$0xff] }
 0x270   : > { %v1641_v4 = vmul.f32 %v4974_v2, %v1631_v33  ;;  %v1680_v34 = vadd.f32 %v1544_v11, %v1530_v50  ;;  %v1709_v20 = vadd.f32 %v1699_v21, %v1697_v25  ;;  %v1705_v7 = vadd.f32 %v1691_v52, %v1689_v57  ;;  %v5150_v11 = vld [vmem:[%s6364_s11 + $0x10] sm:$0xff]  ;;  %v6776_v21 = vld [vmem:[#allocation39_spill] sm:$0xff] }
 0x271   : > { %3785 = vset.pattern.permute.xlu0 %v6762_v0  ;;  %v1678_v13 = vadd.f32 %v1516_v43, %v1502_v23  ;;  %v1572_v62 = vmul.f32 %v6743_v32, %v6763_v16  ;;  %v1660_v44 = vadd.f32 %v5008_v38, %v1248_v22  ;;  %v1614_v48 = vmul.f32 %v6754_v5, %v5020_v28  ;;  %v5123_v23 = vld [vmem:[%s6364_s11] sm:$0xff] }
 0x272   : > { %v1687_v29 = vadd.f32 %v1655_v59, %v1641_v4  ;;  %v1628_v17 = vmul.f32 %v6751_v6, %v6764_v61  ;;  %v1558_v54 = vmul.f32 %v6748_v63, %v6765_v30  ;;  %v1707_v40 = vadd.f32 %v1695_v49, %v1693_v51  ;;  %6766 = vst [vmem:[#allocation13_spill] sm:$0xff] %v5123_v23 }
 0x273   : > { %v1635_v14 = vpop.permute.xlu1 %1634  ;;  %v1684_v52 = vadd.f32 %v1600_v36, %v1586_v45  ;;  %v1694_v38 = vadd.f32 %v5028_v1, %v1666_v35  ;;  %2291 = vperm.xlu0 %3785, %v5123_v23   ;;  %v1696_v63 = vadd.f32 %v5047_v3, %v5035_v8  ;;  %v1674_v6 = vadd.f32 %v5039_v53, %v5053_v41  ;;  %v6767_v1 = vld [vmem:[#allocation38_spill] sm:$0xff] }
 0x274   : > { %v1703_v39 = vadd.f32 %v1687_v29, %v1685_v26  ;;  %v1642_v32 = vmul.f32 %v4974_v2, %v1635_v14  ;;  %v1700_v5 = vadd.f32 %v1680_v34, %v1678_v13  ;;  %v1713_v33 = vadd.f32 %v1707_v40, %v1705_v7  ;;  %6771 = vst [vmem:[#allocation18_spill] sm:$0xff] %v5150_v11  ;;  %v6774_v14 = vld [vmem:[#allocation32_spill] sm:$0xff]  ;;  %v6788_v13 = vld [vmem:[#allocation22_spill] sm:$0xff] }
 0x275   : > { %v1682_v59 = vadd.f32 %v1572_v62, %v1558_v54  ;;  %v1690_v60 = vadd.f32 %v1660_v44, %v5012_v56  ;;  %v1686_v4 = vadd.f32 %v1628_v17, %v1614_v48  ;;  %v1692_v2 = vadd.f32 %v6768_v58, %v6767_v1  ;;  %v567_v1 = vld [vmem:[%s6363_s10] sm:$0xff] }
 0x276   : > { %v1711_v46 = vadd.f32 %v1703_v39, %v1701_v42  ;;  %v1698_v8 = vadd.f32 %v1676_v27, %v1674_v6  ;;  %v1708_v12 = vadd.f32 %v1696_v63, %v1694_v38  ;;  %v6770_v55 = vmov 3  }
 0x277   : > { %v1702_v3 = vadd.f32 %v1684_v52, %v1682_v59  ;;  %v1706_v25 = vadd.f32 %v1692_v2, %v1690_v60  ;;  %v6773_v22 = vmov 4   ;;  %v6775_v49 = vmov 5   ;;  %v574_v60 = vld [vmem:[%s6365_s12 + $0x8] sm:$0xff] }
 0x278   : > { %v1715_v9 = vadd.f32 %v1711_v46, %v1709_v20  ;;  %v1649_v31 = vpop.permute.xlu1 %1648  ;;  %v1710_v56 = vadd.f32 %v1700_v5, %v1698_v8  ;;  %v6777_v42 = vmov 6   ;;  %v6778_v39 = vmov 7   ;;  %v6787_v46 = vld [vmem:[#allocation43_spill] sm:$0xff] }
 0x279   : > { %v1656_v28 = vmul.f32 %v6756_v15, %v1649_v31  ;;  %v5139_v15 = vld [vmem:[%s6364_s11 + $0x18] sm:$0xff]  ;;  %v1714_v26 = vadd.f32 %v1708_v12, %v1706_v25  ;;  %v6779_v47 = vmov 9   ;;  %v6780_v45 = vmov 8  }
 0x27a   : > { %v1717_v50 = vadd.f32 %v1715_v9, %v1713_v33  ;;  %6769 = vst [vmem:[#allocation40_spill] sm:$0xff] %v5139_v15  ;;  %2521 = vperm.xlu0 %3785, %v5139_v15   ;;  %v6781_v36 = vmov 10   ;;  %v6782_v51 = vmov 12   ;;  %v6783_v35 = vmov 13  }
 0x27b   : > { %v1688_v24 = vadd.f32 %v1656_v28, %v1642_v32  ;;  %v6784_v34 = vmov 11   ;;  %v6785_v20 = vmov 15   ;;  %v6786_v7 = vmov 0   ;;  %v5260_v32 = vpop.permute.xlu0 %1856 }
 0x27c   : > { %v6789_v16 = vmov 2  }
 0x27d   : > { %v1704_v53 = vadd.f32 %v1688_v24, %v1686_v4  ;;  %v1722_v41 = vpop.permute.xlu1 %1721 }
 0x27e   : > { %v5142_v37 = vadd.f32 %v1722_v41, %v1717_v50  ;;  %3790 = vset.pattern.permute.xlu0 %v6770_v55 }
 0x27f   : > { %v1712_v57 = vadd.f32 %v1704_v53, %v1702_v3  ;;  %2545 = vperm.xlu0 %3790, %v5150_v11   ;;  %v5269_v6 = vpop.permute.xlu0 %1898 }
 0x280   : > { %1731 = vrot.lane.b32.xlu1 %v5142_v37, %s3903_s16 }
 0x281   : > { %v1716_v29 = vadd.f32 %v1712_v57, %v1710_v56  ;;  %v5215_v62 = vpop.permute.xlu1 %1744 }
 0x283   : > { %v1718_v27 = vadd.f32 %v1716_v29, %v1714_v26  ;;  %3791 = vset.pattern.permute.xlu0 %v6773_v22  ;;  %v5276_v33 = vpop.permute.xlu0 %1940 }
 0x284   : > { %2333 = vperm.xlu0 %3791, %v5123_v23  }
 0x285   : > { %v5154_v43 = vadd.f32 %v6772_v18, %v1718_v27 }
 0x286   : > { %v5218_v44 = vpop.permute.xlu1 %1758 }
 0x287   : > { %1733 = vrot.lane.b32.xlu1 %v5154_v43, %s3903_s16  ;;  %v5284_v4 = vpop.permute.xlu0 %1754 }
 0x288   : > { %2563 = vperm.xlu0 %3791, %v5139_v15  }
 0x28b   : > { %1800 = vperm.xlu1 %3725, %v6774_v14   ;;  %v5223_v48 = vpop.permute.xlu1 %1768  ;;  %v1985_v58 = vpop.permute.xlu0 %1984 }
 0x28c   : > { %3795 = vset.pattern.permute.xlu0 %v6777_v42 }
 0x28d   : > { %2587 = vperm.xlu0 %3795, %v5150_v11  }
 0x28f   : > { %3726 = vset.pattern.permute.xlu1 %v6775_v49  ;;  %v2009_v8 = vpop.permute.xlu0 %2008 }
 0x290   : > { %1810 = vperm.xlu1 %3726, %v6776_v21   ;;  %v5227_v61 = vpop.permute.xlu1 %1782 }
 0x291   : > { %3796 = vset.pattern.permute.xlu0 %v6778_v39 }
 0x292   : > { %2375 = vperm.xlu0 %3796, %v5123_v23  }
 0x293   : > { %v5302_v12 = vpop.permute.xlu0 %1796 }
 0x294   : > { %3727 = vset.pattern.permute.xlu1 %v6777_v42  ;;  %v5230_v17 = vpop.permute.xlu1 %1786 }
 0x295   : > { %1824 = vperm.xlu1 %3727, %v6776_v21  }
 0x296   : > { %2605 = vperm.xlu0 %3796, %v5139_v15  }
 0x297   : > { %v2027_v41 = vpop.permute.xlu0 %2026 }
 0x299   : > { %1828 = vperm.xlu1 %3727, %v6774_v14  }
 0x29a   : > { %3800 = vset.pattern.permute.xlu0 %v6779_v47 }
 0x29b   : > { %2629 = vperm.xlu0 %3800, %v5150_v11   ;;  %v2051_v57 = vpop.permute.xlu0 %2050 }
 0x29d   : > { %3728 = vset.pattern.permute.xlu1 %v6778_v39 }
 0x29e   : > { %1842 = vperm.xlu1 %3728, %v6774_v14  }
 0x29f   : > { %3801 = vset.pattern.permute.xlu0 %v6781_v36  ;;  %v5312_v29 = vpop.permute.xlu0 %1838 }
 0x2a0   : > { %2417 = vperm.xlu0 %3801, %v5123_v23  }
 0x2a2   : > { %3729 = vset.pattern.permute.xlu1 %v6780_v45 }
 0x2a3   : > { %1852 = vperm.xlu1 %3729, %v6776_v21   ;;  %v2069_v18 = vpop.permute.xlu0 %2068 }
 0x2a4   : > { %2647 = vperm.xlu0 %3801, %v5139_v15  }
 0x2a7   : > { %3730 = vset.pattern.permute.xlu1 %v6779_v47 }
 0x2a8   : > { %1866 = vperm.xlu1 %3730, %v6776_v21   ;;  %3805 = vset.pattern.permute.xlu0 %v6782_v51 }
 0x2a9   : > { %2671 = vperm.xlu0 %3805, %v5150_v11  }
 0x2ac   : > { %1870 = vperm.xlu1 %3730, %v6774_v14  }
 0x2ad   : > { %3806 = vset.pattern.permute.xlu0 %v6783_v35 }
 0x2ae   : > { %2459 = vperm.xlu0 %3806, %v5123_v23  }
 0x2b0   : > { %3731 = vset.pattern.permute.xlu1 %v6781_v36 }
 0x2b1   : > { %1884 = vperm.xlu1 %3731, %v6774_v14  }
 0x2b2   : > { %2689 = vperm.xlu0 %3806, %v5139_v15  }
 0x2b5   : > { %3732 = vset.pattern.permute.xlu1 %v6784_v34 }
 0x2b6   : > { %1894 = vperm.xlu1 %3732, %v6776_v21   ;;  %3810 = vset.pattern.permute.xlu0 %v6785_v20 }
 0x2b7   : > { %2713 = vperm.xlu0 %3810, %v5150_v11  }
 0x2ba   : > { %3734 = vset.pattern.permute.xlu1 %v6782_v51 }
 0x2bb   : > { %1908 = vperm.xlu1 %3734, %v6776_v21   ;;  %3811 = vset.pattern.permute.xlu0 %v6786_v7 }
 0x2bc   : > { %2276 = vperm.xlu0 %3811, %v5123_v23  }
 0x2bf   : > { %1912 = vperm.xlu1 %3734, %v6774_v14  }
 0x2c0   : > { %2502 = vperm.xlu0 %3811, %v5150_v11  }
 0x2c3   : > { %3735 = vset.pattern.permute.xlu1 %v6783_v35 }
 0x2c4   : > { %1926 = vperm.xlu1 %3735, %v6774_v14   ;;  %2795 = vperm.xlu0 %3811, %v574_v60  }
 0x2c8   : > { %3736 = vset.pattern.permute.xlu1 %v6757_v19  ;;  %3814 = vset.pattern.permute.xlu0 %v6789_v16 }
 0x2c9   : > { %1936 = vperm.xlu1 %3736, %v6776_v21   ;;  %2309 = vperm.xlu0 %3814, %v4993_v10   ;;  %v6811_v10 = vld [vmem:[#allocation29_spill] sm:$0xff] }
 0x2cd   : > { %3739 = vset.pattern.permute.xlu1 %v6785_v20 }
 0x2ce   : > { %1950 = vperm.xlu1 %3739, %v6776_v21   ;;  %v2093_v21 = vpop.permute.xlu0 %2092 }
 0x2d2   : > { %1954 = vperm.xlu1 %3739, %v6774_v14   ;;  %v5322_v60 = vpop.permute.xlu0 %1880 }
 0x2d6   : > { %3740 = vset.pattern.permute.xlu1 %v6786_v7  ;;  %v2111_v11 = vpop.permute.xlu0 %2110 }
 0x2d7   : > { %1970 = vperm.xlu1 %3740, %v6787_v46  }
 0x2db   : > { %3741 = vset.pattern.permute.xlu1 %v6762_v0  ;;  %v5348_v0 = vrot.slane %v5142_v37, %v6811_v10 }
 0x2dc   : > { %1980 = vperm.xlu1 %3741, %v6788_v13  }
 0x2dd   : > { %6812 = vst [vmem:[#allocation11_spill] sm:$0xff] %v5348_v0 }
 0x2e0   : > { %3742 = vset.pattern.permute.xlu1 %v6789_v16  ;;  %v6809_v16 = vld [vmem:[#allocation30_spill] sm:$0xff] }
 0x2e1   : > { %1994 = vperm.xlu1 %3742, %v6788_v13  }
 0x2e5   : > { %1998 = vperm.xlu1 %3742, %v6787_v46  }
 0x2e9   : > { %3745 = vset.pattern.permute.xlu1 %v6770_v55 }
 0x2ea   : > { %2012 = vperm.xlu1 %3745, %v6787_v46  }
 0x2ee   : > { %3746 = vset.pattern.permute.xlu1 %v6773_v22  ;;  %v5344_v22 = vrot.slane %v5142_v37, %v6809_v16 }
 0x2ef   : > { %2022 = vperm.xlu1 %3746, %v6788_v13  }
 0x2f0   : > { %6810 = vst [vmem:[#allocation17_spill] sm:$0xff] %v5344_v22 }
 0x2f2   : > { %v5235_v30 = vpop.permute.xlu1 %1731 }
 0x2f3   : > { %3747 = vset.pattern.permute.xlu1 %v6775_v49  ;;  %v6815_v49 = vld [vmem:[#allocation35_spill] sm:$0xff] }
 0x2f4   : > { %2036 = vperm.xlu1 %3747, %v6788_v13  }
 0x2f8   : > { %2040 = vperm.xlu1 %3747, %v6787_v46  }
 0x2f9   : > { %v5238_v54 = vpop.permute.xlu1 %1733 }
 0x2fc   : > { %3750 = vset.pattern.permute.xlu1 %v6777_v42 }
 0x2fd   : > { %2054 = vperm.xlu1 %3750, %v6787_v46  }
 0x301   : > { %3751 = vset.pattern.permute.xlu1 %v6778_v39 }
 0x302   : > { %2064 = vperm.xlu1 %3751, %v6788_v13  }
 0x306   : > { %3752 = vset.pattern.permute.xlu1 %v6780_v45 }
 0x307   : > { %2078 = vperm.xlu1 %3752, %v6788_v13  }
 0x30a   : > { %v5242_v40 = vpop.permute.xlu1 %1800 }
 0x30b   : > { %2082 = vperm.xlu1 %3752, %v6787_v46  }
 0x30f   : > { %3755 = vset.pattern.permute.xlu1 %v6779_v47  ;;  %v5246_v9 = vpop.permute.xlu1 %1810 }
 0x310   : > { %2096 = vperm.xlu1 %3755, %v6787_v46  }
 0x314   : > { %3756 = vset.pattern.permute.xlu1 %v6781_v36  ;;  %v5250_v31 = vpop.permute.xlu1 %1824 }
 0x315   : > { %2106 = vperm.xlu1 %3756, %v6788_v13  }
 0x318   : > { %v5253_v52 = vpop.permute.xlu1 %1828 }
 0x319   : > { %3757 = vset.pattern.permute.xlu1 %v6784_v34 }
 0x31a   : > { %2120 = vperm.xlu1 %3757, %v6788_v13  }
 0x31d   : > { %v5257_v38 = vpop.permute.xlu1 %1842 }
 0x31e   : > { %2124 = vperm.xlu1 %3757, %v6787_v46  }
 0x322   : > { %3760 = vset.pattern.permute.xlu1 %v6782_v51  ;;  %v5263_v28 = vpop.permute.xlu1 %1852 }
 0x323   : > { %2138 = vperm.xlu1 %3760, %v6787_v46  }
 0x327   : > { %3761 = vset.pattern.permute.xlu1 %v6783_v35  ;;  %v5267_v63 = vpop.permute.xlu1 %1866 }
 0x328   : > { %2148 = vperm.xlu1 %3761, %v6788_v13  }
 0x32b   : > { %v5272_v5 = vpop.permute.xlu1 %1870 }
 0x32c   : > { %6790 = vst [vmem:[#allocation26_spill] sm:$0xff] %v5272_v5  ;;  %3762 = vset.pattern.permute.xlu1 %v6757_v19  ;;  %v6813_v19 = vld [vmem:[#allocation31_spill] sm:$0xff]  ;;  %v5376_v5 = vmul.f32 %v5344_v22, %v2009_v8  ;;  %v5417_v22 = vrot.slane %v5154_v43, %v6809_v16 }
 0x32d   : > { %2162 = vperm.xlu1 %3762, %v6788_v13   ;;  %v5352_v45 = vrot.slane %v5142_v37, %v6813_v19  ;;  %v5398_v8 = vrot.slane %v5154_v43, %v6813_v19 }
 0x32e   : > { %6823 = vst [vmem:[#allocation44_spill] sm:$0xff] %v5376_v5  ;;  %6833 = vst [vmem:[#allocation32_spill] sm:$0xff] %v5417_v22 }
 0x32f   : > { %6814 = vst [vmem:[#allocation9_spill] sm:$0xff] %v5352_v45  ;;  %6829 = vst [vmem:[#allocation41_spill] sm:$0xff] %v5398_v8 }
 0x330   : > { %v5278_v59 = vpop.permute.xlu1 %1884 }
 0x331   : > { %6791 = vst [vmem:[#allocation8_spill] sm:$0xff] %v5278_v59  ;;  %2166 = vperm.xlu1 %3762, %v6787_v46   ;;  %v6821_v59 = vld [vmem:[#allocation33_spill] sm:$0xff] }
 0x335   : > { %3765 = vset.pattern.permute.xlu1 %v6785_v20  ;;  %v5287_v24 = vpop.permute.xlu1 %1894 }
 0x336   : > { %2180 = vperm.xlu1 %3765, %v6787_v46  }
 0x33a   : > { %3766 = vset.pattern.permute.xlu1 %v6786_v7  ;;  %v5296_v2 = vpop.permute.xlu1 %1908  ;;  %v2135_v7 = vpop.permute.xlu0 %2134 }
 0x33b   : > { %6792 = vst [vmem:[#allocation28_spill] sm:$0xff] %v5296_v2  ;;  %2253 = vperm.xlu1 %3766, %v567_v1  }
 0x33e   : > { %v5298_v50 = vpop.permute.xlu1 %1912  ;;  %v5330_v20 = vpop.permute.xlu0 %1922 }
 0x33f   : > { %6793 = vst [vmem:[#allocation16_spill] sm:$0xff] %v5298_v50 }
 0x342   : > { %v2153_v36 = vpop.permute.xlu0 %2152 }
 0x343   : > { %v5300_v3 = vpop.permute.xlu1 %1926 }
 0x344   : > { %6794 = vst [vmem:[#allocation7_spill] sm:$0xff] %v5300_v3  ;;  %v1735_v3 = vsel %vm1198_vm1, %v5235_v30, 0.0  ;;  %v5390_v30 = vrot.slane %v5154_v43, %v6811_v10 }
 0x345   : > { %v1764_v5 = vrot.slane %v1735_v3, %v6811_v10  ;;  %v1834_v22 = vrot.slane %v1735_v3, %v6815_v49 }
 0x346   : > { %v2177_v39 = vpop.permute.xlu0 %2176  ;;  %6828 = vst [vmem:[#allocation15_spill] sm:$0xff] %v5390_v30 }
 0x348   : > { %v5304_v53 = vpop.permute.xlu1 %1936 }
 0x349   : > { %6795 = vst [vmem:[#allocation37_spill] sm:$0xff] %v5304_v53  ;;  %v5437_v53 = vmul.f32 %v5390_v30, %v2093_v21  ;;  %v1736_v21 = vsel %vm1198_vm1, %v5238_v54, 0.0 }
 0x34a   : > { %v1740_v55 = vpop.permute.xlu0 %1739 }
 0x34d   : > { %v5306_v56 = vpop.permute.xlu1 %1950 }
 0x351   : > { %v5308_v25 = vpop.permute.xlu1 %1954 }
 0x352   : > { %6796 = vst [vmem:[#allocation45_spill] sm:$0xff] %v5308_v25  ;;  %v5373_v25 = vrot.slane %v5142_v37, %v6821_v59 }
 0x354   : > { %6822 = vst [vmem:[#allocation21_spill] sm:$0xff] %v5373_v25 }
 0x356   : > { %v5310_v26 = vpop.permute.xlu1 %1970 }
 0x357   : > { %6797 = vst [vmem:[#allocation49_spill] sm:$0xff] %v5310_v26 }
 0x35b   : > { %v5314_v27 = vpop.permute.xlu1 %1980 }
 0x35c   : > { %6798 = vst [vmem:[#allocation53_spill] sm:$0xff] %v5314_v27 }
 0x360   : > { %v5316_v14 = vpop.permute.xlu1 %1994 }
 0x361   : > { %6799 = vst [vmem:[#allocation46_spill] sm:$0xff] %v5316_v14 }
 0x364   : > { %v5318_v46 = vpop.permute.xlu1 %1998 }
 0x365   : > { %6800 = vst [vmem:[#allocation5_spill] sm:$0xff] %v5318_v46  ;;  %v5356_v46 = vrot.slane %v5142_v37, %v6815_v49 }
 0x367   : > { %6816 = vst [vmem:[#allocation25_spill] sm:$0xff] %v5356_v46  ;;  %v5429_v25 = vmul.f32 %v5356_v46, %v2051_v57 }
 0x369   : > { %v5320_v13 = vpop.permute.xlu1 %2012 }
 0x36a   : > { %6801 = vst [vmem:[#allocation12_spill] sm:$0xff] %v5320_v13  ;;  %v6819_v13 = vld [vmem:[#allocation4_spill] sm:$0xff] }
 0x36e   : > { %v5324_v1 = vpop.permute.xlu1 %2022 }
 0x36f   : > { %6802 = vst [vmem:[#allocation20_spill] sm:$0xff] %v5324_v1  ;;  %v6826_v1 = vld [vmem:[#allocation34_spill] sm:$0xff] }
 0x370   : > { %v5386_v27 = vrot.slane %v5142_v37, %v6826_v1  ;;  %v1820_v57 = vrot.slane %v1735_v3, %v6826_v1 }
 0x372   : > { %6827 = vst [vmem:[#allocation14_spill] sm:$0xff] %v5386_v27 }
 0x373   : > { %v5326_v15 = vpop.permute.xlu1 %2036 }
 0x374   : > { %6803 = vst [vmem:[#allocation47_spill] sm:$0xff] %v5326_v15  ;;  %v5394_v15 = vrot.slane %v5154_v43, %v6821_v59 }
 0x376   : > { %v5440_v2 = vmul.f32 %v5394_v15, %v2111_v11  ;;  %v1765_v11 = vmul.f32 %v1764_v5, %v5284_v4  ;;  %v6839_v4 = vld [vmem:[#allocation56_spill] sm:$0xff] }
 0x377   : > { %v5328_v34 = vpop.permute.xlu1 %2040 }
 0x378   : > { %6804 = vst [vmem:[#allocation27_spill] sm:$0xff] %v5328_v34  ;;  %6836 = vst [vmem:[#allocation22_spill] sm:$0xff] %v5440_v2  ;;  %v1821_v2 = vmul.f32 %v1820_v57, %v5246_v9  ;;  %v1862_v9 = vrot.slane %v1736_v21, %v6819_v13 }
 0x37c   : > { %v5332_v35 = vpop.permute.xlu1 %2054 }
 0x37d   : > { %6805 = vst [vmem:[#allocation51_spill] sm:$0xff] %v5332_v35  ;;  %v5366_v35 = vrot.slane %v5142_v37, %v6819_v13 }
 0x381   : > { %v5334_v51 = vpop.permute.xlu1 %2064 }
 0x386   : > { %v5336_v47 = vpop.permute.xlu1 %2078 }
 0x387   : > { %6806 = vst [vmem:[#allocation10_spill] sm:$0xff] %v5336_v47  ;;  %v5382_v47 = vmul.f32 %v5348_v0, %v1985_v58  ;;  %v5402_v58 = vrot.slane %v5154_v43, %v6826_v1  ;;  %v1792_v0 = vrot.slane %v1735_v3, %v6809_v16 }
 0x389   : > { %6825 = vst [vmem:[#allocation24_spill] sm:$0xff] %v5382_v47  ;;  %v1750_v47 = vrot.slane %v1735_v3, %v6819_v13 }
 0x38a   : > { %v5338_v42 = vpop.permute.xlu1 %2082 }
 0x38b   : > { %6807 = vst [vmem:[#allocation48_spill] sm:$0xff] %v5338_v42  ;;  %v1966_v42 = vpop.permute.xlu0 %1965  ;;  %v1751_v46 = vmul.f32 %v1750_v47, %v1740_v55  ;;  %v1766_v55 = vmul.f32 %v1764_v5, %v5218_v44 }
 0x38c   : > { %v5467_v54 = vmul.f32 %v5366_v35, %v1966_v42  ;;  %v1932_v42 = vrot.slane %v1736_v21, %v6826_v1  ;;  %v6859_v1 = vld [vmem:[#allocation7_spill] sm:$0xff] }
 0x38d   : > { %v2189_v44 = vadd.f32 %v1765_v11, %v1751_v46  ;;  %v5487_v46 = vmul.f32 %v1862_v9, %v5260_v32 }
 0x38f   : > { %v5340_v23 = vpop.permute.xlu1 %2096 }
 0x390   : > { %6808 = vst [vmem:[#allocation19_spill] sm:$0xff] %v5340_v23  ;;  %v6818_v23 = vld [vmem:[#allocation36_spill] sm:$0xff] }
 0x391   : > { %v5362_v34 = vrot.slane %v5142_v37, %v6818_v23  ;;  %v5406_v37 = vrot.slane %v5154_v43, %v6818_v23  ;;  %v1848_v14 = vrot.slane %v1735_v3, %v6818_v23  ;;  %v1960_v11 = vrot.slane %v1736_v21, %v6818_v23 }
 0x393   : > { %6830 = vst [vmem:[#allocation38_spill] sm:$0xff] %v5406_v37  ;;  %v5464_v50 = vmul.f32 %v5406_v37, %v2177_v39 }
 0x394   : > { %v5358_v26 = vpop.permute.xlu1 %2106 }
 0x395   : > { %6817 = vst [vmem:[#allocation50_spill] sm:$0xff] %v5358_v26  ;;  %v5379_v26 = vmul.f32 %v5352_v45, %v2027_v41  ;;  %v5408_v41 = vpop.permute.xlu0 %2258  ;;  %v1778_v45 = vrot.slane %v1735_v3, %v6821_v59 }
 0x396   : > { %6831 = vst [vmem:[#allocation54_spill] sm:$0xff] %v5408_v41  ;;  %v5426_v41 = vrot.slane %v5154_v43, %v6815_v49 }
 0x397   : > { %6824 = vst [vmem:[#allocation6_spill] sm:$0xff] %v5379_v26  ;;  %v5413_v26 = vrot.slane %v5154_v43, %v6819_v13  ;;  %v5446_v43 = vmul.f32 %v5402_v58, %v2153_v36  ;;  %v1793_v36 = vmul.f32 %v1792_v0, %v5227_v61 }
 0x399   : > { %6832 = vst [vmem:[#allocation52_spill] sm:$0xff] %v5413_v26  ;;  %v5422_v27 = vpop.permute.xlu1 %2120  ;;  %v5432_v26 = vmul.f32 %v5362_v34, %v2069_v18  ;;  %6837 = vst [vmem:[#allocation30_spill] sm:$0xff] %v5446_v43  ;;  %v1806_v18 = vrot.slane %v1735_v3, %v6813_v19  ;;  %v1815_v43 = vpop.permute.xlu0 %1814  ;;  %v1849_v3 = vmul.f32 %v1848_v14, %v5312_v29 }
 0x39a   : > { %6834 = vst [vmem:[#allocation39_spill] sm:$0xff] %v5422_v27  ;;  %v5443_v27 = vmul.f32 %v5398_v8, %v2135_v7  ;;  %v1779_v7 = vmul.f32 %v1778_v45, %v5223_v48  ;;  %v1780_v8 = vmul.f32 %v1778_v45, %v6839_v4  ;;  %v1794_v48 = vmul.f32 %v1792_v0, %v5230_v17  ;;  %v6842_v4 = vld [vmem:[#allocation46_spill] sm:$0xff] }
 0x39b   : > { %6835 = vst [vmem:[#allocation43_spill] sm:$0xff] %v5432_v26  ;;  %v1835_v26 = vmul.f32 %v1834_v22, %v5250_v31  ;;  %v1752_v31 = vmul.f32 %v1750_v47, %v5215_v62  ;;  %v1807_v61 = vmul.f32 %v1806_v18, %v5302_v12  ;;  %v1890_v29 = vrot.slane %v1736_v21, %v6821_v59 }
 0x39c   : > { %v1822_v47 = vmul.f32 %v1820_v57, %v1815_v43  ;;  %v1904_v62 = vrot.slane %v1736_v21, %v6809_v16  ;;  %v2191_v39 = vadd.f32 %v1793_v36, %v1779_v7  ;;  %v1946_v45 = vrot.slane %v1736_v21, %v6815_v49 }
 0x39d   : > { %v5454_v30 = vpop.permute.xlu1 %2124  ;;  %v2193_v5 = vadd.f32 %v1821_v2, %v1807_v61  ;;  %v5475_v37 = vadd.f32 %v1766_v55, %v1752_v31  ;;  %v1808_v17 = vmul.f32 %v1806_v18, %v5242_v40  ;;  %v5482_v12 = vadd.f32 %v1794_v48, %v1780_v8  ;;  %v6841_v55 = vld [vmem:[#allocation37_spill] sm:$0xff] }
 0x39e   : > { %6838 = vst [vmem:[#allocation29_spill] sm:$0xff] %v5454_v30  ;;  %v2195_v30 = vadd.f32 %v1849_v3, %v1835_v26  ;;  %v1876_v26 = vrot.slane %v1736_v21, %v6811_v10  ;;  %v1918_v43 = vrot.slane %v1736_v21, %v6813_v19  ;;  %v1891_v2 = vmul.f32 %v1890_v29, %v5322_v60 }
 0x39f   : > { %v1850_v7 = vmul.f32 %v1848_v14, %v5257_v38  ;;  %v1906_v40 = vmul.f32 %v1904_v62, %v5269_v6  ;;  %v2221_v8 = vadd.f32 %v2191_v39, %v2189_v44  ;;  %v1905_v18 = vmul.f32 %v1904_v62, %v5287_v24  ;;  %v6840_v6 = vld [vmem:[#allocation28_spill] sm:$0xff]  ;;  %v6845_v62 = vld [vmem:[#allocation14_spill] sm:$0xff]  ;;  %v6849_v39 = vld [vmem:[#allocation11_spill] sm:$0xff] }
 0x3a0   : > { %v2223_v57 = vadd.f32 %v2195_v30, %v2193_v5  ;;  %v1877_v36 = vmul.f32 %v1876_v26, %v5267_v63  ;;  %v1933_v3 = vmul.f32 %v1932_v42, %v5330_v20  ;;  %v1961_v30 = vmul.f32 %v1960_v11, %v5306_v56  ;;  %v6843_v20 = vld [vmem:[#allocation21_spill] sm:$0xff] }
 0x3a1   : > { %v1948_v32 = vmul.f32 %v1946_v45, %v5276_v33  ;;  %v5498_v31 = vadd.f32 %v1822_v47, %v1808_v17  ;;  %v1836_v60 = vmul.f32 %v1834_v22, %v5253_v52  ;;  %v1863_v21 = vmul.f32 %v1862_v9, %v5263_v28  ;;  %v6844_v47 = vld [vmem:[#allocation47_spill] sm:$0xff]  ;;  %v6847_v28 = vld [vmem:[#allocation32_spill] sm:$0xff] }
 0x3a2   : > { %v5479_v0 = vpop.permute.xlu1 %2138  ;;  %v2075_v38 = vmul.f32 %v5362_v34, %v5334_v51  ;;  %v1919_v14 = vmul.f32 %v1918_v43, %v6840_v6  ;;  %v1947_v24 = vmul.f32 %v1946_v45, %v6841_v55  ;;  %v2005_v48 = vmul.f32 %v6843_v20, %v6842_v4  ;;  %v6846_v52 = vld [vmem:[#allocation39_spill] sm:$0xff]  ;;  %v6848_v34 = vld [vmem:[#allocation53_spill] sm:$0xff]  ;;  %v6850_v17 = vld [vmem:[#allocation20_spill] sm:$0xff] }
 0x3a3   : > { %v5508_v56 = vadd.f32 %v2223_v57, %v2221_v8  ;;  %v2196_v33 = vadd.f32 %v1850_v7, %v1836_v60  ;;  %v2197_v61 = vadd.f32 %v1877_v36, %v1863_v21  ;;  %v2047_v22 = vmul.f32 %v6845_v62, %v6844_v47  ;;  %v6851_v45 = vld [vmem:[#allocation9_spill] sm:$0xff]  ;;  %v6852_v57 = vld [vmem:[#allocation10_spill] sm:$0xff]  ;;  %v6853_v8 = vld [vmem:[#allocation52_spill] sm:$0xff] }
 0x3a4   : > { %v2131_v9 = vmul.f32 %v6847_v28, %v6846_v52  ;;  %v2199_v44 = vadd.f32 %v1905_v18, %v1891_v2  ;;  %v2203_v51 = vadd.f32 %v1961_v30, %v1947_v24  ;;  %v1991_v5 = vmul.f32 %v6849_v39, %v6848_v34  ;;  %v6854_v36 = vld [vmem:[#allocation50_spill] sm:$0xff]  ;;  %v6856_v18 = vld [vmem:[#allocation45_spill] sm:$0xff]  ;;  %v6857_v24 = vld [vmem:[#allocation44_spill] sm:$0xff] }
 0x3a5   : > { %v2033_v6 = vmul.f32 %v6851_v45, %v6850_v17  ;;  %v2211_v55 = vadd.f32 %v2075_v38, %v5429_v25  ;;  %v2089_v7 = vmul.f32 %v6853_v8, %v6852_v57  ;;  %v2117_v60 = vmul.f32 %v5394_v15, %v6854_v36  ;;  %v6855_v4 = vld [vmem:[#allocation26_spill] sm:$0xff]  ;;  %v6858_v39 = vld [vmem:[#allocation8_spill] sm:$0xff] }
 0x3a6   : > { %v1878_v47 = vmul.f32 %v1876_v26, %v6855_v4  ;;  %v2201_v2 = vadd.f32 %v1933_v3, %v1919_v14  ;;  %v1962_v30 = vmul.f32 %v1960_v11, %v6856_v18  ;;  %v2207_v52 = vadd.f32 %v6857_v24, %v2005_v48  ;;  %v6860_v14 = vld [vmem:[#allocation16_spill] sm:$0xff]  ;;  %v6869_v24 = vld [vmem:[#allocation43_spill] sm:$0xff] }
 0x3a7   : > { %v2149_v63 = vpop.permute.xlu1 %2148  ;;  %v1892_v17 = vmul.f32 %v1890_v29, %v6858_v39  ;;  %v2209_v45 = vadd.f32 %v2047_v22, %v2033_v6  ;;  %v2215_v25 = vadd.f32 %v2131_v9, %v2117_v60  ;;  %v2225_v57 = vadd.f32 %v2199_v44, %v2197_v61  ;;  %v6861_v9 = vld [vmem:[#allocation51_spill] sm:$0xff]  ;;  %v6862_v6 = vld [vmem:[#allocation25_spill] sm:$0xff]  ;;  %v6863_v44 = vld [vmem:[#allocation12_spill] sm:$0xff] }
 0x3a8   : > { %v2159_v21 = vmul.f32 %v5402_v58, %v2149_v63  ;;  %v1934_v59 = vmul.f32 %v1932_v42, %v6859_v1  ;;  %v2227_v15 = vadd.f32 %v2203_v51, %v2201_v2  ;;  %v2205_v58 = vadd.f32 %v1991_v5, %v5467_v54  ;;  %v6864_v1 = vld [vmem:[#allocation17_spill] sm:$0xff]  ;;  %v6865_v51 = vld [vmem:[#allocation27_spill] sm:$0xff] }
 0x3a9   : > { %v2231_v63 = vadd.f32 %v2211_v55, %v2209_v45  ;;  %v2213_v26 = vadd.f32 %v5437_v53, %v2089_v7  ;;  %v1920_v48 = vmul.f32 %v1918_v43, %v6860_v14  ;;  %v2204_v29 = vadd.f32 %v1962_v30, %v1948_v32  ;;  %v6866_v7 = vld [vmem:[#allocation29_spill] sm:$0xff]  ;;  %v6873_v45 = vld [vmem:[#allocation6_spill] sm:$0xff] }
 0x3aa   : > { %v2217_v11 = vadd.f32 %v2159_v21, %v5443_v27  ;;  %v2229_v22 = vadd.f32 %v2207_v52, %v2205_v58  ;;  %v2062_v36 = vmul.f32 %v6862_v6, %v6861_v9  ;;  %v2020_v42 = vmul.f32 %v6864_v1, %v6863_v44  ;;  %v6867_v32 = vld [vmem:[#allocation49_spill] sm:$0xff]  ;;  %v6870_v52 = vld [vmem:[#allocation19_spill] sm:$0xff]  ;;  %v6879_v9 = vld [vmem:[#allocation30_spill] sm:$0xff] }
 0x3ab   : > { %v2048_v54 = vmul.f32 %v6845_v62, %v6865_v51  ;;  %v2233_v5 = vadd.f32 %v2215_v25, %v2213_v26  ;;  %v2200_v55 = vadd.f32 %v1906_v40, %v1892_v17  ;;  %v2202_v27 = vadd.f32 %v1934_v59, %v1920_v48  ;;  %v6868_v21 = vld [vmem:[#allocation5_spill] sm:$0xff] }
 0x3ac   : > { %v2163_v34 = vpop.permute.xlu1 %2162  ;;  %v2239_v43 = vadd.f32 %v2227_v15, %v2225_v57  ;;  %v1978_v60 = vmul.f32 %v5366_v35, %v6867_v32  ;;  %v2006_v4 = vmul.f32 %v6843_v20, %v6868_v21  ;;  %v2241_v18 = vadd.f32 %v2231_v63, %v2229_v22  ;;  %v6872_v59 = vld [vmem:[#allocation41_spill] sm:$0xff]  ;;  %v5557_v20 = vld [vmem:[%s6366_s13 + $0x8] sm:$0xff]  ;;  %v6876_v57 = vld [vmem:[#allocation22_spill] sm:$0xff] }
 0x3ad   : > { %v2173_v38 = vmul.f32 %v5426_v41, %v2163_v34  ;;  %v2198_v30 = vadd.f32 %v1878_v47, %v5487_v46  ;;  %v2212_v62 = vadd.f32 %v6869_v24, %v2062_v36  ;;  %v6871_v34 = vld [vmem:[#allocation15_spill] sm:$0xff]  ;;  %v2146_v39 = vmul.f32 %v6872_v59, %v5479_v0  ;;  %6874 = vst [vmem:[#allocation31_spill] sm:$0xff] %v5557_v20  ;;  %v6875_v46 = vld [vmem:[#allocation48_spill] sm:$0xff]  ;;  %v6877_v63 = vld [vmem:[#allocation38_spill] sm:$0xff] }
 0x3ae   : > { %v2104_v40 = vmul.f32 %v6871_v34, %v6870_v52  ;;  %v2208_v17 = vadd.f32 %v2020_v42, %v2006_v4  ;;  %v2210_v25 = vadd.f32 %v2048_v54, %v6873_v45  ;;  %v2090_v47 = vmul.f32 %v6853_v8, %v6875_v46  ;;  %2841 = vperm.xlu0 %3814, %v5557_v20   ;;  %v6890_v24 = vld [vmem:[#allocation55_spill] sm:$0xff] }
 0x3af   : > { %v2219_v3 = vadd.f32 %v5464_v50, %v2173_v38  ;;  %v2132_v50 = vmul.f32 %v6847_v28, %v6866_v7  ;;  %v2228_v28 = vadd.f32 %v2204_v29, %v2202_v27  ;;  %v2224_v26 = vadd.f32 %v2196_v33, %v5498_v31 }
 0x3b0   : > { %v2167_v61 = vpop.permute.xlu1 %2166  ;;  %v2245_v48 = vadd.f32 %v2239_v43, %v5508_v56  ;;  %v2232_v29 = vadd.f32 %v2212_v62, %v2210_v25  ;;  %v2214_v22 = vadd.f32 %v2104_v40, %v2090_v47  ;;  %v2218_v6 = vadd.f32 %v6879_v9, %v2146_v39  ;;  %v6884_v43 = vld [vmem:[#allocation54_spill] sm:$0xff]  ;;  %v6894_v40 = vld [vmem:[#allocation13_spill] sm:$0xff]  ;;  %v3877_v25 = vld [vmem:[%s6364_s11 + $0x8] sm:$0xff] }
 0x3b1   : > { %v2235_v53 = vadd.f32 %v2219_v3, %v2217_v11  ;;  %v2216_v15 = vadd.f32 %v2132_v50, %v6876_v57  ;;  %v2174_v58 = vmul.f32 %v5426_v41, %v2167_v61  ;;  %v2226_v11 = vadd.f32 %v2200_v55, %v2198_v30  ;;  %v6878_v3 = vld [vmem:[#allocation24_spill] sm:$0xff]  ;;  %v5599_v62 = vld [vmem:[%s6366_s13 + $0x18] sm:$0xff] }
 0x3b2   : > { %v2206_v14 = vadd.f32 %v6878_v3, %v1978_v60  ;;  %v2222_v36 = vadd.f32 %v5482_v12, %v5475_v37  ;;  %v6880_v31 = vmov 5   ;;  %v6883_v37 = vmov 8   ;;  %v6885_v60 = vld [vmem:[#allocation42_spill] sm:$0xff]  ;;  %6891 = vst [vmem:[#allocation28_spill] sm:$0xff] %v5599_v62 }
 0x3b3   : > { %v2243_v2 = vadd.f32 %v2235_v53, %v2233_v5  ;;  %v2240_v61 = vadd.f32 %v2228_v28, %v2226_v11  ;;  %v2234_v1 = vadd.f32 %v2216_v15, %v2214_v22  ;;  %3820 = vset.pattern.permute.xlu0 %v6880_v31  ;;  %v6881_v53 = vld [vmem:[#allocation23_spill] sm:$0xff]  ;;  %v6886_v4 = vmov 14   ;;  %v5616_v28 = vld [vmem:[%s6366_s13 + $0x10] sm:$0xff] }
 0x3b4   : > { %v2230_v44 = vadd.f32 %v2208_v17, %v2206_v14  ;;  %2883 = vperm.xlu0 %3820, %v5557_v20   ;;  %v2238_v56 = vadd.f32 %v2224_v26, %v2222_v36  ;;  %v6889_v30 = vmov 1   ;;  %v6892_v52 = vmov 4   ;;  %6897 = vst [vmem:[#allocation37_spill] sm:$0xff] %v5616_v28 }
 0x3b5   : > { %v2181_v35 = vpop.permute.xlu1 %2180  ;;  %v2247_v38 = vadd.f32 %v2243_v2, %v2241_v18  ;;  %v5591_v18 = vld [vmem:[%s6366_s13] sm:$0xff]  ;;  %v6893_v34 = vmov 2   ;;  %v6895_v59 = vmov 3   ;;  %v6896_v39 = vmov 6  }
 0x3b6   : > { %v2188_v0 = vmul.f32 %v6877_v63, %v2181_v35  ;;  %v2242_v54 = vadd.f32 %v2232_v29, %v2230_v44  ;;  %v2246_v27 = vadd.f32 %v2240_v61, %v2238_v56  ;;  %6888 = vst [vmem:[#allocation56_spill] sm:$0xff] %v5591_v18  ;;  %v6898_v17 = vmov 7   ;;  %v6906_v63 = vld [vmem:[#allocation40_spill] sm:$0xff] }
 0x3b7   : > { %v2249_v41 = vadd.f32 %v2247_v38, %v2245_v48  ;;  %v6899_v45 = vmov 9   ;;  %v6900_v35 = vmov 10   ;;  %v6901_v38 = vmov 12  }
 0x3b8   : > { %v2220_v8 = vadd.f32 %v2188_v0, %v2174_v58  ;;  %3824 = vset.pattern.permute.xlu0 %v6883_v37  ;;  %v6902_v46 = vmov 13   ;;  %v6903_v47 = vmov 15   ;;  %v6904_v57 = vmov 11   ;;  %v580_v58 = vld [vmem:[%s6367_s14 + $0x8] sm:$0xff]  ;;  %v6907_v0 = vld [vmem:[#allocation18_spill] sm:$0xff] }
 0x3b9   : > { %2925 = vperm.xlu0 %3824, %v5557_v20   ;;  %v6905_v15 = vmov 0  }
 0x3ba   : > { %v2236_v42 = vadd.f32 %v2220_v8, %v2218_v6  ;;  %v2254_v51 = vpop.permute.xlu1 %2253  ;;  %v5703_v6 = vpop.permute.xlu0 %2351 }
 0x3bb   : > { %v2261_v33 = vadd.f32 %v2254_v51, %v2249_v41 }
 0x3bc   : > { %v2244_v5 = vadd.f32 %v2236_v42, %v2234_v1 }
 0x3bd   : > { %v2263_v55 = vadd.f32 %v2261_v33, %v6881_v53  ;;  %3831 = vset.pattern.permute.xlu0 %v6886_v4 }
 0x3be   : > { %v2248_v7 = vadd.f32 %v2244_v5, %v2242_v54  ;;  %3009 = vperm.xlu0 %3831, %v5557_v20   ;;  %v5712_v41 = vpop.permute.xlu0 %2393 }
 0x3bf   : > { %v5574_v50 = vmax.f32 %v2263_v55, 0.0  ;;  %v5748_v55 = vld [vmem:[%s6368_s15] sm:$0x1] }
 0x3c0   : > { %v2250_v12 = vadd.f32 %v2248_v7, %v2246_v27  ;;  %6910 = vst [vmem:[#allocation47_spill] sm:$0xff] %v5748_v55 }
 0x3c1   : > { %6882 = vst [vmem:[#allocation35_spill] sm:$0xff] %v5574_v50  ;;  %2268 = vrot.lane.b32.xlu1 %v5574_v50, %s3904_s24 }
 0x3c2   : > { %v2262_v32 = vadd.f32 %v6884_v43, %v2250_v12  ;;  %3832 = vset.pattern.permute.xlu0 %v6889_v30  ;;  %v5719_v44 = vpop.permute.xlu0 %2435  ;;  %v573_v12 = vld [vmem:[%s6365_s12] sm:$0xff] }
 0x3c3   : > { %2823 = vperm.xlu0 %3832, %v5591_v18  }
 0x3c4   : > { %v2264_v21 = vadd.f32 %v2262_v32, %v6885_v60 }
 0x3c6   : > { %v5584_v2 = vmax.f32 %v2264_v21, 0.0  ;;  %v5724_v42 = vpop.permute.xlu0 %2477 }
 0x3c7   : > { %3053 = vperm.xlu0 %3832, %v5599_v62  }
 0x3c8   : > { %6887 = vst [vmem:[#allocation36_spill] sm:$0xff] %v5584_v2  ;;  %2270 = vrot.lane.b32.xlu1 %v5584_v2, %s3904_s24 }
 0x3ca   : > { %v5730_v33 = vpop.permute.xlu0 %2291 }
 0x3cb   : > { %3836 = vset.pattern.permute.xlu0 %v6892_v52 }
 0x3cc   : > { %2281 = vperm.xlu1 %3766, %v6890_v24   ;;  %2865 = vperm.xlu0 %3836, %v5591_v18  }
 0x3ce   : > { %v5739_v5 = vpop.permute.xlu0 %2521 }
 0x3d0   : > { %3768 = vset.pattern.permute.xlu1 %v6889_v30  ;;  %3095 = vperm.xlu0 %3836, %v5599_v62  }
 0x3d1   : > { %2295 = vperm.xlu1 %3768, %v6890_v24  }
 0x3d2   : > { %v5751_v27 = vpop.permute.xlu0 %2545 }
 0x3d4   : > { %3841 = vset.pattern.permute.xlu0 %v6896_v39 }
 0x3d5   : > { %3769 = vset.pattern.permute.xlu1 %v6893_v34  ;;  %3119 = vperm.xlu0 %3841, %v5616_v28  }
 0x3d6   : > { %2305 = vperm.xlu1 %3769, %v6894_v40   ;;  %v5762_v43 = vpop.permute.xlu0 %2333 }
 0x3d9   : > { %3842 = vset.pattern.permute.xlu0 %v6898_v17 }
 0x3da   : > { %3770 = vset.pattern.permute.xlu1 %v6895_v59  ;;  %2907 = vperm.xlu0 %3842, %v5591_v18   ;;  %v2564_v21 = vpop.permute.xlu0 %2563 }
 0x3db   : > { %2319 = vperm.xlu1 %3770, %v6894_v40  }
 0x3de   : > { %3137 = vperm.xlu0 %3842, %v5599_v62  }
 0x3df   : > { %2323 = vperm.xlu1 %3770, %v6890_v24  }
 0x3e2   : > { %3846 = vset.pattern.permute.xlu0 %v6899_v45 }
 0x3e3   : > { %3771 = vset.pattern.permute.xlu1 %v6892_v52  ;;  %3161 = vperm.xlu0 %3846, %v5616_v28  }
 0x3e4   : > { %2337 = vperm.xlu1 %3771, %v6890_v24  }
 0x3e7   : > { %3847 = vset.pattern.permute.xlu0 %v6900_v35 }
 0x3e8   : > { %3772 = vset.pattern.permute.xlu1 %v6880_v31  ;;  %2949 = vperm.xlu0 %3847, %v5591_v18  }
 0x3e9   : > { %2347 = vperm.xlu1 %3772, %v6894_v40  }
 0x3ec   : > { %3179 = vperm.xlu0 %3847, %v5599_v62  }
 0x3ed   : > { %3773 = vset.pattern.permute.xlu1 %v6896_v39 }
 0x3ee   : > { %2361 = vperm.xlu1 %3773, %v6894_v40  }
 0x3f0   : > { %3851 = vset.pattern.permute.xlu0 %v6901_v38 }
 0x3f1   : > { %3203 = vperm.xlu0 %3851, %v5616_v28  }
 0x3f2   : > { %2365 = vperm.xlu1 %3773, %v3877_v25  }
 0x3f5   : > { %3852 = vset.pattern.permute.xlu0 %v6902_v46 }
 0x3f6   : > { %3774 = vset.pattern.permute.xlu1 %v6898_v17  ;;  %2991 = vperm.xlu0 %3852, %v5591_v18  }
 0x3f7   : > { %2379 = vperm.xlu1 %3774, %v3877_v25  }
 0x3fa   : > { %3221 = vperm.xlu0 %3852, %v5599_v62  }
 0x3fb   : > { %3775 = vset.pattern.permute.xlu1 %v6883_v37 }
 0x3fc   : > { %2389 = vperm.xlu1 %3775, %v6894_v40  }
 0x3fe   : > { %3856 = vset.pattern.permute.xlu0 %v6903_v47 }
 0x3ff   : > { %3245 = vperm.xlu0 %3856, %v5616_v28  }
 0x400   : > { %3777 = vset.pattern.permute.xlu1 %v6899_v45 }
 0x401   : > { %2403 = vperm.xlu1 %3777, %v6894_v40  }
 0x403   : > { %3857 = vset.pattern.permute.xlu0 %v6905_v15 }
 0x404   : > { %2808 = vperm.xlu0 %3857, %v5591_v18  }
 0x405   : > { %2407 = vperm.xlu1 %3777, %v3877_v25  }
 0x408   : > { %3034 = vperm.xlu0 %3857, %v5616_v28  }
 0x409   : > { %3778 = vset.pattern.permute.xlu1 %v6900_v35 }
 0x40a   : > { %2421 = vperm.xlu1 %3778, %v3877_v25  }
 0x40c   : > { %3327 = vperm.xlu0 %3857, %v580_v58  }
 0x40e   : > { %3779 = vset.pattern.permute.xlu1 %v6904_v57 }
 0x40f   : > { %2431 = vperm.xlu1 %3779, %v6894_v40  }
 0x410   : > { %3860 = vset.pattern.permute.xlu0 %v6895_v59 }
 0x411   : > { %3077 = vperm.xlu0 %3860, %v5616_v28  }
 0x413   : > { %3781 = vset.pattern.permute.xlu1 %v6901_v38 }
 0x414   : > { %2445 = vperm.xlu1 %3781, %v6894_v40  }
 0x415   : > { %3365 = vperm.xlu0 %3860, %v5748_v55  }
 0x418   : > { %2449 = vperm.xlu1 %3781, %v3877_v25  }
 0x419   : > { %3863 = vset.pattern.permute.xlu0 %v6904_v57 }
 0x41a   : > { %2967 = vperm.xlu0 %3863, %v5557_v20  }
 0x41c   : > { %3782 = vset.pattern.permute.xlu1 %v6902_v46 }
 0x41d   : > { %2463 = vperm.xlu1 %3782, %v3877_v25  }
 0x41e   : > { %3437 = vperm.xlu0 %3863, %v5748_v55  }
 0x421   : > { %3783 = vset.pattern.permute.xlu1 %v6886_v4 }
 0x422   : > { %2473 = vperm.xlu1 %3783, %v6894_v40   ;;  %3868 = vset.pattern.permute.xlu0 %v6889_v30 }
 0x423   : > { %3347 = vperm.xlu0 %3868, %v5748_v55  }
 0x426   : > { %3786 = vset.pattern.permute.xlu1 %v6903_v47 }
 0x427   : > { %2487 = vperm.xlu1 %3786, %v6894_v40   ;;  %3871 = vset.pattern.permute.xlu0 %v6899_v45  ;;  %v2588_v40 = vpop.permute.xlu0 %2587 }
 0x428   : > { %3419 = vperm.xlu0 %3871, %v5748_v55  }
 0x42b   : > { %2491 = vperm.xlu1 %3786, %v3877_v25   ;;  %v5780_v58 = vpop.permute.xlu0 %2375 }
 0x42c   : > { %3874 = vset.pattern.permute.xlu0 %v6905_v15 }
 0x42d   : > { %3338 = vperm.xlu0 %3874, %v5748_v55  }
 0x42f   : > { %3787 = vset.pattern.permute.xlu1 %v6905_v15 }
 0x430   : > { %2507 = vperm.xlu1 %3787, %v6906_v63  }
 0x433   : > { %v5674_v26 = vpop.permute.xlu1 %2268 }
 0x434   : > { %3788 = vset.pattern.permute.xlu1 %v6889_v30 }
 0x435   : > { %2517 = vperm.xlu1 %3788, %v6907_v0  }
 0x439   : > { %3789 = vset.pattern.permute.xlu1 %v6893_v34 }
 0x43a   : > { %2531 = vperm.xlu1 %3789, %v6907_v0   ;;  %v5677_v11 = vpop.permute.xlu1 %2270 }
 0x43e   : > { %2535 = vperm.xlu1 %3789, %v6906_v63  }
 0x442   : > { %3792 = vset.pattern.permute.xlu1 %v6895_v59 }
 0x443   : > { %2549 = vperm.xlu1 %3792, %v6906_v63  }
 0x447   : > { %3793 = vset.pattern.permute.xlu1 %v6892_v52 }
 0x448   : > { %2559 = vperm.xlu1 %3793, %v6907_v0  }
 0x44b   : > { %v5681_v3 = vpop.permute.xlu1 %2281 }
 0x44c   : > { %3794 = vset.pattern.permute.xlu1 %v6880_v31 }
 0x44d   : > { %2573 = vperm.xlu1 %3794, %v6907_v0  }
 0x450   : > { %v5685_v14 = vpop.permute.xlu1 %2295 }
 0x451   : > { %2577 = vperm.xlu1 %3794, %v6906_v63  }
 0x455   : > { %3797 = vset.pattern.permute.xlu1 %v6896_v39  ;;  %v5689_v48 = vpop.permute.xlu1 %2305 }
 0x456   : > { %2591 = vperm.xlu1 %3797, %v6906_v63  }
 0x45a   : > { %3798 = vset.pattern.permute.xlu1 %v6898_v17  ;;  %v5693_v29 = vpop.permute.xlu1 %2319 }
 0x45b   : > { %2601 = vperm.xlu1 %3798, %v6907_v0  }
 0x45e   : > { %v5696_v22 = vpop.permute.xlu1 %2323 }
 0x45f   : > { %3799 = vset.pattern.permute.xlu1 %v6883_v37 }
 0x460   : > { %2615 = vperm.xlu1 %3799, %v6907_v0  }
 0x463   : > { %v5700_v9 = vpop.permute.xlu1 %2337 }
 0x464   : > { %2619 = vperm.xlu1 %3799, %v6906_v63  }
 0x468   : > { %3802 = vset.pattern.permute.xlu1 %v6899_v45  ;;  %v5706_v8 = vpop.permute.xlu1 %2347 }
 0x469   : > { %2633 = vperm.xlu1 %3802, %v6906_v63  }
 0x46d   : > { %3803 = vset.pattern.permute.xlu1 %v6900_v35  ;;  %v5710_v36 = vpop.permute.xlu1 %2361 }
 0x46e   : > { %2643 = vperm.xlu1 %3803, %v6907_v0  }
 0x471   : > { %v5715_v61 = vpop.permute.xlu1 %2365 }
 0x472   : > { %3804 = vset.pattern.permute.xlu1 %v6904_v57 }
 0x473   : > { %2657 = vperm.xlu1 %3804, %v6907_v0  }
 0x476   : > { %v5721_v1 = vpop.permute.xlu1 %2379 }
 0x477   : > { %2661 = vperm.xlu1 %3804, %v6906_v63  }
 0x47b   : > { %3807 = vset.pattern.permute.xlu1 %v6901_v38  ;;  %v5727_v51 = vpop.permute.xlu1 %2389 }
 0x47c   : > { %2675 = vperm.xlu1 %3807, %v6906_v63  }
 0x480   : > { %3808 = vset.pattern.permute.xlu1 %v6902_v46  ;;  %v5733_v56 = vpop.permute.xlu1 %2403 }
 0x481   : > { %2685 = vperm.xlu1 %3808, %v6907_v0  }
 0x484   : > { %v5736_v54 = vpop.permute.xlu1 %2407 }
 0x485   : > { %6908 = vst [vmem:[#allocation46_spill] sm:$0xff] %v5736_v54  ;;  %3809 = vset.pattern.permute.xlu1 %v6886_v4 }
 0x486   : > { %2699 = vperm.xlu1 %3809, %v6907_v0   ;;  %v2606_v0 = vpop.permute.xlu0 %2605 }
 0x489   : > { %v5742_v53 = vpop.permute.xlu1 %2421 }
 0x48a   : > { %6909 = vst [vmem:[#allocation21_spill] sm:$0xff] %v5742_v53  ;;  %2703 = vperm.xlu1 %3809, %v6906_v63   ;;  %v5788_v62 = vpop.permute.xlu0 %2629 }
 0x48e   : > { %3812 = vset.pattern.permute.xlu1 %v6903_v47  ;;  %v5754_v7 = vpop.permute.xlu1 %2431  ;;  %v5792_v4 = vpop.permute.xlu0 %2417 }
 0x48f   : > { %2717 = vperm.xlu1 %3812, %v6906_v63  }
 0x493   : > { %3813 = vset.pattern.permute.xlu1 %v6905_v15  ;;  %v5765_v32 = vpop.permute.xlu1 %2445  ;;  %v2648_v15 = vpop.permute.xlu0 %2647 }
 0x494   : > { %2790 = vperm.xlu1 %3813, %v573_v12  }
 0x497   : > { %v5768_v60 = vpop.permute.xlu1 %2449  ;;  %v2672_v55 = vpop.permute.xlu0 %2671 }
 0x498   : > { %6911 = vst [vmem:[#allocation14_spill] sm:$0xff] %v5768_v60  ;;  %v5822_v60 = vrot.slane %v5574_v50, %v6819_v13 }
 0x49a   : > { %6927 = vst [vmem:[#allocation51_spill] sm:$0xff] %v5822_v60 }
 0x49b   : > { %v5802_v45 = vpop.permute.xlu0 %2459 }
 0x49c   : > { %v5772_v24 = vpop.permute.xlu1 %2463 }
 0x49d   : > { %6912 = vst [vmem:[#allocation39_spill] sm:$0xff] %v5772_v24  ;;  %v6930_v24 = vld [vmem:[#allocation3_spill] sm:$0xff] }
 0x49e   : > { %vm2267_vm2 = vcmp.ge.s32.totalorder %v6930_v24, 4 }
 0x49f   : > { %v2690_v17 = vpop.permute.xlu0 %2689 }
 0x4a1   : > { %v5776_v25 = vpop.permute.xlu1 %2473 }
 0x4a3   : > { %v2714_v31 = vpop.permute.xlu0 %2713 }
 0x4a6   : > { %v5782_v63 = vpop.permute.xlu1 %2487 }
 0x4a7   : > { %v2277_v59 = vpop.permute.xlu0 %2276 }
 0x4aa   : > { %v5784_v12 = vpop.permute.xlu1 %2491 }
 0x4ab   : > { %6913 = vst [vmem:[#allocation32_spill] sm:$0xff] %v5784_v12  ;;  %v2503_v30 = vpop.permute.xlu0 %2502  ;;  %v6934_v12 = vld [vmem:[#allocation33_spill] sm:$0xff] }
 0x4ac   : > { %v5849_v54 = vrot.slane %v5574_v50, %v6934_v12 }
 0x4ae   : > { %6935 = vst [vmem:[#allocation49_spill] sm:$0xff] %v5849_v54 }
 0x4af   : > { %v5786_v28 = vpop.permute.xlu1 %2507 }
 0x4b0   : > { %6914 = vst [vmem:[#allocation53_spill] sm:$0xff] %v5786_v28 }
 0x4b4   : > { %v5790_v47 = vpop.permute.xlu1 %2517 }
 0x4b5   : > { %6915 = vst [vmem:[#allocation11_spill] sm:$0xff] %v5790_v47 }
 0x4b9   : > { %v5794_v46 = vpop.permute.xlu1 %2531 }
 0x4ba   : > { %6916 = vst [vmem:[#allocation20_spill] sm:$0xff] %v5794_v46  ;;  %v2272_v46 = vsel %vm2267_vm2, %v5674_v26, 0.0 }
 0x4bd   : > { %v5796_v38 = vpop.permute.xlu1 %2535 }
 0x4be   : > { %6917 = vst [vmem:[#allocation9_spill] sm:$0xff] %v5796_v38  ;;  %v5816_v38 = vpop.permute.xlu0 %2795 }
 0x4bf   : > { %6925 = vst [vmem:[#allocation7_spill] sm:$0xff] %v5816_v38  ;;  %v5835_v38 = vrot.slane %v5574_v50, %v6813_v19 }
 0x4c1   : > { %6931 = vst [vmem:[#allocation17_spill] sm:$0xff] %v5835_v38 }
 0x4c2   : > { %v5798_v57 = vpop.permute.xlu1 %2549 }
 0x4c3   : > { %6918 = vst [vmem:[#allocation10_spill] sm:$0xff] %v5798_v57  ;;  %v2310_v57 = vpop.permute.xlu0 %2309 }
 0x4c7   : > { %v5800_v35 = vpop.permute.xlu1 %2559 }
 0x4c8   : > { %6919 = vst [vmem:[#allocation52_spill] sm:$0xff] %v5800_v35  ;;  %v6937_v35 = vld [vmem:[#allocation34_spill] sm:$0xff] }
 0x4c9   : > { %v5855_v47 = vrot.slane %v5574_v50, %v6937_v35 }
 0x4cb   : > { %6938 = vst [vmem:[#allocation43_spill] sm:$0xff] %v5855_v47  ;;  %v2329_v47 = vrot.slane %v2272_v46, %v6809_v16 }
 0x4cc   : > { %v5804_v37 = vpop.permute.xlu1 %2573 }
 0x4cd   : > { %6920 = vst [vmem:[#allocation50_spill] sm:$0xff] %v5804_v37  ;;  %v5858_v37 = vmul.f32 %v5822_v60, %v2503_v30  ;;  %v5877_v30 = vrot.slane %v5584_v2, %v6818_v23  ;;  %v5898_v60 = vrot.slane %v5584_v2, %v6934_v12 }
 0x4cf   : > { %6939 = vst [vmem:[#allocation19_spill] sm:$0xff] %v5858_v37  ;;  %6942 = vst [vmem:[#allocation6_spill] sm:$0xff] %v5877_v30  ;;  %v2385_v37 = vrot.slane %v2272_v46, %v6818_v23 }
 0x4d0   : > { %v5806_v39 = vpop.permute.xlu1 %2577 }
 0x4d1   : > { %6921 = vst [vmem:[#allocation26_spill] sm:$0xff] %v5806_v39  ;;  %v5826_v39 = vrot.slane %v5574_v50, %v6811_v10  ;;  %v2386_v24 = vmul.f32 %v2385_v37, %v5780_v58 }
 0x4d3   : > { %6928 = vst [vmem:[#allocation25_spill] sm:$0xff] %v5826_v39 }
 0x4d5   : > { %v5808_v52 = vpop.permute.xlu1 %2591 }
 0x4d6   : > { %6922 = vst [vmem:[#allocation45_spill] sm:$0xff] %v5808_v52  ;;  %v5830_v52 = vrot.slane %v5574_v50, %v6809_v16 }
 0x4d8   : > { %6929 = vst [vmem:[#allocation12_spill] sm:$0xff] %v5830_v52  ;;  %v5869_v54 = vmul.f32 %v5830_v52, %v5751_v27  ;;  %v5890_v27 = vrot.slane %v5584_v2, %v6819_v13  ;;  %v2315_v52 = vrot.slane %v2272_v46, %v6934_v12 }
 0x4da   : > { %v5810_v18 = vpop.permute.xlu1 %2601  ;;  %6941 = vst [vmem:[#allocation41_spill] sm:$0xff] %v5869_v54  ;;  %6946 = vst [vmem:[#allocation24_spill] sm:$0xff] %v5890_v27  ;;  %v5917_v54 = vrot.slane %v5584_v2, %v6815_v49 }
 0x4df   : > { %v5812_v34 = vpop.permute.xlu1 %2615 }
 0x4e0   : > { %6923 = vst [vmem:[#allocation44_spill] sm:$0xff] %v5812_v34  ;;  %v5851_v34 = vpop.permute.xlu0 %2841 }
 0x4e1   : > { %6936 = vst [vmem:[#allocation5_spill] sm:$0xff] %v5851_v34  ;;  %v5873_v34 = vrot.slane %v5584_v2, %v6937_v35 }
 0x4e3   : > { %v5814_v20 = vpop.permute.xlu1 %2619  ;;  %v5920_v27 = vmul.f32 %v5873_v34, %v2690_v17 }
 0x4e4   : > { %6924 = vst [vmem:[#allocation8_spill] sm:$0xff] %v5814_v20  ;;  %v5839_v20 = vrot.slane %v5574_v50, %v6815_v49 }
 0x4e5   : > { %6950 = vst [vmem:[#allocation42_spill] sm:$0xff] %v5920_v27 }
 0x4e6   : > { %6932 = vst [vmem:[#allocation27_spill] sm:$0xff] %v5839_v20  ;;  %v5883_v26 = vmul.f32 %v5839_v20, %v2588_v40  ;;  %v2301_v40 = vrot.slane %v2272_v46, %v6811_v10  ;;  %v2371_v20 = vrot.slane %v2272_v46, %v6815_v49 }
 0x4e8   : > { %v5818_v28 = vpop.permute.xlu1 %2633  ;;  %6944 = vst [vmem:[#allocation22_spill] sm:$0xff] %v5883_v26  ;;  %v5923_v26 = vmul.f32 %v5877_v30, %v2714_v31  ;;  %v2302_v27 = vmul.f32 %v2301_v40, %v5730_v33  ;;  %v5940_v30 = vmul.f32 %v5898_v60, %v2648_v15 }
 0x4e9   : > { %6926 = vst [vmem:[#allocation16_spill] sm:$0xff] %v5818_v28  ;;  %v5843_v28 = vrot.slane %v5574_v50, %v6818_v23  ;;  %v5880_v50 = vmul.f32 %v5835_v38, %v2564_v21  ;;  %v2287_v21 = vrot.slane %v2272_v46, %v6819_v13  ;;  %v2343_v38 = vrot.slane %v2272_v46, %v6813_v19 }
 0x4ea   : > { %6951 = vst [vmem:[#allocation55_spill] sm:$0xff] %v5923_v26  ;;  %6953 = vst [vmem:[#allocation40_spill] sm:$0xff] %v5940_v30  ;;  %v2316_v30 = vmul.f32 %v2315_v52, %v5689_v48 }
 0x4eb   : > { %6943 = vst [vmem:[#allocation48_spill] sm:$0xff] %v5880_v50  ;;  %v2288_v31 = vmul.f32 %v2287_v21, %v2277_v59  ;;  %v2344_v59 = vmul.f32 %v2343_v38, %v5762_v43  ;;  %v2289_v48 = vmul.f32 %v2287_v21, %v5681_v3 }
 0x4ed   : > { %v5845_v53 = vpop.permute.xlu1 %2643 }
 0x4ee   : > { %6933 = vst [vmem:[#allocation29_spill] sm:$0xff] %v5845_v53  ;;  %v5865_v53 = vmul.f32 %v5826_v39, %v5739_v5  ;;  %v5886_v5 = vmul.f32 %v5843_v28, %v2606_v0  ;;  %v5904_v0 = vrot.slane %v5584_v2, %v6809_v16  ;;  %v2357_v39 = vrot.slane %v2272_v46, %v6937_v35 }
 0x4ef   : > { %v2330_v46 = vmul.f32 %v2329_v47, %v5693_v29  ;;  %v2303_v29 = vmul.f32 %v2301_v40, %v5685_v14 }
 0x4f0   : > { %6940 = vst [vmem:[#allocation15_spill] sm:$0xff] %v5865_v53  ;;  %6945 = vst [vmem:[#allocation38_spill] sm:$0xff] %v5886_v5  ;;  %v5894_v53 = vrot.slane %v5584_v2, %v6811_v10  ;;  %v5910_v5 = vrot.slane %v5584_v2, %v6813_v19  ;;  %v2372_v2 = vmul.f32 %v2371_v20, %v5710_v36 }
 0x4f1   : > { %6948 = vst [vmem:[#allocation23_spill] sm:$0xff] %v5904_v0  ;;  %v5927_v0 = vpop.permute.xlu0 %2883  ;;  %v2358_v36 = vmul.f32 %v2357_v39, %v5706_v8  ;;  %v2726_v8 = vadd.f32 %v2302_v27, %v2288_v31  ;;  %v2728_v43 = vadd.f32 %v2330_v46, %v2316_v30  ;;  %v2387_v46 = vmul.f32 %v2385_v37, %v5721_v1 }
 0x4f2   : > { %6947 = vst [vmem:[#allocation30_spill] sm:$0xff] %v5894_v53  ;;  %v5906_v50 = vpop.permute.xlu1 %2657  ;;  %6952 = vst [vmem:[#allocation13_spill] sm:$0xff] %v5927_v0  ;;  %v5936_v17 = vmul.f32 %v5894_v53, %v5788_v62  ;;  %v5945_v0 = vmul.f32 %v5910_v5, %v2672_v55  ;;  %v2359_v62 = vmul.f32 %v2357_v39, %v5703_v6 }
 0x4f3   : > { %6949 = vst [vmem:[#allocation54_spill] sm:$0xff] %v5906_v50  ;;  %v2273_v50 = vsel %vm2267_vm2, %v5677_v11, 0.0  ;;  %v2317_v11 = vmul.f32 %v2315_v52, %v2310_v57  ;;  %v2732_v53 = vadd.f32 %v2386_v24, %v2372_v2  ;;  %v2345_v24 = vmul.f32 %v2343_v38, %v5700_v9 }
 0x4f4   : > { %v2399_v33 = vrot.slane %v2273_v50, %v6819_v13  ;;  %v2427_v15 = vrot.slane %v2273_v50, %v6934_v12  ;;  %v2441_v55 = vrot.slane %v2273_v50, %v6809_v16  ;;  %v2469_v57 = vrot.slane %v2273_v50, %v6937_v35 }
 0x4f5   : > { %v2413_v58 = vrot.slane %v2273_v50, %v6811_v10  ;;  %v2483_v39 = vrot.slane %v2273_v50, %v6815_v49  ;;  %v5960_v6 = vpop.permute.xlu0 %2925  ;;  %v2331_v13 = vmul.f32 %v2329_v47, %v5696_v22  ;;  %v2730_v12 = vadd.f32 %v2358_v36, %v2344_v59 }
 0x4f6   : > { %v5942_v26 = vpop.permute.xlu1 %2661  ;;  %v2455_v52 = vrot.slane %v2273_v50, %v6813_v19  ;;  %v5969_v14 = vmul.f32 %v2399_v33, %v5712_v41  ;;  %v2497_v27 = vrot.slane %v2273_v50, %v6818_v23  ;;  %v2443_v31 = vmul.f32 %v2441_v55, %v5719_v44 }
 0x4f7   : > { %v2760_v40 = vadd.f32 %v2732_v53, %v2730_v12  ;;  %v2428_v30 = vmul.f32 %v2427_v15, %v5792_v4  ;;  %v2470_v47 = vmul.f32 %v2469_v57, %v5802_v45  ;;  %v5975_v22 = vadd.f32 %v2303_v29, %v2289_v48  ;;  %v6961_v29 = vld [vmem:[#allocation25_spill] sm:$0xff] }
 0x4f8   : > { %v2414_v3 = vmul.f32 %v2413_v58, %v5733_v56  ;;  %v2485_v38 = vmul.f32 %v2483_v39, %v5724_v42  ;;  %v2758_v9 = vadd.f32 %v2728_v43, %v2726_v8  ;;  %v5980_v41 = vadd.f32 %v2331_v13, %v2317_v11  ;;  %v6954_v56 = vld [vmem:[#allocation20_spill] sm:$0xff]  ;;  %v6959_v59 = vld [vmem:[#allocation23_spill] sm:$0xff]  ;;  %v6964_v43 = vld [vmem:[#allocation22_spill] sm:$0xff] }
 0x4f9   : > { %v2442_v50 = vmul.f32 %v2441_v55, %v5754_v7  ;;  %v2498_v53 = vmul.f32 %v2497_v27, %v5782_v63  ;;  %v5984_v44 = vadd.f32 %v2359_v62, %v2345_v24  ;;  %v2373_v4 = vmul.f32 %v2371_v20, %v5715_v61  ;;  %v5988_v12 = vpop.permute.xlu0 %3009  ;;  %v6955_v7 = vld [vmem:[#allocation49_spill] sm:$0xff]  ;;  %v6956_v20 = vld [vmem:[#allocation50_spill] sm:$0xff]  ;;  %v6957_v61 = vld [vmem:[#allocation43_spill] sm:$0xff] }
 0x4fa   : > { %v2400_v45 = vmul.f32 %v2399_v33, %v5727_v51  ;;  %v2612_v37 = vmul.f32 %v5843_v28, %v5810_v18  ;;  %v2456_v42 = vmul.f32 %v2455_v52, %v5765_v32  ;;  %v2484_v13 = vmul.f32 %v2483_v39, %v5776_v25  ;;  %v6958_v62 = vld [vmem:[#allocation54_spill] sm:$0xff]  ;;  %v6960_v28 = vld [vmem:[#allocation11_spill] sm:$0xff]  ;;  %v6962_v8 = vld [vmem:[#allocation52_spill] sm:$0xff] }
 0x4fb   : > { %v5964_v2 = vpop.permute.xlu1 %2675  ;;  %v2542_v21 = vmul.f32 %v6955_v7, %v6954_v56  ;;  %v5996_v63 = vadd.f32 %v2760_v40, %v2758_v9  ;;  %v2733_v11 = vadd.f32 %v2387_v46, %v2373_v4  ;;  %v2584_v51 = vmul.f32 %v6957_v61, %v6956_v20  ;;  %v6963_v25 = vld [vmem:[#allocation17_spill] sm:$0xff]  ;;  %v6965_v24 = vld [vmem:[#allocation44_spill] sm:$0xff] }
 0x4fc   : > { %v2734_v36 = vadd.f32 %v2414_v3, %v2400_v45  ;;  %v2668_v33 = vmul.f32 %v6959_v59, %v6958_v62  ;;  %v2736_v55 = vadd.f32 %v2442_v50, %v2428_v30  ;;  %v2740_v18 = vadd.f32 %v2498_v53, %v2484_v13  ;;  %v6966_v40 = vld [vmem:[#allocation24_spill] sm:$0xff]  ;;  %v6967_v3 = vld [vmem:[#allocation29_spill] sm:$0xff]  ;;  %v6968_v45 = vld [vmem:[#allocation46_spill] sm:$0xff] }
 0x4fd   : > { %v2528_v32 = vmul.f32 %v6961_v29, %v6960_v28  ;;  %v2570_v39 = vmul.f32 %v6963_v25, %v6962_v8  ;;  %v2748_v48 = vadd.f32 %v2612_v37, %v6964_v43  ;;  %v2626_v46 = vmul.f32 %v6966_v40, %v6965_v24  ;;  %v6969_v50 = vld [vmem:[#allocation32_spill] sm:$0xff]  ;;  %v6970_v13 = vld [vmem:[#allocation41_spill] sm:$0xff]  ;;  %v6016_v37 = vpop.permute.xlu0 %2823 }
 0x4fe   : > { %v2654_v9 = vmul.f32 %v5898_v60, %v6967_v3  ;;  %v2415_v56 = vmul.f32 %v2413_v58, %v6968_v45  ;;  %v2738_v30 = vadd.f32 %v2470_v47, %v2456_v42  ;;  %v2499_v53 = vmul.f32 %v2497_v27, %v6969_v50  ;;  %v6971_v28 = vld [vmem:[#allocation21_spill] sm:$0xff]  ;;  %v6972_v60 = vld [vmem:[#allocation39_spill] sm:$0xff] }
 0x4ff   : > { %v2744_v20 = vadd.f32 %v6970_v13, %v2542_v21  ;;  %v2429_v29 = vmul.f32 %v2427_v15, %v6971_v28  ;;  %v2746_v8 = vadd.f32 %v2584_v51, %v2570_v39  ;;  %v2762_v24 = vadd.f32 %v2736_v55, %v2734_v36  ;;  %v6974_v21 = vld [vmem:[#allocation55_spill] sm:$0xff]  ;;  %v6975_v15 = vld [vmem:[#allocation14_spill] sm:$0xff] }
 0x500   : > { %v2686_v1 = vpop.permute.xlu1 %2685  ;;  %v2752_v25 = vadd.f32 %v2668_v33, %v2654_v9  ;;  %v2471_v3 = vmul.f32 %v2469_v57, %v6972_v60  ;;  %v2750_v27 = vadd.f32 %v5936_v17, %v2626_v46  ;;  %v2457_v51 = vmul.f32 %v2455_v52, %v6975_v15  ;;  %v6976_v33 = vld [vmem:[#allocation45_spill] sm:$0xff]  ;;  %v6977_v9 = vld [vmem:[#allocation27_spill] sm:$0xff]  ;;  %v6978_v55 = vld [vmem:[#allocation10_spill] sm:$0xff] }
 0x501   : > { %v2696_v4 = vmul.f32 %v5873_v34, %v2686_v1  ;;  %v2764_v34 = vadd.f32 %v2740_v18, %v2738_v30  ;;  %v6973_v1 = vld [vmem:[#allocation19_spill] sm:$0xff]  ;;  %v2768_v47 = vadd.f32 %v2748_v48, %v2746_v8  ;;  %v2741_v39 = vadd.f32 %v2499_v53, %v2485_v38  ;;  %v6979_v57 = vld [vmem:[#allocation12_spill] sm:$0xff]  ;;  %v6980_v30 = vld [vmem:[#allocation26_spill] sm:$0xff]  ;;  %v6037_v8 = vpop.permute.xlu0 %3053 }
 0x502   : > { %v2742_v58 = vadd.f32 %v2528_v32, %v6973_v1  ;;  %v2599_v13 = vmul.f32 %v6977_v9, %v6976_v33  ;;  %v2557_v18 = vmul.f32 %v6979_v57, %v6978_v55  ;;  %v2585_v32 = vmul.f32 %v6957_v61, %v6980_v30  ;;  %v6981_v38 = vld [vmem:[#allocation53_spill] sm:$0xff]  ;;  %v6982_v53 = vld [vmem:[#allocation51_spill] sm:$0xff] }
 0x503   : > { %v2754_v42 = vadd.f32 %v2696_v4, %v5945_v0  ;;  %v2770_v48 = vadd.f32 %v2752_v25, %v2750_v27  ;;  %v2737_v46 = vadd.f32 %v2443_v31, %v2429_v29  ;;  %v2739_v0 = vadd.f32 %v2471_v3, %v2457_v51  ;;  %v6984_v25 = vld [vmem:[#allocation38_spill] sm:$0xff]  ;;  %v6985_v31 = vld [vmem:[#allocation16_spill] sm:$0xff]  ;;  %v6991_v33 = vld [vmem:[#allocation15_spill] sm:$0xff] }
 0x504   : > { %v2766_v50 = vadd.f32 %v2744_v20, %v2742_v58  ;;  %v2669_v4 = vmul.f32 %v6959_v59, %v5942_v26  ;;  %v2776_v52 = vadd.f32 %v2764_v34, %v2762_v24  ;;  %v2515_v20 = vmul.f32 %v6982_v53, %v6981_v38  ;;  %v6986_v29 = vld [vmem:[#allocation30_spill] sm:$0xff]  ;;  %v6987_v34 = vld [vmem:[#allocation48_spill] sm:$0xff]  ;;  %v6993_v53 = vld [vmem:[#allocation7_spill] sm:$0xff] }
 0x505   : > { %v2700_v62 = vpop.permute.xlu1 %2699  ;;  %v2735_v61 = vadd.f32 %v2415_v56, %v5969_v14  ;;  %v2749_v1 = vadd.f32 %v6984_v25, %v2599_v13  ;;  %v2641_v3 = vmul.f32 %v6986_v29, %v6985_v31  ;;  %v2683_v26 = vmul.f32 %v5910_v5, %v5964_v2  ;;  %v6990_v56 = vld [vmem:[#allocation6_spill] sm:$0xff] }
 0x506   : > { %v2710_v43 = vmul.f32 %v5917_v54, %v2700_v62  ;;  %v6983_v62 = vld [vmem:[#allocation9_spill] sm:$0xff]  ;;  %v2778_v60 = vadd.f32 %v2768_v47, %v2766_v50  ;;  %v2765_v59 = vadd.f32 %v2741_v39, %v2739_v0  ;;  %v2747_v58 = vadd.f32 %v2585_v32, %v6987_v34  ;;  %v6989_v47 = vld [vmem:[#allocation40_spill] sm:$0xff]  ;;  %v6992_v13 = vld [vmem:[#allocation42_spill] sm:$0xff] }
 0x507   : > { %v2543_v28 = vmul.f32 %v6955_v7, %v6983_v62  ;;  %v2761_v51 = vadd.f32 %v2733_v11, %v5984_v44  ;;  %v2763_v50 = vadd.f32 %v2737_v46, %v2735_v61  ;;  %v2743_v5 = vadd.f32 %v6991_v33, %v2515_v20  ;;  %v6995_v62 = vld [vmem:[#allocation31_spill] sm:$0xff] }
 0x508   : > { %v2756_v45 = vadd.f32 %v6974_v21, %v2710_v43  ;;  %v2782_v2 = vadd.f32 %v2776_v52, %v5996_v63  ;;  %v2769_v39 = vadd.f32 %v2749_v1, %v2747_v58  ;;  %v2755_v55 = vadd.f32 %v6992_v13, %v2683_v26 }
 0x509   : > { %v2704_v36 = vpop.permute.xlu1 %2703  ;;  %v2745_v24 = vadd.f32 %v2557_v18, %v2543_v28  ;;  %v6057_v18 = vpop.permute.xlu0 %2865  ;;  %v6996_v28 = vmov 1   ;;  %v6999_v61 = vmov 3   ;;  %v7000_v25 = vmov 4  }
 0x50a   : > { %v2772_v17 = vadd.f32 %v2756_v45, %v2754_v42  ;;  %v6988_v42 = vld [vmem:[#allocation8_spill] sm:$0xff]  ;;  %v2753_v45 = vadd.f32 %v2669_v4, %v6989_v47  ;;  %v2711_v14 = vmul.f32 %v5917_v54, %v2704_v36  ;;  %v2777_v36 = vadd.f32 %v2765_v59, %v2763_v50 }
 0x50b   : > { %v2627_v21 = vmul.f32 %v6966_v40, %v6988_v42  ;;  %v2759_v40 = vadd.f32 %v5980_v41, %v5975_v22  ;;  %v2767_v30 = vadd.f32 %v2745_v24, %v2743_v5  ;;  %v7001_v1 = vmov 5   ;;  %v7014_v47 = vld [vmem:[#allocation28_spill] sm:$0xff] }
 0x50c   : > { %v2780_v43 = vadd.f32 %v2772_v17, %v2770_v48  ;;  %v7002_v31 = vmov 6   ;;  %v7003_v29 = vmov 7   ;;  %v7005_v26 = vmov 9  }
 0x50d   : > { %v2751_v9 = vadd.f32 %v2641_v3, %v2627_v21  ;;  %v2775_v17 = vadd.f32 %v2761_v51, %v2759_v40  ;;  %v2779_v63 = vadd.f32 %v2769_v39, %v2767_v30  ;;  %v3096_v41 = vpop.permute.xlu0 %3095  ;;  %v7004_v3 = vmov 8  }
 0x50e   : > { %v2718_v27 = vpop.permute.xlu1 %2717  ;;  %v2784_v7 = vadd.f32 %v2780_v43, %v2778_v60  ;;  %v6997_v43 = vmov 2   ;;  %v6998_v60 = vld [vmem:[#allocation56_spill] sm:$0xff]  ;;  %v7006_v59 = vmov 10   ;;  %v7007_v24 = vmov 11  }
 0x50f   : > { %v2725_v15 = vmul.f32 %v6990_v56, %v2718_v27  ;;  %v2771_v32 = vadd.f32 %v2753_v45, %v2751_v9  ;;  %v2783_v0 = vadd.f32 %v2777_v36, %v2775_v17  ;;  %v7008_v34 = vmov 12  }
 0x510   : > { %v2786_v54 = vadd.f32 %v2784_v7, %v2782_v2  ;;  %v7009_v58 = vmov 13   ;;  %v7010_v27 = vmov 14   ;;  %v7011_v7 = vmov 15  }
 0x511   : > { %v2757_v57 = vadd.f32 %v2725_v15, %v2711_v14  ;;  %v6111_v42 = vpop.permute.xlu0 %3119  ;;  %v7013_v21 = vmov 0   ;;  %v7015_v14 = vld [vmem:[#allocation37_spill] sm:$0xff] }
 0x512   : > { %7012 = vst [vmem:[#allocation34_spill] sm:$0xff] %v6111_v42 }
 0x513   : > { %v2773_v44 = vadd.f32 %v2757_v57, %v2755_v55  ;;  %v2791_v11 = vpop.permute.xlu1 %2790 }
 0x514   : > { %v6059_v48 = vadd.f32 %v2791_v11, %v2786_v54 }
 0x515   : > { %v2781_v46 = vadd.f32 %v2773_v44, %v2771_v32  ;;  %v2908_v45 = vpop.permute.xlu0 %2907 }
 0x516   : > { %2800 = vrot.lane.b32.xlu1 %v6059_v48, %s3904_s24  ;;  %v6065_v22 = vrot.slane %v6059_v48, %v6813_v19 }
 0x517   : > { %v2785_v4 = vadd.f32 %v2781_v46, %v2779_v63 }
 0x518   : > { %v6068_v38 = vmul.f32 %v6065_v22, %v3096_v41 }
 0x519   : > { %v2787_v52 = vadd.f32 %v2785_v4, %v2783_v0  ;;  %v6119_v56 = vpop.permute.xlu0 %3137 }
 0x51b   : > { %v6071_v20 = vadd.f32 %v6993_v53, %v2787_v52 }
 0x51d   : > { %6994 = vst [vmem:[#allocation18_spill] sm:$0xff] %v6071_v20  ;;  %2802 = vrot.lane.b32.xlu1 %v6071_v20, %s3904_s24  ;;  %v6122_v15 = vpop.permute.xlu0 %3161 }
 0x51e   : > { %7016 = vst [vmem:[#allocation20_spill] sm:$0xff] %v6122_v15 }
 0x521   : > { %2813 = vperm.xlu1 %3813, %v6995_v62   ;;  %v6126_v50 = vpop.permute.xlu0 %2949 }
 0x525   : > { %3815 = vset.pattern.permute.xlu1 %v6996_v28  ;;  %v6133_v2 = vpop.permute.xlu0 %3179 }
 0x526   : > { %2827 = vperm.xlu1 %3815, %v6995_v62   ;;  %7017 = vst [vmem:[#allocation49_spill] sm:$0xff] %v6133_v2 }
 0x529   : > { %v6139_v9 = vpop.permute.xlu0 %3203 }
 0x52a   : > { %3816 = vset.pattern.permute.xlu1 %v6997_v43  ;;  %7018 = vst [vmem:[#allocation50_spill] sm:$0xff] %v6139_v9 }
 0x52b   : > { %2837 = vperm.xlu1 %3816, %v6998_v60  }
 0x52d   : > { %v6145_v55 = vpop.permute.xlu0 %2991 }
 0x52f   : > { %3817 = vset.pattern.permute.xlu1 %v6999_v61 }
 0x530   : > { %2851 = vperm.xlu1 %3817, %v6998_v60  }
 0x531   : > { %v6153_v54 = vpop.permute.xlu0 %3221 }
 0x532   : > { %7019 = vst [vmem:[#allocation43_spill] sm:$0xff] %v6153_v54 }
 0x534   : > { %2855 = vperm.xlu1 %3817, %v6995_v62  }
 0x535   : > { %v6160_v30 = vpop.permute.xlu0 %3245 }
 0x536   : > { %7020 = vst [vmem:[#allocation54_spill] sm:$0xff] %v6160_v30 }
 0x538   : > { %3818 = vset.pattern.permute.xlu1 %v7000_v25 }
 0x539   : > { %2869 = vperm.xlu1 %3818, %v6995_v62   ;;  %v6178_v0 = vpop.permute.xlu0 %2808 }
 0x53d   : > { %3819 = vset.pattern.permute.xlu1 %v7001_v1 }
 0x53e   : > { %2879 = vperm.xlu1 %3819, %v6998_v60  }
 0x542   : > { %3821 = vset.pattern.permute.xlu1 %v7002_v31 }
 0x543   : > { %2893 = vperm.xlu1 %3821, %v6998_v60  }
 0x547   : > { %2897 = vperm.xlu1 %3821, %v6995_v62  }
 0x54b   : > { %3822 = vset.pattern.permute.xlu1 %v7003_v29 }
 0x54c   : > { %2911 = vperm.xlu1 %3822, %v6995_v62  }
 0x550   : > { %3823 = vset.pattern.permute.xlu1 %v7004_v3 }
 0x551   : > { %2921 = vperm.xlu1 %3823, %v6998_v60  }
 0x555   : > { %3825 = vset.pattern.permute.xlu1 %v7005_v26 }
 0x556   : > { %2935 = vperm.xlu1 %3825, %v6998_v60  }
 0x55a   : > { %2939 = vperm.xlu1 %3825, %v6995_v62  }
 0x55e   : > { %3826 = vset.pattern.permute.xlu1 %v7006_v59 }
 0x55f   : > { %2953 = vperm.xlu1 %3826, %v6995_v62  }
 0x563   : > { %3827 = vset.pattern.permute.xlu1 %v7007_v24 }
 0x564   : > { %2963 = vperm.xlu1 %3827, %v6998_v60  }
 0x568   : > { %3828 = vset.pattern.permute.xlu1 %v7008_v34 }
 0x569   : > { %2977 = vperm.xlu1 %3828, %v6998_v60  }
 0x56d   : > { %2981 = vperm.xlu1 %3828, %v6995_v62  }
 0x571   : > { %3829 = vset.pattern.permute.xlu1 %v7009_v58 }
 0x572   : > { %2995 = vperm.xlu1 %3829, %v6995_v62  }
 0x576   : > { %3830 = vset.pattern.permute.xlu1 %v7010_v27 }
 0x577   : > { %3005 = vperm.xlu1 %3830, %v6998_v60  }
 0x57b   : > { %3833 = vset.pattern.permute.xlu1 %v7011_v7 }
 0x57c   : > { %3019 = vperm.xlu1 %3833, %v6998_v60  }
 0x580   : > { %3023 = vperm.xlu1 %3833, %v6995_v62  }
 0x584   : > { %3834 = vset.pattern.permute.xlu1 %v7013_v21 }
 0x585   : > { %3039 = vperm.xlu1 %3834, %v7014_v47  }
 0x588   : > { %v2801_v51 = vpop.permute.xlu1 %2800 }
 0x589   : > { %3835 = vset.pattern.permute.xlu1 %v6996_v28  ;;  %v6164_v44 = vsel %vm2267_vm2, %v2801_v51, 0.0 }
 0x58a   : > { %3049 = vperm.xlu1 %3835, %v7015_v14   ;;  %v6170_v17 = vrot.slane %v6164_v44, %v6813_v19  ;;  %v6174_v63 = vrot.slane %v6164_v44, %v6937_v35  ;;  %v2917_v46 = vrot.slane %v6164_v44, %v6818_v23  ;;  %v2903_v41 = vrot.slane %v6164_v44, %v6815_v49 }
 0x58c   : > { %v2876_v53 = vmul.f32 %v6170_v17, %v6057_v18  ;;  %v2918_v62 = vmul.f32 %v2917_v46, %v2908_v45 }
 0x58e   : > { %3837 = vset.pattern.permute.xlu1 %v6997_v43 }
 0x58f   : > { %3063 = vperm.xlu1 %3837, %v7015_v14   ;;  %v2803_v33 = vpop.permute.xlu1 %2802 }
 0x593   : > { %3067 = vperm.xlu1 %3837, %v7014_v47  }
 0x597   : > { %3838 = vset.pattern.permute.xlu1 %v6999_v61 }
 0x598   : > { %3081 = vperm.xlu1 %3838, %v7014_v47  }
 0x59c   : > { %3839 = vset.pattern.permute.xlu1 %v7000_v25 }
 0x59d   : > { %3091 = vperm.xlu1 %3839, %v7015_v14  }
 0x5a0   : > { %v6130_v5 = vpop.permute.xlu1 %2813 }
 0x5a1   : > { %3840 = vset.pattern.permute.xlu1 %v7001_v1 }
 0x5a2   : > { %3105 = vperm.xlu1 %3840, %v7015_v14  }
 0x5a5   : > { %v6136_v39 = vpop.permute.xlu1 %2827 }
 0x5a6   : > { %3109 = vperm.xlu1 %3840, %v7014_v47  }
 0x5aa   : > { %3843 = vset.pattern.permute.xlu1 %v7002_v31  ;;  %v6142_v13 = vpop.permute.xlu1 %2837 }
 0x5ab   : > { %3123 = vperm.xlu1 %3843, %v7014_v47  }
 0x5af   : > { %3844 = vset.pattern.permute.xlu1 %v7003_v29  ;;  %v6148_v57 = vpop.permute.xlu1 %2851 }
 0x5b0   : > { %3133 = vperm.xlu1 %3844, %v7015_v14  }
 0x5b3   : > { %v6151_v40 = vpop.permute.xlu1 %2855 }
 0x5b4   : > { %3845 = vset.pattern.permute.xlu1 %v7004_v3 }
 0x5b5   : > { %3147 = vperm.xlu1 %3845, %v7015_v14  }
 0x5b8   : > { %v6157_v36 = vpop.permute.xlu1 %2869 }
 0x5b9   : > { %3151 = vperm.xlu1 %3845, %v7014_v47  }
 0x5bd   : > { %3848 = vset.pattern.permute.xlu1 %v7005_v26  ;;  %v2880_v11 = vpop.permute.xlu1 %2879  ;;  %v6187_v26 = vpop.permute.xlu0 %3034 }
 0x5be   : > { %3165 = vperm.xlu1 %3848, %v7014_v47   ;;  %v2890_v4 = vmul.f32 %v6174_v63, %v2880_v11 }
 0x5c0   : > { %v3262_v60 = vadd.f32 %v2890_v4, %v2876_v53  ;;  %v7023_v53 = vld [vmem:[#allocation4_spill] sm:$0xff] }
 0x5c1   : > { %v6193_v2 = vpop.permute.xlu0 %3327 }
 0x5c2   : > { %3849 = vset.pattern.permute.xlu1 %v7006_v59  ;;  %v2894_v52 = vpop.permute.xlu1 %2893  ;;  %7022 = vst [vmem:[#allocation23_spill] sm:$0xff] %v6193_v2 }
 0x5c3   : > { %v2904_v28 = vmul.f32 %v2903_v41, %v2894_v52  ;;  %3175 = vperm.xlu1 %3849, %v7015_v14   ;;  %v2805_v52 = vsel %vm2267_vm2, %v2803_v33, 0.0 }
 0x5c4   : > { %v2973_v33 = vrot.slane %v2805_v52, %v6809_v16 }
 0x5c5   : > { %v3264_v61 = vadd.f32 %v2918_v62, %v2904_v28  ;;  %v2931_v62 = vrot.slane %v2805_v52, %v7023_v53  ;;  %v2945_v28 = vrot.slane %v2805_v52, %v6811_v10 }
 0x5c6   : > { %v2898_v51 = vpop.permute.xlu1 %2897 }
 0x5c7   : > { %v6189_v54 = vadd.f32 %v3264_v61, %v3262_v60  ;;  %3850 = vset.pattern.permute.xlu1 %v7007_v24  ;;  %v2905_v30 = vmul.f32 %v2903_v41, %v2898_v51  ;;  %v6202_v24 = vpop.permute.xlu0 %3077 }
 0x5c8   : > { %3189 = vperm.xlu1 %3850, %v7015_v14  }
 0x5cb   : > { %v2912_v11 = vpop.permute.xlu1 %2911  ;;  %v6207_v41 = vpop.permute.xlu0 %3365 }
 0x5cc   : > { %v2919_v18 = vmul.f32 %v2917_v46, %v2912_v11  ;;  %3193 = vperm.xlu1 %3850, %v7014_v47   ;;  %7024 = vst [vmem:[#allocation11_spill] sm:$0xff] %v6207_v41  ;;  %v2933_v41 = vmul.f32 %v2931_v62, %v5960_v6  ;;  %v579_v6 = vld [vmem:[%s6367_s14] sm:$0xff] }
 0x5ce   : > { %v6196_v45 = vadd.f32 %v2919_v18, %v2905_v30  ;;  %v7025_v18 = vld [vmem:[#allocation33_spill] sm:$0xff] }
 0x5cf   : > { %v2968_v51 = vpop.permute.xlu0 %2967  ;;  %v2959_v2 = vrot.slane %v2805_v52, %v7025_v18 }
 0x5d0   : > { %3853 = vset.pattern.permute.xlu1 %v7008_v34  ;;  %v2922_v4 = vpop.permute.xlu1 %2921  ;;  %v2975_v15 = vmul.f32 %v2973_v33, %v2968_v51 }
 0x5d1   : > { %3207 = vperm.xlu1 %3853, %v7014_v47   ;;  %v2932_v30 = vmul.f32 %v2931_v62, %v2922_v4 }
 0x5d5   : > { %3854 = vset.pattern.permute.xlu1 %v7009_v58  ;;  %v2936_v46 = vpop.permute.xlu1 %2935 }
 0x5d6   : > { %v2946_v60 = vmul.f32 %v2945_v28, %v2936_v46  ;;  %3217 = vperm.xlu1 %3854, %v7015_v14  }
 0x5d8   : > { %v3266_v61 = vadd.f32 %v2946_v60, %v2932_v30 }
 0x5d9   : > { %v2940_v32 = vpop.permute.xlu1 %2939 }
 0x5da   : > { %3855 = vset.pattern.permute.xlu1 %v7010_v27  ;;  %v2947_v11 = vmul.f32 %v2945_v28, %v2940_v32  ;;  %v2819_v32 = vrot.slane %v6164_v44, %v7023_v53 }
 0x5db   : > { %3231 = vperm.xlu1 %3855, %v7015_v14   ;;  %v2960_v14 = vmul.f32 %v2959_v2, %v6126_v50  ;;  %v2987_v50 = vrot.slane %v2805_v52, %v6813_v19 }
 0x5dc   : > { %v3267_v46 = vadd.f32 %v2947_v11, %v2933_v41  ;;  %v7026_v41 = vld [vmem:[#allocation47_spill] sm:$0xff]  ;;  %v2847_v11 = vrot.slane %v6164_v44, %v7025_v18 }
 0x5de   : > { %v2954_v9 = vpop.permute.xlu1 %2953 }
 0x5df   : > { %v2961_v4 = vmul.f32 %v2959_v2, %v2954_v9  ;;  %3235 = vperm.xlu1 %3855, %v7014_v47  }
 0x5e1   : > { %v3269_v30 = vadd.f32 %v2975_v15, %v2961_v4 }
 0x5e3   : > { %v6216_v60 = vadd.f32 %v3269_v30, %v3267_v46  ;;  %3858 = vset.pattern.permute.xlu1 %v7011_v7  ;;  %v2964_v20 = vpop.permute.xlu1 %2963  ;;  %v2848_v30 = vmul.f32 %v2847_v11, %v6142_v13 }
 0x5e4   : > { %v2974_v42 = vmul.f32 %v2973_v33, %v2964_v20  ;;  %3249 = vperm.xlu1 %3858, %v7014_v47   ;;  %v3001_v20 = vrot.slane %v2805_v52, %v6937_v35  ;;  %v2861_v33 = vrot.slane %v6164_v44, %v6809_v16 }
 0x5e6   : > { %v3268_v28 = vadd.f32 %v2974_v42, %v2960_v14  ;;  %v2862_v4 = vmul.f32 %v2861_v33, %v6148_v57  ;;  %v2863_v57 = vmul.f32 %v2861_v33, %v6151_v40  ;;  %v2821_v40 = vmul.f32 %v2819_v32, %v6130_v5 }
 0x5e8   : > { %v3294_v9 = vadd.f32 %v3268_v28, %v3266_v61  ;;  %3859 = vset.pattern.permute.xlu1 %v7013_v21  ;;  %v2978_v62 = vpop.permute.xlu1 %2977  ;;  %v3015_v28 = vrot.slane %v2805_v52, %v6815_v49 }
 0x5e9   : > { %3322 = vperm.xlu1 %3859, %v579_v6   ;;  %v2988_v14 = vmul.f32 %v2987_v50, %v2978_v62  ;;  %v3029_v6 = vrot.slane %v2805_v52, %v6818_v23  ;;  %v7027_v62 = vld [vmem:[#allocation5_spill] sm:$0xff] }
 0x5ea   : > { %v2849_v52 = vmul.f32 %v2847_v11, %v7027_v62  ;;  %v3059_v11 = vrot.slane %v6059_v48, %v6811_v10 }
 0x5ec   : > { %v2982_v15 = vpop.permute.xlu1 %2981 }
 0x5ed   : > { %3861 = vset.pattern.permute.xlu1 %v7003_v29  ;;  %v2989_v42 = vmul.f32 %v2987_v50, %v2982_v15  ;;  %v2833_v29 = vrot.slane %v6164_v44, %v6811_v10  ;;  %v3260_v15 = vadd.f32 %v2862_v4, %v2848_v30  ;;  %v3002_v44 = vmul.f32 %v3001_v20, %v6145_v55  ;;  %v7028_v50 = vld [vmem:[#allocation13_spill] sm:$0xff] }
 0x5ee   : > { %3401 = vperm.xlu1 %3861, %v7026_v41   ;;  %v2891_v55 = vmul.f32 %v6174_v63, %v7028_v50 }
 0x5ef   : > { %v2834_v46 = vmul.f32 %v2833_v29, %v6016_v37  ;;  %v2835_v37 = vmul.f32 %v2833_v29, %v6136_v39 }
 0x5f1   : > { %v2996_v47 = vpop.permute.xlu1 %2995  ;;  %v3259_v29 = vadd.f32 %v2835_v37, %v2821_v40 }
 0x5f2   : > { %v3003_v2 = vmul.f32 %v3001_v20, %v2996_v47  ;;  %3862 = vset.pattern.permute.xlu1 %v7011_v7  ;;  %v2820_v7 = vmul.f32 %v2819_v32, %v6178_v0  ;;  %v3270_v20 = vadd.f32 %v3002_v44, %v2988_v14 }
 0x5f3   : > { %3473 = vperm.xlu1 %3862, %v7026_v41  }
 0x5f4   : > { %v3271_v61 = vadd.f32 %v3003_v2, %v2989_v42  ;;  %v3258_v13 = vadd.f32 %v2834_v46, %v2820_v7 }
 0x5f6   : > { %v3006_v51 = vpop.permute.xlu1 %3005  ;;  %v3290_v33 = vadd.f32 %v3260_v15, %v3258_v13 }
 0x5f7   : > { %3864 = vset.pattern.permute.xlu1 %v7001_v1  ;;  %v2877_v1 = vmul.f32 %v6170_v17, %v6157_v36  ;;  %v3016_v42 = vmul.f32 %v3015_v28, %v3006_v51  ;;  %v3017_v36 = vmul.f32 %v3015_v28, %v5988_v12  ;;  %v3261_v51 = vadd.f32 %v2863_v57, %v2849_v52 }
 0x5f8   : > { %3383 = vperm.xlu1 %3864, %v7026_v41   ;;  %v3306_v5 = vadd.f32 %v6189_v54, %v3290_v33  ;;  %v3045_v12 = vrot.slane %v6059_v48, %v7023_v53  ;;  %v3087_v57 = vrot.slane %v6059_v48, %v6809_v16 }
 0x5f9   : > { %v3291_v46 = vadd.f32 %v3261_v51, %v3259_v29  ;;  %v7029_v29 = vld [vmem:[#allocation34_spill] sm:$0xff] }
 0x5fb   : > { %v3020_v47 = vpop.permute.xlu1 %3019 }
 0x5fc   : > { %v3030_v0 = vmul.f32 %v3029_v6, %v3020_v47  ;;  %3865 = vset.pattern.permute.xlu1 %v7002_v31  ;;  %v3263_v31 = vadd.f32 %v2891_v55, %v2877_v1  ;;  %v3046_v47 = vmul.f32 %v3045_v12, %v6187_v26  ;;  %v3088_v1 = vmul.f32 %v3087_v57, %v6202_v24 }
 0x5fd   : > { %3392 = vperm.xlu1 %3865, %v7026_v41  }
 0x5fe   : > { %v3272_v2 = vadd.f32 %v3030_v0, %v3016_v42  ;;  %v3293_v63 = vadd.f32 %v6196_v45, %v3263_v31 }
 0x5ff   : > { %v3024_v17 = vpop.permute.xlu1 %3023 }
 0x600   : > { %v3296_v4 = vadd.f32 %v3272_v2, %v3270_v20  ;;  %v3031_v39 = vmul.f32 %v3029_v6, %v3024_v17  ;;  %v3061_v6 = vmul.f32 %v3059_v11, %v6037_v8  ;;  %v3307_v15 = vadd.f32 %v3293_v63, %v3291_v46  ;;  %v582_v2 = vld [vmem:[#allocation2] sm:$0x1]  ;;  %v7031_v46 = vld [vmem:[#allocation20_spill] sm:$0xff] }
 0x601   : > { %3866 = vset.pattern.permute.xlu1 %v7009_v58 }
 0x602   : > { %v3273_v7 = vadd.f32 %v3031_v39, %v3017_v36  ;;  %3455 = vperm.xlu1 %3866, %v7026_v41   ;;  %v3308_v32 = vadd.f32 %v3296_v4, %v3294_v9  ;;  %v3143_v36 = vrot.slane %v6059_v48, %v6818_v23 }
 0x604   : > { %v3297_v30 = vadd.f32 %v3273_v7, %v3271_v61  ;;  %v3040_v14 = vpop.permute.xlu1 %3039  ;;  %v6267_v28 = vadd.f32 %v3308_v32, %v3306_v5  ;;  %v3145_v51 = vmul.f32 %v3143_v36, %v6119_v56  ;;  %v7030_v7 = vld [vmem:[#allocation18_spill] sm:$0xff] }
 0x605   : > { %v3047_v58 = vmul.f32 %v3045_v12, %v3040_v14  ;;  %v3171_v5 = vrot.slane %v7030_v7, %v6811_v10  ;;  %v3199_v10 = vrot.slane %v7030_v7, %v6809_v16  ;;  %v3241_v16 = vrot.slane %v7030_v7, %v6815_v49 }
 0x606   : > { %v3309_v45 = vadd.f32 %v3297_v30, %v6216_v60  ;;  %3867 = vset.pattern.permute.xlu1 %v7010_v27  ;;  %v3073_v27 = vrot.slane %v6059_v48, %v7025_v18 }
 0x607   : > { %v3275_v44 = vadd.f32 %v3061_v6, %v3047_v58  ;;  %3464 = vperm.xlu1 %3867, %v7026_v41   ;;  %v3172_v30 = vmul.f32 %v3171_v5, %v7031_v46 }
 0x608   : > { %v6273_v54 = vadd.f32 %v3309_v45, %v3307_v15 }
 0x609   : > { %v3050_v9 = vpop.permute.xlu1 %3049 }
 0x60a   : > { %v3060_v61 = vmul.f32 %v3059_v11, %v3050_v9 }
 0x60b   : > { %3869 = vset.pattern.permute.xlu1 %v6997_v43 }
 0x60c   : > { %v3274_v8 = vadd.f32 %v3060_v61, %v3046_v47  ;;  %3356 = vperm.xlu1 %3869, %v7026_v41  }
 0x60e   : > { %v3064_v60 = vpop.permute.xlu1 %3063 }
 0x60f   : > { %v3074_v42 = vmul.f32 %v3073_v27, %v3064_v60 }
 0x610   : > { %3870 = vset.pattern.permute.xlu1 %v7000_v25 }
 0x611   : > { %v3276_v0 = vadd.f32 %v3088_v1, %v3074_v42  ;;  %3374 = vperm.xlu1 %3870, %v7026_v41   ;;  %v3213_v42 = vrot.slane %v7030_v7, %v6813_v19 }
 0x612   : > { %v3068_v26 = vpop.permute.xlu1 %3067 }
 0x613   : > { %v3298_v37 = vadd.f32 %v3276_v0, %v3274_v8  ;;  %v3075_v13 = vmul.f32 %v3073_v27, %v3068_v26  ;;  %v3227_v0 = vrot.slane %v7030_v7, %v6937_v35 }
 0x615   : > { %3872 = vset.pattern.permute.xlu1 %v7006_v59  ;;  %v3115_v59 = vrot.slane %v6059_v48, %v6937_v35 }
 0x616   : > { %3428 = vperm.xlu1 %3872, %v7026_v41  }
 0x617   : > { %v3082_v43 = vpop.permute.xlu1 %3081 }
 0x618   : > { %v3089_v62 = vmul.f32 %v3087_v57, %v3082_v43 }
 0x61a   : > { %v3277_v52 = vadd.f32 %v3089_v62, %v3075_v13  ;;  %3873 = vset.pattern.permute.xlu1 %v7008_v34  ;;  %v7032_v13 = vld [vmem:[#allocation50_spill] sm:$0xff] }
 0x61b   : > { %3446 = vperm.xlu1 %3873, %v7026_v41   ;;  %v3214_v43 = vmul.f32 %v3213_v42, %v7032_v13  ;;  %v7033_v62 = vld [vmem:[#allocation54_spill] sm:$0xff] }
 0x61c   : > { %v3299_v24 = vadd.f32 %v3277_v52, %v3275_v44  ;;  %v3092_v50 = vpop.permute.xlu1 %3091  ;;  %v3185_v44 = vrot.slane %v7030_v7, %v7025_v18  ;;  %v3255_v18 = vrot.slane %v7030_v7, %v6818_v23 }
 0x61d   : > { %v3102_v25 = vmul.f32 %v6065_v22, %v3092_v50 }
 0x61e   : > { %v3256_v52 = vmul.f32 %v3255_v18, %v7033_v62 }
 0x61f   : > { %3875 = vset.pattern.permute.xlu1 %v7004_v3  ;;  %v3129_v3 = vrot.slane %v6059_v48, %v6815_v49 }
 0x620   : > { %3410 = vperm.xlu1 %3875, %v7026_v41  }
 0x621   : > { %v3106_v55 = vpop.permute.xlu1 %3105 }
 0x622   : > { %v3116_v20 = vmul.f32 %v3115_v59, %v3106_v55 }
 0x624   : > { %v3278_v40 = vadd.f32 %v3116_v20, %v3102_v25  ;;  %3876 = vset.pattern.permute.xlu1 %v7013_v21  ;;  %v3130_v21 = vmul.f32 %v3129_v3, %v7029_v29 }
 0x625   : > { %v3110_v34 = vpop.permute.xlu1 %3109  ;;  %3540 = vperm.xlu1 %3876, %v582_v2   ;;  %v7034_v2 = vld [vmem:[#allocation49_spill] sm:$0xff] }
 0x626   : > { %v3117_v33 = vmul.f32 %v3115_v59, %v3110_v34  ;;  %v7035_v34 = vld [vmem:[#allocation43_spill] sm:$0xff] }
 0x628   : > { %v3279_v22 = vadd.f32 %v3117_v33, %v6068_v38  ;;  %v3157_v38 = vrot.slane %v7030_v7, %v7023_v53  ;;  %v3229_v33 = vmul.f32 %v3227_v0, %v7035_v34 }
 0x62a   : > { %v3124_v41 = vpop.permute.xlu1 %3123 }
 0x62b   : > { %v3131_v17 = vmul.f32 %v3129_v3, %v3124_v41 }
 0x62d   : > { %v3281_v31 = vadd.f32 %v3145_v51, %v3131_v17 }
 0x62f   : > { %v3301_v4 = vadd.f32 %v3281_v31, %v3279_v22  ;;  %v3134_v39 = vpop.permute.xlu1 %3133 }
 0x630   : > { %v3144_v11 = vmul.f32 %v3143_v36, %v3134_v39 }
 0x631   : > { %v3311_v63 = vadd.f32 %v3301_v4, %v3299_v24 }
 0x632   : > { %v3280_v32 = vadd.f32 %v3144_v11, %v3130_v21 }
 0x634   : > { %v3300_v12 = vadd.f32 %v3280_v32, %v3278_v40  ;;  %v3148_v48 = vpop.permute.xlu1 %3147  ;;  %v3187_v40 = vmul.f32 %v3185_v44, %v7034_v2 }
 0x635   : > { %v3158_v14 = vmul.f32 %v3157_v38, %v3148_v48 }
 0x636   : > { %v3310_v56 = vadd.f32 %v3300_v12, %v3298_v37 }
 0x637   : > { %v3282_v58 = vadd.f32 %v3172_v30, %v3158_v14 }
 0x638   : > { %v3152_v6 = vpop.permute.xlu1 %3151 }
 0x639   : > { %v3159_v22 = vmul.f32 %v3157_v38, %v3152_v6  ;;  %v7036_v6 = vld [vmem:[#allocation23_spill] sm:$0xff] }
 0x63d   : > { %v3166_v15 = vpop.permute.xlu1 %3165 }
 0x63e   : > { %v3173_v35 = vmul.f32 %v3171_v5, %v3166_v15 }
 0x640   : > { %v3283_v31 = vadd.f32 %v3173_v35, %v3159_v22 }
 0x642   : > { %v3176_v45 = vpop.permute.xlu1 %3175 }
 0x643   : > { %v3186_v47 = vmul.f32 %v3185_v44, %v3176_v45  ;;  %v7037_v45 = vld [vmem:[#allocation35_spill] sm:$0xff] }
 0x647   : > { %v3190_v9 = vpop.permute.xlu1 %3189 }
 0x648   : > { %v3200_v61 = vmul.f32 %v3199_v10, %v3190_v9 }
 0x64a   : > { %v3284_v57 = vadd.f32 %v3200_v61, %v3186_v47 }
 0x64b   : > { %v3194_v8 = vpop.permute.xlu1 %3193 }
 0x64c   : > { %v3302_v27 = vadd.f32 %v3284_v57, %v3282_v58  ;;  %v3201_v55 = vmul.f32 %v3199_v10, %v3194_v8  ;;  %v7038_v10 = vld [vmem:[#allocation36_spill] sm:$0xff] }
 0x64e   : > { %v3285_v3 = vadd.f32 %v3201_v55, %v3187_v40 }
 0x650   : > { %v3208_v60 = vpop.permute.xlu1 %3207  ;;  %v3303_v29 = vadd.f32 %v3285_v3, %v3283_v31 }
 0x651   : > { %v3215_v23 = vmul.f32 %v3213_v42, %v3208_v60 }
 0x653   : > { %v3287_v4 = vadd.f32 %v3229_v33, %v3215_v23 }
 0x655   : > { %v3218_v1 = vpop.permute.xlu1 %3217 }
 0x656   : > { %v3228_v26 = vmul.f32 %v3227_v0, %v3218_v1  ;;  %v7039_v1 = vld [vmem:[#allocation11_spill] sm:$0xff] }
 0x657   : > { %v3371_v42 = vrot.slane %v7039_v1, %v7023_v53 }
 0x658   : > { %v3286_v50 = vadd.f32 %v3228_v26, %v3214_v43 }
 0x65a   : > { %v3232_v37 = vpop.permute.xlu1 %3231 }
 0x65b   : > { %v3242_v24 = vmul.f32 %v3241_v16, %v3232_v37 }
 0x65d   : > { %v3288_v25 = vadd.f32 %v3256_v52, %v3242_v24 }
 0x65e   : > { %v3236_v59 = vpop.permute.xlu1 %3235 }
 0x65f   : > { %v3304_v19 = vadd.f32 %v3288_v25, %v3286_v50  ;;  %v3243_v41 = vmul.f32 %v3241_v16, %v3236_v59 }
 0x661   : > { %v3312_v20 = vadd.f32 %v3304_v19, %v3302_v27 }
 0x663   : > { %v3250_v36 = vpop.permute.xlu1 %3249  ;;  %v3316_v49 = vadd.f32 %v3312_v20, %v3310_v56  ;;  %v3438_v56 = vpop.permute.xlu0 %3437 }
 0x664   : > { %v3257_v17 = vmul.f32 %v3255_v18, %v3250_v36  ;;  %v3443_v37 = vrot.slane %v3438_v56, %v7023_v53 }
 0x665   : > { %v3318_v51 = vadd.f32 %v3316_v49, %v6267_v28 }
 0x666   : > { %v3289_v39 = vadd.f32 %v3257_v17, %v3243_v41 }
 0x667   : > { %v3348_v47 = vpop.permute.xlu0 %3347 }
 0x668   : > { %v3305_v21 = vadd.f32 %v3289_v39, %v3287_v4  ;;  %v3323_v11 = vpop.permute.xlu1 %3322  ;;  %v3353_v25 = vrot.slane %v3348_v47, %v7023_v53 }
 0x669   : > { %v3330_v58 = vadd.f32 %v3323_v11, %v3318_v51 }
 0x66a   : > { %v3313_v7 = vadd.f32 %v3305_v21, %v3303_v29 }
 0x66b   : > { %v3332_v44 = vadd.f32 %v3330_v58, %v7037_v45  ;;  %v3420_v0 = vpop.permute.xlu0 %3419 }
 0x66c   : > { %v3317_v5 = vadd.f32 %v3313_v7, %v3311_v63  ;;  %v3425_v2 = vrot.slane %v3420_v0, %v7023_v53 }
 0x66d   : > { %v3402_v32 = vpop.permute.xlu1 %3401  ;;  %v3334_v61 = vmax.f32 %v3332_v44, 0.0 }
 0x66e   : > { %v3319_v12 = vadd.f32 %v3317_v5, %v6273_v54  ;;  %v3407_v63 = vrot.slane %v3402_v32, %v7023_v53 }
 0x66f   : > { %v3372_v59 = vmul.f32 %v3371_v42, %v3334_v61  ;;  %v3339_v34 = vpop.permute.xlu0 %3338  ;;  %v3354_v41 = vmul.f32 %v3353_v25, %v3334_v61 }
 0x670   : > { %v3331_v28 = vadd.f32 %v7036_v6, %v3319_v12  ;;  %v3408_v18 = vmul.f32 %v3407_v63, %v3334_v61  ;;  %v3344_v29 = vrot.slane %v3339_v34, %v7023_v53 }
 0x671   : > { %v3486_v31 = vrot.slane %v3372_v59, 1 }
 0x672   : > { %v3474_v48 = vpop.permute.xlu1 %3473  ;;  %v3333_v9 = vadd.f32 %v3331_v28, %v7038_v10  ;;  %v3494_v19 = vrot.slane %v3408_v18, 1  ;;  %v3345_v6 = vmul.f32 %v3344_v29, %v3334_v61 }
 0x673   : > { %v3479_v8 = vrot.slane %v3474_v48, %v7023_v53  ;;  %v3482_v48 = vrot.slane %v3354_v41, 1 }
 0x674   : > { %v3335_v54 = vmax.f32 %v3333_v9, 0.0 }
 0x675   : > { %v3484_v10 = vadd.f32 %v3482_v48, %v3345_v6 }
 0x676   : > { %v3480_v62 = vmul.f32 %v3479_v8, %v3335_v54  ;;  %v3444_v23 = vmul.f32 %v3443_v37, %v3335_v54  ;;  %v3426_v7 = vmul.f32 %v3425_v2, %v3335_v54 }
 0x677   : > { %v3384_v46 = vpop.permute.xlu1 %3383 }
 0x678   : > { %v3389_v27 = vrot.slane %v3384_v46, %v7023_v53  ;;  %v3510_v33 = vrot.slane %v3480_v62, 1  ;;  %v3502_v12 = vrot.slane %v3444_v23, 1  ;;  %v3498_v28 = vrot.slane %v3426_v7, 1 }
 0x67a   : > { %v3390_v52 = vmul.f32 %v3389_v27, %v3334_v61 }
 0x67c   : > { %v3393_v30 = vpop.permute.xlu1 %3392  ;;  %v3490_v36 = vrot.slane %v3390_v52, 1 }
 0x67d   : > { %v3398_v60 = vrot.slane %v3393_v30, %v7023_v53 }
 0x67f   : > { %v3399_v24 = vmul.f32 %v3398_v60, %v3334_v61 }
 0x681   : > { %v3456_v38 = vpop.permute.xlu1 %3455  ;;  %v3496_v49 = vadd.f32 %v3494_v19, %v3399_v24 }
 0x682   : > { %v3461_v13 = vrot.slane %v3456_v38, %v7023_v53 }
 0x683   : > { %v3518_v5 = vrot.slane %v3496_v49, 2 }
 0x684   : > { %v3462_v40 = vmul.f32 %v3461_v13, %v3335_v54 }
 0x686   : > { %v3465_v14 = vpop.permute.xlu1 %3464  ;;  %v3506_v21 = vrot.slane %v3462_v40, 1 }
 0x687   : > { %v3470_v26 = vrot.slane %v3465_v14, %v7023_v53 }
 0x689   : > { %v3471_v55 = vmul.f32 %v3470_v26, %v3335_v54 }
 0x68b   : > { %v3357_v15 = vpop.permute.xlu1 %3356  ;;  %v3512_v51 = vadd.f32 %v3510_v33, %v3471_v55 }
 0x68c   : > { %v3362_v50 = vrot.slane %v3357_v15, %v7023_v53 }
 0x68d   : > { %v3526_v38 = vrot.slane %v3512_v51, 2 }
 0x68e   : > { %v3363_v22 = vmul.f32 %v3362_v50, %v3334_v61 }
 0x690   : > { %v3375_v57 = vpop.permute.xlu1 %3374  ;;  %v3488_v32 = vadd.f32 %v3486_v31, %v3363_v22 }
 0x691   : > { %v3380_v16 = vrot.slane %v3375_v57, %v7023_v53 }
 0x692   : > { %v3514_v15 = vrot.slane %v3488_v32, 2 }
 0x693   : > { %v3381_v20 = vmul.f32 %v3380_v16, %v3334_v61 }
 0x694   : > { %v3516_v8 = vadd.f32 %v3514_v15, %v3484_v10 }
 0x695   : > { %v3429_v43 = vpop.permute.xlu1 %3428  ;;  %v3492_v4 = vadd.f32 %v3490_v36, %v3381_v20 }
 0x696   : > { %v3434_v35 = vrot.slane %v3429_v43, %v7023_v53 }
 0x697   : > { %v3520_v14 = vadd.f32 %v3518_v5, %v3492_v4 }
 0x698   : > { %v3435_v39 = vmul.f32 %v3434_v35, %v3335_v54 }
 0x699   : > { %v3530_v9 = vrot.slane %v3520_v14, 4 }
 0x69a   : > { %v3447_v3 = vpop.permute.xlu1 %3446  ;;  %v3504_v56 = vadd.f32 %v3502_v12, %v3435_v39 }
 0x69b   : > { %v3452_v17 = vrot.slane %v3447_v3, %v7023_v53  ;;  %v3532_v1 = vadd.f32 %v3530_v9, %v3516_v8 }
 0x69c   : > { %v3522_v47 = vrot.slane %v3504_v56, 2 }
 0x69d   : > { %v3453_v11 = vmul.f32 %v3452_v17, %v3335_v54 }
 0x69f   : > { %v3508_v46 = vadd.f32 %v3506_v21, %v3453_v11  ;;  %v3411_v30 = vpop.permute.xlu1 %3410 }
 0x6a0   : > { %v3416_v58 = vrot.slane %v3411_v30, %v7023_v53 }
 0x6a1   : > { %v3528_v45 = vadd.f32 %v3526_v38, %v3508_v46 }
 0x6a2   : > { %v3417_v44 = vmul.f32 %v3416_v58, %v3335_v54 }
 0x6a3   : > { %v3534_v27 = vrot.slane %v3528_v45, 4 }
 0x6a4   : > { %v3500_v63 = vadd.f32 %v3498_v28, %v3417_v44  ;;  %v3541_v57 = vpop.permute.xlu1 %3540 }
 0x6a5   : > { %v3546_v0 = vrot.slane %v3541_v57, %v7023_v53 }
 0x6a6   : > { %v3524_v60 = vadd.f32 %v3522_v47, %v3500_v63 }
 0x6a8   : > { %v3536_v42 = vadd.f32 %v3534_v27, %v3524_v60 }
 0x6aa   : > { %v3537_v18 = vadd.f32 %v3536_v42, %v3532_v1 }
 0x6ac   : > { %v3547_v61 = vadd.f32 %v3546_v0, %v3537_v18 }
 0x6ae   : > { %3548 = vst [vmem:[%s540_s18] sm:$0x1] %v3547_v61 }
 0x6af PF: > { %s29_s26 = sadd.s32 1, %s3884_s26  }
 0x6b0   : > { %p26_p4 = scmp.ge.s32.totalorder %s29_s26, 4  }
 0x6b2   :  { %28 = sbr.rel (!%p26_p4) target bundleno = 3 (0x3), region = 118 }

</bundles_post_ra>
